<compile_context>
chip_gen: v5e
topology: v5e:2x2
jax: 0.10.0
libtpu: 0.0.40
codegen_flags: <defaults>
</compile_context>

<pallas_src>
import numpy as np
import jax
import jax.numpy as jnp
from jax.experimental import pallas as pl
from jax.experimental.pallas import tpu as pltpu


def _round_up(x, m):
    return ((x + m - 1) // m) * m


def _gauss3d_kernel(dv_ref, const_ref, out_ref):
    """Compute one (TM, TG) output tile.

    dv_ref    : (TM, 8)      rows = flattened (b,a,n); cols 0..2 = dx,dy,dz
    const_ref : (4, G_pad)   fully VMEM-resident; rows 0..2 = grid xyz, row 3 = coeff
    out_ref   : (TM, TG)     output tile
    """
    TG = out_ref.shape[1]                              # static block width
    col = pl.multiple_of(pl.program_id(1) * TG, 128)   # lane window for this tile
    g = const_ref[:, pl.ds(col, TG)]                   # (4, TG)

    dv = dv_ref[...]                                   # (TM, 8)
    x = dv[:, 0:1] - g[0:1, :]                         # broadcast -> (TM, TG)
    y = dv[:, 1:2] - g[1:2, :]
    z = dv[:, 2:3] - g[2:3, :]
    sq = x * x + y * y + z * z                         # exact squared distance (VPU)
    out_ref[...] = jnp.exp(g[3:4, :] * sq)             # exp on the EUP


def make_gaussian_smearing_3d_polar(cutoff=10.0, grid_size=(20, 20, 30),
                                    tm=512, tg=4096):
    """Build the module's buffers (grid, widths) deterministically and return a
    forward function implemented with a Pallas kernel.

    tm: row tile (multiple of 8); clamped for small inputs.
    tg: lane tile (multiple of 128); clamped for small grids.
    """
    g0, g1, g2 = grid_size
    offsets0 = jnp.linspace(0.0, cutoff, g0, dtype=jnp.float32)
    offsets1 = jnp.linspace(0.0, np.pi, g1, dtype=jnp.float32)
    offsets2 = jnp.linspace(-np.pi, np.pi, g2, dtype=jnp.float32)
    grids = jnp.meshgrid(offsets0, offsets1, offsets2, indexing="ij")
    grid = jnp.stack(grids, axis=-1)                                  # (G0,G1,G2,3)
    widths0 = (offsets0[1] - offsets0[0]) * jnp.ones_like(grids[0])
    widths1 = (offsets1[1] - offsets1[0]) * jnp.ones_like(grids[1])
    widths2 = (offsets2[1] - offsets2[0]) * jnp.ones_like(grids[2])
    widths = jnp.stack([widths0, widths1, widths2], axis=-1)          # (G0,G1,G2,3)

    G = g0 * g1 * g2
    TG = _round_up(min(int(tg), _round_up(G, 128)), 128)
    G_pad = _round_up(G, TG)   # only the constants are lane-padded, not the output

    grid_t = grid.reshape(G, 3).T.astype(jnp.float32)                 # (3, G)
    w_mean = jnp.mean(widths, axis=-1).reshape(1, G).astype(jnp.float32)
    coeff = (-0.5 / (w_mean * w_mean)).astype(jnp.float32)            # (1, G)

    # One small VMEM-resident constant: rows 0..2 grid xyz, row 3 coeff.
    # Padded lanes: grid=0, coeff=0 -> exp(0)=1, but they only ever land in
    # masked boundary stores so they never reach the output.
    const = jnp.concatenate([grid_t, coeff], axis=0)                  # (4, G)
    const = jnp.pad(const, ((0, 0), (0, G_pad - G)))                  # (4, G_pad)

    def forward(distance_vector):
        B, A, N, three = distance_vector.shape
        assert three == 3
        M = B * A * N
        dv = distance_vector.reshape(M, 3).astype(jnp.float32)
        # Pad the 3 components out to 8 lanes for clean aligned loads.
        dv = jnp.pad(dv, ((0, 0), (0, 5)))                            # (M, 8)

        # Row tile: large by default, clamped (to a multiple of 8) for small M.
        TM = _round_up(min(int(tm), _round_up(M, 8)), 8)

        grid_m = pl.cdiv(M, TM)
        grid_g = pl.cdiv(G, TG)

        cost = pl.CostEstimate(
            flops=9 * M * G,
            transcendentals=M * G,
            bytes_accessed=4 * M * G + 4 * M * 8 + 4 * 4 * G_pad,
        )

        out = pl.pallas_call(
            _gauss3d_kernel,
            # Exact output shape: every byte written exactly once, boundary
            # tiles use masked stores, no post-kernel slice/copy.
            out_shape=jax.ShapeDtypeStruct((M, G), jnp.float32),
            grid_spec=pltpu.PrefetchScalarGridSpec(
                num_scalar_prefetch=0,
                grid=(grid_m, grid_g),     # M first: shards across TCs on v7x
                in_specs=[
                    pl.BlockSpec((TM, 8), lambda i, j: (i, 0)),        # dv row tile
                    pl.BlockSpec((4, G_pad), lambda i, j: (0, 0)),     # resident consts
                ],
                out_specs=pl.BlockSpec((TM, TG), lambda i, j: (i, j)),
            ),
            compiler_params=pltpu.CompilerParams(
                dimension_semantics=("parallel", "parallel"),
                # 2 x 8 MiB output buffers + ~0.5 MiB inputs; 40 MiB covers
                # v5e's 16 MiB default scoped limit and leaves headroom, while
                # staying well under v7x's 64 MiB physical VMEM.
                vmem_limit_bytes=40 << 20,
            ),
            cost_estimate=cost,
        )(dv, const)

        return out.reshape(B, A, N, g0, g1, g2)   # contiguous -> free bitcast

    return forward, grid, widths


def _reference(distance_vector, grid, widths):
    """Pure-JAX reference matching the PyTorch semantics (norm then square ==
    sum of squared differences)."""
    diff = grid[None, None, None] - distance_vector[:, :, :, None, None, None, :]
    sq = jnp.sum(diff * diff, axis=-1)
    w = jnp.mean(widths, axis=-1)
    coeff = -0.5 / (w * w)
    return jnp.exp(coeff * sq)


if __name__ == "__main__":
    # Small shapes consistent with the module: dv is (B, A, N, 3).
    B, A, N = 2, 3, 4
    cutoff = 10.0
    grid_size = (20, 20, 30)   # module default -> output (B, A, N, 20, 20, 30)

    key = jax.random.PRNGKey(0)
    distance_vector = jax.random.normal(key, (B, A, N, 3), dtype=jnp.float32) * 3.0

    forward, grid_buf, widths_buf = make_gaussian_smearing_3d_polar(
        cutoff=cutoff, grid_size=grid_size)

    out = forward(distance_vector)
    out = jax.block_until_ready(out)

    assert out.shape == (B, A, N) + grid_size, out.shape

    ref = _reference(distance_vector, grid_buf, widths_buf)
    ref = jax.block_until_ready(ref)
    np.testing.assert_allclose(np.asarray(out), np.asarray(ref),
                               rtol=1e-5, atol=1e-6)

    print("KERNEL_OK")
</pallas_src>

<mosaic_0001>
module attributes {stable_mosaic.version = 11 : i64} {
  func.func @_gauss3d_kernel(%arg0: i32, %arg1: i32, %arg2: memref<24x8xf32, #tpu.memory_space<vmem>>, %arg3: memref<4x12288xf32, #tpu.memory_space<vmem>>, %arg4: memref<24x4096xf32, #tpu.memory_space<vmem>>) attributes {dimension_semantics = [#tpu.dimension_semantics<parallel>, #tpu.dimension_semantics<parallel>], iteration_bounds = array<i64: 1, 3>, scalar_prefetch = 0 : i64, scratch_operands = 0 : i64, tpu.core_type = #tpu.core_type<tc>, window_params = [{transform_indices = @transform_0, window_bounds = array<i64: 24, 8>}, {pipeline_mode = #tpu.pipeline_mode<synchronous>, transform_indices = @transform_1, window_bounds = array<i64: 4, 12288>}, {transform_indices = @transform_2, window_bounds = array<i64: 24, 4096>}]} {
    %c4096_i32 = arith.constant 4096 : i32
    %0 = arith.muli %arg1, %c4096_i32 : i32
    %1 = tpu.assume_multiple %0, 128 : i32
    %c0 = arith.constant 0 : index
    %2 = arith.index_cast %1 : i32 to index
    %3 = vector.load %arg3[%c0, %2] : memref<4x12288xf32, #tpu.memory_space<vmem>>, vector<4x4096xf32>
    %c0_0 = arith.constant 0 : index
    %c0_1 = arith.constant 0 : index
    %4 = vector.load %arg2[%c0_0, %c0_1] : memref<24x8xf32, #tpu.memory_space<vmem>>, vector<24x8xf32>
    %5 = vector.extract_strided_slice %4 {offsets = [0, 0], sizes = [24, 1], strides = [1, 1]} : vector<24x8xf32> to vector<24x1xf32>
    %6 = vector.extract_strided_slice %3 {offsets = [0, 0], sizes = [1, 4096], strides = [1, 1]} : vector<4x4096xf32> to vector<1x4096xf32>
    %7 = vector.broadcast %5 : vector<24x1xf32> to vector<24x4096xf32>
    %8 = vector.broadcast %6 : vector<1x4096xf32> to vector<24x4096xf32>
    %9 = arith.subf %7, %8 : vector<24x4096xf32>
    %10 = vector.extract_strided_slice %4 {offsets = [0, 1], sizes = [24, 1], strides = [1, 1]} : vector<24x8xf32> to vector<24x1xf32>
    %11 = vector.extract_strided_slice %3 {offsets = [1, 0], sizes = [1, 4096], strides = [1, 1]} : vector<4x4096xf32> to vector<1x4096xf32>
    %12 = vector.broadcast %10 : vector<24x1xf32> to vector<24x4096xf32>
    %13 = vector.broadcast %11 : vector<1x4096xf32> to vector<24x4096xf32>
    %14 = arith.subf %12, %13 : vector<24x4096xf32>
    %15 = vector.extract_strided_slice %4 {offsets = [0, 2], sizes = [24, 1], strides = [1, 1]} : vector<24x8xf32> to vector<24x1xf32>
    %16 = vector.extract_strided_slice %3 {offsets = [2, 0], sizes = [1, 4096], strides = [1, 1]} : vector<4x4096xf32> to vector<1x4096xf32>
    %17 = vector.broadcast %15 : vector<24x1xf32> to vector<24x4096xf32>
    %18 = vector.broadcast %16 : vector<1x4096xf32> to vector<24x4096xf32>
    %19 = arith.subf %17, %18 : vector<24x4096xf32>
    %20 = arith.mulf %9, %9 : vector<24x4096xf32>
    %21 = arith.mulf %14, %14 : vector<24x4096xf32>
    %22 = arith.addf %20, %21 : vector<24x4096xf32>
    %23 = arith.mulf %19, %19 : vector<24x4096xf32>
    %24 = arith.addf %22, %23 : vector<24x4096xf32>
    %25 = vector.extract_strided_slice %3 {offsets = [3, 0], sizes = [1, 4096], strides = [1, 1]} : vector<4x4096xf32> to vector<1x4096xf32>
    %26 = vector.broadcast %25 : vector<1x4096xf32> to vector<24x4096xf32>
    %27 = arith.mulf %26, %24 : vector<24x4096xf32>
    %28 = math.exp %27 : vector<24x4096xf32>
    %c0_2 = arith.constant 0 : index
    %c0_3 = arith.constant 0 : index
    %29 = vector.load %arg4[%c0_2, %c0_3] : memref<24x4096xf32, #tpu.memory_space<vmem>>, vector<24x4096xf32>
    tpu.vector_store %arg4[%c0_2, %c0_3], %28 {strides = array<i32>} : memref<24x4096xf32, #tpu.memory_space<vmem>>, vector<24x4096xf32>,
    return
  }
  func.func @transform_0(%arg0: i32, %arg1: i32) -> (i32, i32) {
    %c0_i32 = arith.constant 0 : i32
    %c0_i32_0 = arith.constant 0 : i32
    return %arg0, %c0_i32 : i32, i32
  }
  func.func @transform_1(%arg0: i32, %arg1: i32) -> (i32, i32) {
    %c0_i32 = arith.constant 0 : i32
    %c0_i32_0 = arith.constant 0 : i32
    %c0_i32_1 = arith.constant 0 : i32
    return %c0_i32, %c0_i32_0 : i32, i32
  }
  func.func @transform_2(%arg0: i32, %arg1: i32) -> (i32, i32) {
    %c0_i32 = arith.constant 0 : i32
    return %arg0, %arg1 : i32, i32
  }
}

</mosaic_0001>

<bundles_post_ra>
// kernel: tpu_custom_call.1
= control target key start
LH: loop header
LB: loop body
LE: loop exit
PB: predicated region body
PF: predicated region fallthrough
CT: control target
= control target key end

     0   :  { %7 = vsyncpa [#allocation3], 0  ;;  %s5413_s0 = inlined_call_operand.vmem [shape: f32[24,8], index: 0, kind: input, shape index: {}]   ;;  %s5414_s1 = inlined_call_operand.hbm [shape: f32[4,12288], index: 1, kind: input, shape index: {}]   ;;  %s5415_s2 = inlined_call_operand.hbm [shape: f32[24,12000], index: 2, kind: output, shape index: {}]  }
   0x1   :  { %8 = vsyncpa [#allocation4], 0 }
   0x2   :  { %10 = vsyncpa [#allocation4 + $0x1], 0  ;;  %s2346_s9 = smov 0   ;;  %s2348_s10 = smov 0  }
   0x3   :  { %s2350_s11 = smov 0   ;;  %s2352_s12 = smov 0  }
   0x4   :  { %s2354_s13 = smov 0   ;;  %s2356_s14 = smov 0  }
   0x5 LB: > { %s1911_s15 = sadd.s32 4294967295, %s2322_s14   ;;  %s1912_s16 = sadd.s32 4294967294, %s2322_s14   ;;  %s2322_s14 = sphi %s2356_s14, %s16_s14   ;;  %s2318_s13 = sphi %s2354_s13, %s6614_s13   ;;  %s2314_s12 = sphi %s2352_s12, %s6613_s12   ;;  %s2310_s11 = sphi %s2350_s11, %s6612_s11   ;;  %s2306_s10 = sphi %s2348_s10, %s6611_s10   ;;  %s2302_s9 = sphi %s2346_s9, %s6610_s9  }
   0x6   : > { %s25_s17 = sadd.s32 1, %s2318_s13  ;;  %s84_s18 = sadd.s32 1, %s2310_s11 }
   0x7   : > { %p26_p0 = scmp.ge.s32.totalorder %s25_s17, 3  ;;  %p94_p1 = scmp.ne.s32.totalorder %s2310_s11, %s2306_s10 }
   0x8   : > { %p95_p2 = scmp.eq.s32.totalorder %s1911_s15, 2  ;;  %p100_p3 = scmp.ne.s32.totalorder %s2306_s10, %s2302_s9 }
   0x9   : > { %s6616_s17 = smov (%p26_p0, %s25_s17), 0  ;;  %p101_p5 = scmp.eq.s32.totalorder %s1912_s16, 2 }
   0xa   : > { %p2386_p4 = por %p95_p2, %p94_p1  ;;  %s80_s20 = ssub.s32 %s2318_s13, %s6616_s17 }
   0xb   : > { %p1913_p6 = scmp.ge.s32.totalorder %s2322_s14, 1  ;;  %p82_p7 = scmp.eq.s32.totalorder %s80_s20, 0 }
   0xc   : > { %p2393_p8 = por %p101_p5, %p100_p3  ;;  %p108_p9 = scmp.lt.s32.totalorder %s2322_s14, 4 }
   0xd   : > { %s2399_s22 = scalar_select %p82_p7, %s2310_s11, %s84_s18  }
   0xe   : > { %p109_p10 = pnand %p1913_p6, %p108_p9  ;;  %p1943_p11 = scmp.eq.s32.totalorder %s1911_s15, 0 }
   0xf   : > { %s129_s25 = sshll.u32 %s5414_s1, 4  ;;  %s2324_s26 = smov [#allocation2]   ;;  %s130_s25 = int_to_ptr.hbm [resolvable:$true] %s129_s25 }
  0x10   : > { %p1935_p12 = pneg %p109_p10  ;;  %s131_s27 = sshll.u32 %s2324_s26, 4  ;;  %s132_s27 = int_to_ptr.vmem [resolvable:$true] %s131_s27 }
  0x11   : > { %144 = sbr.rel (%p109_p10) target bundleno = 607 (0x25f), region = 28 }
  0x12   : > { %p1936_p13 = pnand %p1943_p11, %p1935_p12 }
  0x14   : > { %1938 = dma.hbm_to_vmem [thread:$0]  (!%p1936_p13), %s130_s25, 6144, %s132_s27, [#allocation3]  }
  0x16   : > { %2293 = dma.done.wait (%p1943_p11), [#allocation3], 6144  }
  0x17   : > { %2295 = vsyncadd (%p1943_p11), [#allocation3], 4294961152  ;;  %v2325_v0 = vmov 0   ;;  %s164_s28 = sand.u32 1, %s2306_s10   ;;  %v2326_v1 = vmov 1   ;;  %v202_v2 = vld [vmem:[%s5413_s0 + $0x10] sm:$0xff] }
  0x18   : > { %2001 = vset.pattern.permute.xlu1 %v2325_v0  ;;  %2000 = vset.pattern.permute.xlu0 %v2325_v0  ;;  %v200_v3 = vld [vmem:[%s5413_s0] sm:$0xff]  ;;  %v201_v4 = vld [vmem:[%s5413_s0 + $0x8] sm:$0xff]  ;;  %v2327_v5 = vmov 2   ;;  %s1918_s7 = sshll.u32 %s2314_s12, 12  ;;  %s3611_s18 = smul.u32 768, %s164_s28 }
  0x19   : > { %2003 = vset.pattern.permute.xlu2 %v2326_v1  ;;  %215 = vperm.xlu1 %2001, %v202_v2   ;;  %s180_s8 = sshra.s32 %s1918_s7, 7  ;;  %s5343_s23 = scalar_lea.sflag [#allocation4], %s164_s28 }
  0x1a   : > { %205 = vperm.xlu0 %2000, %v200_v3   ;;  %431 = vperm.xlu2 %2003, %v201_v4   ;;  %s1919_s15 = sshll.u32 %s180_s8, 2  ;;  %s3650_s20 = scalar_lea.vmem [#allocation5], %s3611_s18 }
  0x1b   : > { %s2415_s16 = scalar_lea.vmem [#allocation2], %s1919_s15  ;;  %s1920_s24 = sshll.u32 (%p2386_p4), %s2314_s12, 5 }
  0x1c   : > { %v2418_v6 = vld [vmem:[%s2415_s16] sm:$0xff]  ;;  %v2421_v7 = vld [vmem:[%s2415_s16 + $0x8] sm:$0xff]  ;;  %v2424_v8 = vld [vmem:[%s2415_s16 + $0x10] sm:$0xff]  ;;  %s1804_s25 = ssub.s32 (%p2386_p4), 94, %s1920_s24 }
  0x1d   : > { %5712 = vst [vmem:[#allocation8_spill] sm:$0xff] %v2418_v6  ;;  %v2427_v9 = vld [vmem:[%s2415_s16 + $0x18] sm:$0xff]  ;;  %v2430_v10 = vld [vmem:[%s2415_s16 + $0x20] sm:$0xff]  ;;  %v2433_v11 = vld [vmem:[%s2415_s16 + $0x28] sm:$0xff]  ;;  %v234_v14 = vperm.slane %v2418_v6, 0  ;;  %v235_v15 = vperm.slane %v2418_v6, 4 }
  0x1e   : > { %5713 = vst [vmem:[#allocation9_spill] sm:$0xff] %v2421_v7  ;;  %v2436_v12 = vld [vmem:[%s2415_s16 + $0x30] sm:$0xff]  ;;  %v2439_v13 = vld [vmem:[%s2415_s16 + $0x38] sm:$0xff]  ;;  %v236_v16 = vperm.slane %v2421_v7, 0  ;;  %v237_v17 = vperm.slane %v2421_v7, 4  ;;  %v2446_v18 = vld [vmem:[%s2415_s16 + $0x40] sm:$0xff] }
  0x1f   : > { %5714 = vst [vmem:[#allocation10_spill] sm:$0xff] %v2424_v8  ;;  %v2449_v19 = vld [vmem:[%s2415_s16 + $0x48] sm:$0xff]  ;;  %v238_v20 = vperm.slane %v2424_v8, 0  ;;  %v239_v21 = vperm.slane %v2424_v8, 4  ;;  %v240_v22 = vperm.slane %v2427_v9, 0  ;;  %v241_v23 = vperm.slane %v2427_v9, 4 }
  0x20   : > { %5715 = vst [vmem:[#allocation11_spill] sm:$0xff] %v2427_v9  ;;  %v2456_v24 = vld [vmem:[%s2415_s16 + $0x50] sm:$0xff]  ;;  %v2459_v25 = vld [vmem:[%s2415_s16 + $0x58] sm:$0xff]  ;;  %v242_v26 = vperm.slane %v2430_v10, 0  ;;  %v243_v27 = vperm.slane %v2430_v10, 4  ;;  %v244_v28 = vperm.slane %v2433_v11, 0 }
  0x21   : > { %2002 = vset.pattern.permute.xlu1 %v2326_v1  ;;  %5716 = vst [vmem:[#allocation12_spill] sm:$0xff] %v2430_v10  ;;  %v245_v29 = vperm.slane %v2433_v11, 4  ;;  %v2466_v30 = vld [vmem:[%s2415_s16 + $0x60] sm:$0xff]  ;;  %v2469_v31 = vld [vmem:[%s2415_s16 + $0x68] sm:$0xff]  ;;  %v246_v32 = vperm.slane %v2436_v12, 0  ;;  %v247_v33 = vperm.slane %v2436_v12, 4 }
  0x22   : > { %210 = vperm.xlu0 %2000, %v201_v4   ;;  %427 = vperm.xlu1 %2002, %v200_v3   ;;  %5717 = vst [vmem:[#allocation13_spill] sm:$0xff] %v2433_v11  ;;  %v248_v34 = vperm.slane %v2439_v13, 0  ;;  %v249_v35 = vperm.slane %v2439_v13, 4  ;;  %v2476_v36 = vld [vmem:[%s2415_s16 + $0x70] sm:$0xff]  ;;  %v2479_v37 = vld [vmem:[%s2415_s16 + $0x78] sm:$0xff]  ;;  %v250_v38 = vperm.slane %v2446_v18, 0 }
  0x23   : > { %435 = vperm.xlu2 %2003, %v202_v2   ;;  %5718 = vst [vmem:[#allocation14_spill] sm:$0xff] %v2436_v12  ;;  %v251_v39 = vperm.slane %v2446_v18, 4  ;;  %v252_v40 = vperm.slane %v2449_v19, 0  ;;  %v253_v41 = vperm.slane %v2449_v19, 4  ;;  %v254_v42 = vperm.slane %v2456_v24, 0  ;;  %p1805_p0 = scmp.lt.s32.totalorder (%p2386_p4), %s1804_s25, 32 }
  0x24   : > { %5719 = vst [vmem:[#allocation15_spill] sm:$0xff] %v2439_v13  ;;  %v255_v43 = vperm.slane %v2456_v24, 4  ;;  %v256_v44 = vperm.slane %v2459_v25, 0  ;;  %v257_v45 = vperm.slane %v2459_v25, 4  ;;  %v258_v46 = vperm.slane %v2466_v30, 0 }
  0x25   : > { %5720 = vst [vmem:[#allocation16_spill] sm:$0xff] %v2446_v18  ;;  %v259_v47 = vperm.slane %v2466_v30, 4  ;;  %v260_v48 = vperm.slane %v2469_v31, 0  ;;  %v261_v49 = vperm.slane %v2469_v31, 4  ;;  %v262_v50 = vperm.slane %v2476_v36, 0 }
  0x26   : > { %5721 = vst [vmem:[#allocation17_spill] sm:$0xff] %v2449_v19  ;;  %v263_v51 = vperm.slane %v2476_v36, 4  ;;  %v264_v52 = vperm.slane %v2479_v37, 0  ;;  %v265_v53 = vperm.slane %v2479_v37, 4  ;;  %v2497_v54 = vperm.slane %v234_v14, 0 }
  0x27   : > { %5722 = vst [vmem:[#allocation18_spill] sm:$0xff] %v2456_v24  ;;  %v2499_v55 = vperm.slane %v235_v15, 0  ;;  %v2501_v56 = vperm.slane %v236_v16, 0  ;;  %v2503_v57 = vperm.slane %v237_v17, 0  ;;  %v2505_v58 = vperm.slane %v238_v20, 0 }
  0x28   : > { %5723 = vst [vmem:[#allocation19_spill] sm:$0xff] %v2459_v25  ;;  %v2507_v59 = vperm.slane %v239_v21, 0  ;;  %v2509_v60 = vperm.slane %v240_v22, 0  ;;  %v2511_v61 = vperm.slane %v241_v23, 0  ;;  %v2513_v62 = vperm.slane %v242_v26, 0 }
  0x29   : > { %5724 = vst [vmem:[#allocation20_spill] sm:$0xff] %v2466_v30  ;;  %v2515_v63 = vperm.slane %v243_v27, 0  ;;  %v2517_v0 = vperm.slane %v244_v28, 0  ;;  %v2519_v1 = vperm.slane %v245_v29, 0  ;;  %v2529_v14 = vperm.slane %v250_v38, 0 }
  0x2a   : > { %2004 = vset.pattern.permute.xlu0 %v2327_v5  ;;  %2005 = vset.pattern.permute.xlu1 %v2327_v5  ;;  %5725 = vst [vmem:[#allocation21_spill] sm:$0xff] %v2469_v31  ;;  %v2531_v15 = vperm.slane %v251_v39, 0  ;;  %v2533_v16 = vperm.slane %v252_v40, 0  ;;  %v2535_v17 = vperm.slane %v253_v41, 0  ;;  %v2537_v20 = vperm.slane %v254_v42, 0 }
  0x2b   : > { %631 = vperm.xlu0 %2004, %v200_v3   ;;  %635 = vperm.xlu1 %2005, %v201_v4   ;;  %5726 = vst [vmem:[#allocation22_spill] sm:$0xff] %v2476_v36  ;;  %v2523_v3 = vperm.slane %v247_v33, 0  ;;  %v2525_v4 = vperm.slane %v248_v34, 0  ;;  %v2539_v21 = vperm.slane %v255_v43, 0  ;;  %v2541_v22 = vperm.slane %v256_v44, 0 }
  0x2c   : > { %2006 = vset.pattern.permute.xlu2 %v2327_v5  ;;  %5727 = vst [vmem:[#allocation23_spill] sm:$0xff] %v2479_v37  ;;  %v2527_v5 = vperm.slane %v249_v35, 0  ;;  %v2543_v23 = vperm.slane %v257_v45, 0  ;;  %v2545_v26 = vperm.slane %v258_v46, 0  ;;  %v2547_v27 = vperm.slane %v259_v47, 0 }
  0x2d   : > { %639 = vperm.xlu2 %2006, %v202_v2   ;;  %5728 = vst [vmem:[#allocation24_spill] sm:$0xff] %v2497_v54  ;;  %v2521_v2 = vperm.slane %v246_v32, 0  ;;  %v2549_v28 = vperm.slane %v260_v48, 0  ;;  %v2551_v29 = vperm.slane %v261_v49, 0  ;;  %v2553_v32 = vperm.slane %v262_v50, 0 }
  0x2e   : > { %5729 = vst [vmem:[#allocation25_spill] sm:$0xff] %v2499_v55  ;;  %v2555_v33 = vperm.slane %v263_v51, 0  ;;  %v2557_v34 = vperm.slane %v264_v52, 0  ;;  %v2559_v35 = vperm.slane %v265_v53, 0  ;;  %v438_v38 = vperm.slane %v2418_v6, 1 }
  0x2f   : > { %5730 = vst [vmem:[#allocation26_spill] sm:$0xff] %v2501_v56  ;;  %v439_v39 = vperm.slane %v2418_v6, 5  ;;  %v440_v40 = vperm.slane %v2421_v7, 1  ;;  %v441_v41 = vperm.slane %v2421_v7, 5  ;;  %v442_v42 = vperm.slane %v2424_v8, 1 }
  0x30   : > { %5731 = vst [vmem:[#allocation27_spill] sm:$0xff] %v2503_v57  ;;  %v443_v43 = vperm.slane %v2424_v8, 5  ;;  %v444_v44 = vperm.slane %v2427_v9, 1  ;;  %v445_v45 = vperm.slane %v2427_v9, 5  ;;  %v446_v46 = vperm.slane %v2430_v10, 1 }
  0x31   : > { %5732 = vst [vmem:[#allocation28_spill] sm:$0xff] %v2505_v58  ;;  %v447_v47 = vperm.slane %v2430_v10, 5  ;;  %v448_v48 = vperm.slane %v2433_v11, 1  ;;  %v449_v49 = vperm.slane %v2433_v11, 5  ;;  %v450_v50 = vperm.slane %v2436_v12, 1 }
  0x32   : > { %5733 = vst [vmem:[#allocation29_spill] sm:$0xff] %v2507_v59  ;;  %v451_v51 = vperm.slane %v2436_v12, 5  ;;  %v452_v52 = vperm.slane %v2439_v13, 1  ;;  %v453_v53 = vperm.slane %v2439_v13, 5  ;;  %v454_v8 = vperm.slane %v2446_v18, 1 }
  0x33   : > { %5734 = vst [vmem:[#allocation30_spill] sm:$0xff] %v2509_v60  ;;  %v455_v9 = vperm.slane %v2446_v18, 5  ;;  %v456_v7 = vperm.slane %v2449_v19, 1  ;;  %v457_v10 = vperm.slane %v2449_v19, 5  ;;  %v458_v11 = vperm.slane %v2456_v24, 1 }
  0x34   : > { %5735 = vst [vmem:[#allocation31_spill] sm:$0xff] %v2511_v61  ;;  %v460_v12 = vperm.slane %v2459_v25, 1  ;;  %v462_v13 = vperm.slane %v2466_v30, 1  ;;  %v464_v18 = vperm.slane %v2469_v31, 1  ;;  %v466_v19 = vperm.slane %v2476_v36, 1 }
  0x35   : > { %5736 = vst [vmem:[#allocation32_spill] sm:$0xff] %v2513_v62 }
  0x36   : > { %5737 = vst [vmem:[#allocation33_spill] sm:$0xff] %v2515_v63 }
  0x37   : > { %5738 = vst [vmem:[#allocation34_spill] sm:$0xff] %v2517_v0 }
  0x38   : > { %5739 = vst [vmem:[#allocation35_spill] sm:$0xff] %v2519_v1 }
  0x39   : > { %5740 = vst [vmem:[#allocation36_spill] sm:$0xff] %v2521_v2 }
  0x3a   : > { %5741 = vst [vmem:[#allocation37_spill] sm:$0xff] %v2523_v3 }
  0x3b   : > { %5742 = vst [vmem:[#allocation38_spill] sm:$0xff] %v2525_v4 }
  0x3c   : > { %5743 = vst [vmem:[#allocation39_spill] sm:$0xff] %v2527_v5 }
  0x3d   : > { %5744 = vst [vmem:[#allocation40_spill] sm:$0xff] %v2529_v14 }
  0x3e   : > { %5745 = vst [vmem:[#allocation41_spill] sm:$0xff] %v2531_v15 }
  0x3f   : > { %5746 = vst [vmem:[#allocation42_spill] sm:$0xff] %v2533_v16 }
  0x40   : > { %5747 = vst [vmem:[#allocation43_spill] sm:$0xff] %v2535_v17 }
  0x41   : > { %5748 = vst [vmem:[#allocation44_spill] sm:$0xff] %v2537_v20 }
  0x42   : > { %5749 = vst [vmem:[#allocation45_spill] sm:$0xff] %v2539_v21  ;;  %v2613_v21 = vperm.slane %v447_v47, 1  ;;  %v2633_v47 = vperm.slane %v457_v10, 1  ;;  %v2653_v10 = vperm.slane %v466_v19, 1 }
  0x43   : > { %5750 = vst [vmem:[#allocation46_spill] sm:$0xff] %v2541_v22  ;;  %v2609_v22 = vperm.slane %v445_v45, 1  ;;  %v2629_v45 = vperm.slane %v455_v9, 1 }
  0x44   : > { %5751 = vst [vmem:[#allocation47_spill] sm:$0xff] %v2543_v23  ;;  %v2605_v23 = vperm.slane %v443_v43, 1  ;;  %v2625_v43 = vperm.slane %v453_v53, 1 }
  0x45   : > { %5752 = vst [vmem:[#allocation48_spill] sm:$0xff] %v2545_v26  ;;  %v2601_v26 = vperm.slane %v441_v41, 1  ;;  %v2621_v41 = vperm.slane %v451_v51, 1 }
  0x46   : > { %5753 = vst [vmem:[#allocation49_spill] sm:$0xff] %v2547_v27  ;;  %v2597_v27 = vperm.slane %v439_v39, 1  ;;  %v2617_v39 = vperm.slane %v449_v49, 1 }
  0x47   : > { %5754 = vst [vmem:[#allocation50_spill] sm:$0xff] %v2549_v28  ;;  %v2595_v28 = vperm.slane %v438_v38, 1  ;;  %v2615_v38 = vperm.slane %v448_v48, 1  ;;  %v2635_v48 = vperm.slane %v458_v11, 1 }
  0x48   : > { %5755 = vst [vmem:[#allocation51_spill] sm:$0xff] %v2551_v29  ;;  %v468_v29 = vperm.slane %v2479_v37, 1 }
  0x49   : > { %5756 = vst [vmem:[#allocation52_spill] sm:$0xff] %v2553_v32  ;;  %v465_v32 = vperm.slane %v2469_v31, 5  ;;  %v2607_v31 = vperm.slane %v444_v44, 1  ;;  %v2627_v44 = vperm.slane %v454_v8, 1  ;;  %v2647_v8 = vperm.slane %v464_v18, 1 }
  0x4a   : > { %5757 = vst [vmem:[#allocation53_spill] sm:$0xff] %v2555_v33  ;;  %v463_v33 = vperm.slane %v2466_v30, 5  ;;  %v2603_v30 = vperm.slane %v442_v42, 1  ;;  %v2623_v42 = vperm.slane %v452_v52, 1  ;;  %v2643_v52 = vperm.slane %v462_v13, 1 }
  0x4b   : > { %5758 = vst [vmem:[#allocation54_spill] sm:$0xff] %v2557_v34  ;;  %v461_v34 = vperm.slane %v2459_v25, 5  ;;  %v2599_v25 = vperm.slane %v440_v40, 1  ;;  %v2619_v40 = vperm.slane %v450_v50, 1  ;;  %v2639_v50 = vperm.slane %v460_v12, 1 }
  0x4c   : > { %5759 = vst [vmem:[#allocation55_spill] sm:$0xff] %v2559_v35  ;;  %v459_v35 = vperm.slane %v2456_v24, 5  ;;  %v469_v24 = vperm.slane %v2479_v37, 5  ;;  %v2645_v53 = vperm.slane %v463_v33, 1  ;;  %v2649_v9 = vperm.slane %v465_v32, 1 }
  0x4d   : > { %5761 = vst [vmem:[#allocation57_spill] sm:$0xff] %v2595_v28  ;;  %v2641_v51 = vperm.slane %v461_v34, 1 }
  0x4e   : > { %5762 = vst [vmem:[#allocation58_spill] sm:$0xff] %v2597_v27  ;;  %v2637_v49 = vperm.slane %v459_v35, 1  ;;  %v2657_v35 = vperm.slane %v468_v29, 1  ;;  %v2659_v12 = vperm.slane %v469_v24, 1 }
  0x4f   : > { %5763 = vst [vmem:[#allocation59_spill] sm:$0xff] %v2599_v25 }
  0x50   : > { %5764 = vst [vmem:[#allocation60_spill] sm:$0xff] %v2601_v26 }
  0x51   : > { %5765 = vst [vmem:[#allocation61_spill] sm:$0xff] %v2603_v30 }
  0x52   : > { %5766 = vst [vmem:[#allocation62_spill] sm:$0xff] %v2605_v23 }
  0x53   : > { %5767 = vst [vmem:[#allocation63_spill] sm:$0xff] %v2607_v31 }
  0x54   : > { %5768 = vst [vmem:[#allocation64_spill] sm:$0xff] %v2609_v22 }
  0x55   : > { %5770 = vst [vmem:[#allocation66_spill] sm:$0xff] %v2613_v21 }
  0x56   : > { %5771 = vst [vmem:[#allocation67_spill] sm:$0xff] %v2615_v38 }
  0x57   : > { %5772 = vst [vmem:[#allocation68_spill] sm:$0xff] %v2617_v39 }
  0x58   : > { %5773 = vst [vmem:[#allocation69_spill] sm:$0xff] %v2619_v40 }
  0x59   : > { %5774 = vst [vmem:[#allocation70_spill] sm:$0xff] %v2621_v41 }
  0x5a   : > { %5775 = vst [vmem:[#allocation71_spill] sm:$0xff] %v2623_v42 }
  0x5b   : > { %5776 = vst [vmem:[#allocation72_spill] sm:$0xff] %v2625_v43 }
  0x5c   : > { %5777 = vst [vmem:[#allocation73_spill] sm:$0xff] %v2627_v44 }
  0x5d   : > { %5778 = vst [vmem:[#allocation74_spill] sm:$0xff] %v2629_v45 }
  0x5e   : > { %5780 = vst [vmem:[#allocation76_spill] sm:$0xff] %v2633_v47 }
  0x5f   : > { %5781 = vst [vmem:[#allocation77_spill] sm:$0xff] %v2635_v48 }
  0x60   : > { %5782 = vst [vmem:[#allocation78_spill] sm:$0xff] %v2637_v49 }
  0x61   : > { %5783 = vst [vmem:[#allocation79_spill] sm:$0xff] %v2639_v50 }
  0x62   : > { %5784 = vst [vmem:[#allocation80_spill] sm:$0xff] %v2641_v51 }
  0x63   : > { %5785 = vst [vmem:[#allocation81_spill] sm:$0xff] %v2643_v52 }
  0x64   : > { %5786 = vst [vmem:[#allocation82_spill] sm:$0xff] %v2645_v53 }
  0x65   : > { %5787 = vst [vmem:[#allocation83_spill] sm:$0xff] %v2647_v8 }
  0x66   : > { %5788 = vst [vmem:[#allocation84_spill] sm:$0xff] %v2649_v9 }
  0x67   : > { %5789 = vst [vmem:[#allocation85_spill] sm:$0xff] %v2653_v10 }
  0x68   : > { %5791 = vst [vmem:[#allocation87_spill] sm:$0xff] %v2657_v35 }
  0x69   : > { %5792 = vst [vmem:[#allocation88_spill] sm:$0xff] %v2659_v12 }
  0x74   : > { %v2581_v6 = vpop.permute.xlu2 %431 }
  0x75   : > { %5760 = vst [vmem:[#allocation56_spill] sm:$0xff] %v2581_v6  ;;  %v467_v6 = vperm.slane %v2476_v36, 5  ;;  %v2611_v36 = vperm.slane %v446_v46, 1  ;;  %v2631_v46 = vperm.slane %v456_v7, 1 }
  0x77   : > { %5769 = vst [vmem:[#allocation65_spill] sm:$0xff] %v2611_v36  ;;  %v2655_v11 = vperm.slane %v467_v6, 1 }
  0x78   : > { %5779 = vst [vmem:[#allocation75_spill] sm:$0xff] %v2631_v46 }
  0x79   : > { %5790 = vst [vmem:[#allocation86_spill] sm:$0xff] %v2655_v11 }
  0x7d   : > { %v2651_v7 = vpop.permute.xlu2 %435 }
  0x7e   : > { %v2663_v13 = vsub.f32 %v2651_v7, %v2595_v28  ;;  %v2667_v18 = vsub.f32 %v2651_v7, %v2597_v27  ;;  %v2671_v32 = vsub.f32 %v2651_v7, %v2599_v25  ;;  %v2675_v6 = vsub.f32 %v2651_v7, %v2601_v26 }
  0x7f   : > { %v2679_v19 = vsub.f32 %v2651_v7, %v2603_v30  ;;  %v2683_v24 = vsub.f32 %v2651_v7, %v2605_v23  ;;  %v2687_v29 = vsub.f32 %v2651_v7, %v2607_v31  ;;  %v2691_v33 = vsub.f32 %v2651_v7, %v2609_v22 }
  0x80   : > { %5793 = vst [vmem:[#allocation89_spill] sm:$0xff] %v2663_v13  ;;  %v2695_v26 = vsub.f32 %v2651_v7, %v2611_v36  ;;  %v2699_v30 = vsub.f32 %v2651_v7, %v2613_v21  ;;  %v2703_v23 = vsub.f32 %v2651_v7, %v2615_v38  ;;  %v2707_v31 = vsub.f32 %v2651_v7, %v2617_v39 }
  0x81   : > { %5794 = vst [vmem:[#allocation90_spill] sm:$0xff] %v2667_v18  ;;  %v5859_v18 = vld [vmem:[#allocation20_spill] sm:$0xff] }
  0x82   : > { %5795 = vst [vmem:[#allocation91_spill] sm:$0xff] %v2671_v32  ;;  %v666_v13 = vperm.slane %v5859_v18, 2 }
  0x83   : > { %5796 = vst [vmem:[#allocation92_spill] sm:$0xff] %v2675_v6 }
  0x84   : > { %5797 = vst [vmem:[#allocation93_spill] sm:$0xff] %v2679_v19 }
  0x85   : > { %5798 = vst [vmem:[#allocation94_spill] sm:$0xff] %v2683_v24 }
  0x86   : > { %5799 = vst [vmem:[#allocation95_spill] sm:$0xff] %v2687_v29 }
  0x87   : > { %5800 = vst [vmem:[#allocation96_spill] sm:$0xff] %v2691_v33 }
  0x88   : > { %5801 = vst [vmem:[#allocation97_spill] sm:$0xff] %v2695_v26 }
  0x89   : > { %5802 = vst [vmem:[#allocation98_spill] sm:$0xff] %v2699_v30 }
  0x8a   : > { %5803 = vst [vmem:[#allocation99_spill] sm:$0xff] %v2703_v23 }
  0x8b   : > { %v216_v34 = vpop.permute.xlu1 %215  ;;  %5804 = vst [vmem:[#allocation100_spill] sm:$0xff] %v2707_v31 }
  0x8c   : > { %v2710_v25 = vsub.f32 %v216_v34, %v2497_v54  ;;  %v2713_v22 = vsub.f32 %v216_v34, %v2499_v55  ;;  %v2716_v36 = vsub.f32 %v216_v34, %v2501_v56  ;;  %v2719_v21 = vsub.f32 %v216_v34, %v2503_v57 }
  0x8d   : > { %v2722_v27 = vsub.f32 %v216_v34, %v2505_v58  ;;  %v2725_v38 = vsub.f32 %v216_v34, %v2507_v59  ;;  %v2728_v39 = vsub.f32 %v216_v34, %v2509_v60  ;;  %v2731_v28 = vsub.f32 %v216_v34, %v2511_v61 }
  0x8e   : > { %v2734_v55 = vsub.f32 %v216_v34, %v2513_v62  ;;  %v2737_v56 = vsub.f32 %v216_v34, %v2515_v63  ;;  %v2740_v57 = vsub.f32 %v216_v34, %v2517_v0  ;;  %v2743_v58 = vsub.f32 %v216_v34, %v2519_v1 }
  0x8f   : > { %v2746_v59 = vsub.f32 %v216_v34, %v2521_v2  ;;  %v2749_v60 = vsub.f32 %v216_v34, %v2523_v3  ;;  %v2752_v61 = vsub.f32 %v216_v34, %v2525_v4  ;;  %v2755_v62 = vsub.f32 %v216_v34, %v2527_v5  ;;  %v5805_v4 = vld [vmem:[#allocation45_spill] sm:$0xff]  ;;  %v5807_v5 = vld [vmem:[#allocation46_spill] sm:$0xff] }
  0x90   : > { %v2758_v63 = vsub.f32 %v216_v34, %v2529_v14  ;;  %v2761_v0 = vsub.f32 %v216_v34, %v2531_v15  ;;  %v2764_v1 = vsub.f32 %v216_v34, %v2533_v16  ;;  %v2767_v2 = vsub.f32 %v216_v34, %v2535_v17  ;;  %v5809_v14 = vld [vmem:[#allocation47_spill] sm:$0xff]  ;;  %v5811_v15 = vld [vmem:[#allocation48_spill] sm:$0xff]  ;;  %v5813_v16 = vld [vmem:[#allocation49_spill] sm:$0xff] }
  0x91   : > { %v2770_v3 = vsub.f32 %v216_v34, %v2537_v20  ;;  %v2773_v54 = vsub.f32 %v216_v34, %v5805_v4  ;;  %v2776_v31 = vsub.f32 %v216_v34, %v5807_v5  ;;  %v2779_v23 = vsub.f32 %v216_v34, %v5809_v14  ;;  %v5815_v17 = vld [vmem:[#allocation50_spill] sm:$0xff]  ;;  %v5817_v20 = vld [vmem:[#allocation51_spill] sm:$0xff]  ;;  %v5819_v4 = vld [vmem:[#allocation52_spill] sm:$0xff] }
  0x92   : > { %v2782_v30 = vsub.f32 %v216_v34, %v5811_v15  ;;  %v2785_v26 = vsub.f32 %v216_v34, %v5813_v16  ;;  %v2788_v33 = vsub.f32 %v216_v34, %v5815_v17  ;;  %v2791_v29 = vsub.f32 %v216_v34, %v5817_v20  ;;  %v5821_v5 = vld [vmem:[#allocation53_spill] sm:$0xff]  ;;  %v5823_v14 = vld [vmem:[#allocation54_spill] sm:$0xff]  ;;  %v5825_v15 = vld [vmem:[#allocation55_spill] sm:$0xff] }
  0x93   : > { %5806 = vst [vmem:[#allocation101_spill] sm:$0xff] %v2773_v54  ;;  %v2794_v24 = vsub.f32 %v216_v34, %v5819_v4  ;;  %v2797_v19 = vsub.f32 %v216_v34, %v5821_v5  ;;  %v2800_v6 = vsub.f32 %v216_v34, %v5823_v14  ;;  %v2803_v32 = vsub.f32 %v216_v34, %v5825_v15  ;;  %v5847_v15 = vld [vmem:[#allocation8_spill] sm:$0xff]  ;;  %v5848_v17 = vld [vmem:[#allocation9_spill] sm:$0xff] }
  0x94   : > { %5808 = vst [vmem:[#allocation102_spill] sm:$0xff] %v2776_v31  ;;  %v2807_v16 = vsub.f32 %v2651_v7, %v2619_v40  ;;  %v2811_v20 = vsub.f32 %v2651_v7, %v2621_v41  ;;  %v2815_v4 = vsub.f32 %v2651_v7, %v2623_v42  ;;  %v2819_v5 = vsub.f32 %v2651_v7, %v2625_v43 }
  0x95   : > { %5810 = vst [vmem:[#allocation103_spill] sm:$0xff] %v2779_v23  ;;  %v2823_v34 = vsub.f32 %v2651_v7, %v2627_v44  ;;  %v2827_v40 = vsub.f32 %v2651_v7, %v2629_v45  ;;  %v2831_v41 = vsub.f32 %v2651_v7, %v2631_v46  ;;  %v2835_v42 = vsub.f32 %v2651_v7, %v2633_v47 }
  0x96   : > { %5812 = vst [vmem:[#allocation104_spill] sm:$0xff] %v2782_v30  ;;  %v2839_v43 = vsub.f32 %v2651_v7, %v2635_v48  ;;  %v2843_v44 = vsub.f32 %v2651_v7, %v2637_v49  ;;  %v2847_v45 = vsub.f32 %v2651_v7, %v2639_v50  ;;  %v2851_v46 = vsub.f32 %v2651_v7, %v2641_v51 }
  0x97   : > { %5814 = vst [vmem:[#allocation105_spill] sm:$0xff] %v2785_v26  ;;  %v2855_v47 = vsub.f32 %v2651_v7, %v2643_v52  ;;  %v2859_v48 = vsub.f32 %v2651_v7, %v2645_v53  ;;  %v2863_v49 = vsub.f32 %v2651_v7, %v2647_v8  ;;  %v2867_v50 = vsub.f32 %v2651_v7, %v2649_v9 }
  0x98   : > { %5816 = vst [vmem:[#allocation106_spill] sm:$0xff] %v2788_v33  ;;  %v2871_v51 = vsub.f32 %v2651_v7, %v2653_v10  ;;  %v2875_v52 = vsub.f32 %v2651_v7, %v2655_v11  ;;  %v2879_v53 = vsub.f32 %v2651_v7, %v2657_v35  ;;  %v2883_v8 = vsub.f32 %v2651_v7, %v2659_v12  ;;  %v5852_v12 = vld [vmem:[#allocation13_spill] sm:$0xff] }
  0x99   : > { %5818 = vst [vmem:[#allocation107_spill] sm:$0xff] %v2791_v29  ;;  %v642_v14 = vperm.slane %v5847_v15, 2  ;;  %v643_v9 = vperm.slane %v5847_v15, 6  ;;  %v645_v10 = vperm.slane %v5848_v17, 6  ;;  %v653_v15 = vperm.slane %v5852_v12, 6 }
  0x9a   : > { %5820 = vst [vmem:[#allocation108_spill] sm:$0xff] %v2794_v24  ;;  %v672_v29 = vperm.slane %v2479_v37, 2 }
  0x9b   : > { %5822 = vst [vmem:[#allocation109_spill] sm:$0xff] %v2797_v19  ;;  %v5861_v19 = vld [vmem:[#allocation22_spill] sm:$0xff]  ;;  %v2917_v33 = vperm.slane %v642_v14, 2  ;;  %v2919_v26 = vperm.slane %v643_v9, 2  ;;  %v2923_v30 = vperm.slane %v645_v10, 2  ;;  %v2939_v9 = vperm.slane %v653_v15, 2 }
  0x9c   : > { %5824 = vst [vmem:[#allocation110_spill] sm:$0xff] %v2800_v6  ;;  %v670_v24 = vperm.slane %v5861_v19, 2 }
  0x9d   : > { %5826 = vst [vmem:[#allocation111_spill] sm:$0xff] %v2803_v32  ;;  %v5860_v32 = vld [vmem:[#allocation21_spill] sm:$0xff] }
  0x9e   : > { %5827 = vst [vmem:[#allocation112_spill] sm:$0xff] %v2807_v16  ;;  %v668_v6 = vperm.slane %v5860_v32, 2 }
  0x9f   : > { %5828 = vst [vmem:[#allocation113_spill] sm:$0xff] %v2811_v20  ;;  %v5858_v20 = vld [vmem:[#allocation19_spill] sm:$0xff] }
  0xa0   : > { %5829 = vst [vmem:[#allocation114_spill] sm:$0xff] %v2815_v4  ;;  %v664_v16 = vperm.slane %v5858_v20, 2 }
  0xa1   : > { %5830 = vst [vmem:[#allocation115_spill] sm:$0xff] %v2819_v5  ;;  %v5857_v5 = vld [vmem:[#allocation18_spill] sm:$0xff] }
  0xa2   : > { %5831 = vst [vmem:[#allocation116_spill] sm:$0xff] %v2823_v34  ;;  %v662_v4 = vperm.slane %v5857_v5, 2 }
  0xa3   : > { %5832 = vst [vmem:[#allocation117_spill] sm:$0xff] %v2827_v40  ;;  %v5856_v40 = vld [vmem:[#allocation17_spill] sm:$0xff] }
  0xa4   : > { %5833 = vst [vmem:[#allocation118_spill] sm:$0xff] %v2831_v41  ;;  %v660_v34 = vperm.slane %v5856_v40, 2 }
  0xa5   : > { %5834 = vst [vmem:[#allocation119_spill] sm:$0xff] %v2835_v42  ;;  %v5855_v42 = vld [vmem:[#allocation16_spill] sm:$0xff] }
  0xa6   : > { %5835 = vst [vmem:[#allocation120_spill] sm:$0xff] %v2839_v43  ;;  %v658_v41 = vperm.slane %v5855_v42, 2 }
  0xa7   : > { %5836 = vst [vmem:[#allocation121_spill] sm:$0xff] %v2843_v44  ;;  %v5854_v44 = vld [vmem:[#allocation15_spill] sm:$0xff] }
  0xa8   : > { %5837 = vst [vmem:[#allocation122_spill] sm:$0xff] %v2847_v45  ;;  %v656_v43 = vperm.slane %v5854_v44, 2 }
  0xa9   : > { %5838 = vst [vmem:[#allocation123_spill] sm:$0xff] %v2851_v46  ;;  %v5853_v46 = vld [vmem:[#allocation14_spill] sm:$0xff] }
  0xaa   : > { %5839 = vst [vmem:[#allocation124_spill] sm:$0xff] %v2855_v47  ;;  %v654_v45 = vperm.slane %v5853_v46, 2 }
  0xab   : > { %5840 = vst [vmem:[#allocation125_spill] sm:$0xff] %v2859_v48 }
  0xac   : > { %5841 = vst [vmem:[#allocation126_spill] sm:$0xff] %v2863_v49 }
  0xad   : > { %5842 = vst [vmem:[#allocation127_spill] sm:$0xff] %v2867_v50  ;;  %v644_v50 = vperm.slane %v5848_v17, 2  ;;  %v655_v17 = vperm.slane %v5853_v46, 6  ;;  %v665_v46 = vperm.slane %v5858_v20, 6 }
  0xae   : > { %5843 = vst [vmem:[#allocation128_spill] sm:$0xff] %v2871_v51  ;;  %v5849_v51 = vld [vmem:[#allocation10_spill] sm:$0xff] }
  0xaf   : > { %5844 = vst [vmem:[#allocation129_spill] sm:$0xff] %v2875_v52  ;;  %v646_v49 = vperm.slane %v5849_v51, 2  ;;  %v647_v11 = vperm.slane %v5849_v51, 6  ;;  %v5850_v52 = vld [vmem:[#allocation11_spill] sm:$0xff]  ;;  %v657_v51 = vperm.slane %v5854_v44, 6  ;;  %v667_v44 = vperm.slane %v5859_v18, 6 }
  0xb0   : > { %5845 = vst [vmem:[#allocation130_spill] sm:$0xff] %v2879_v53  ;;  %v648_v48 = vperm.slane %v5850_v52, 2  ;;  %v649_v35 = vperm.slane %v5850_v52, 6  ;;  %v5851_v53 = vld [vmem:[#allocation12_spill] sm:$0xff]  ;;  %v659_v52 = vperm.slane %v5855_v42, 6  ;;  %v669_v42 = vperm.slane %v5860_v32, 6 }
  0xb1   : > { %5846 = vst [vmem:[#allocation131_spill] sm:$0xff] %v2883_v8  ;;  %v650_v47 = vperm.slane %v5851_v53, 2  ;;  %v651_v7 = vperm.slane %v5851_v53, 6  ;;  %v652_v8 = vperm.slane %v5852_v12, 2  ;;  %v661_v53 = vperm.slane %v5856_v40, 6 }
  0xb2   : > { %v663_v12 = vperm.slane %v5857_v5, 6  ;;  %v671_v40 = vperm.slane %v5861_v19, 6  ;;  %v673_v5 = vperm.slane %v2479_v37, 6  ;;  %5862 = vst [vmem:[#allocation132_spill] sm:$0xff] %v2917_v33  ;;  %v2921_v20 = vperm.slane %v644_v50, 2 }
  0xb3   : > { %5863 = vst [vmem:[#allocation133_spill] sm:$0xff] %v2919_v26  ;;  %v2925_v18 = vperm.slane %v646_v49, 2  ;;  %v2927_v23 = vperm.slane %v647_v11, 2  ;;  %v2929_v32 = vperm.slane %v648_v48, 2  ;;  %v2931_v31 = vperm.slane %v649_v35, 2 }
  0xb4   : > { %5864 = vst [vmem:[#allocation134_spill] sm:$0xff] %v2921_v20  ;;  %v2933_v19 = vperm.slane %v650_v47, 2  ;;  %v2935_v54 = vperm.slane %v651_v7, 2  ;;  %v2937_v14 = vperm.slane %v652_v8, 2  ;;  %v2941_v50 = vperm.slane %v654_v45, 2  ;;  %v640_v8 = vpop.permute.xlu2 %639 }
  0xb5   : > { %5865 = vst [vmem:[#allocation135_spill] sm:$0xff] %v2923_v30  ;;  %v2943_v10 = vperm.slane %v655_v17, 2  ;;  %v2945_v49 = vperm.slane %v656_v43, 2  ;;  %v2947_v11 = vperm.slane %v657_v51, 2  ;;  %v2949_v48 = vperm.slane %v658_v41, 2 }
  0xb6   : > { %5866 = vst [vmem:[#allocation136_spill] sm:$0xff] %v2925_v18  ;;  %v2951_v35 = vperm.slane %v659_v52, 2  ;;  %v2953_v47 = vperm.slane %v660_v34, 2  ;;  %v2955_v7 = vperm.slane %v661_v53, 2  ;;  %v2957_v37 = vperm.slane %v662_v4, 2 }
  0xb7   : > { %5867 = vst [vmem:[#allocation137_spill] sm:$0xff] %v2927_v23  ;;  %v2959_v15 = vperm.slane %v663_v12, 2  ;;  %v2961_v45 = vperm.slane %v664_v16, 2  ;;  %v2963_v17 = vperm.slane %v665_v46, 2  ;;  %v2965_v43 = vperm.slane %v666_v13, 2 }
  0xb8   : > { %5868 = vst [vmem:[#allocation138_spill] sm:$0xff] %v2929_v32  ;;  %v2967_v51 = vperm.slane %v667_v44, 2  ;;  %v2969_v41 = vperm.slane %v668_v6, 2  ;;  %v2971_v52 = vperm.slane %v669_v42, 2  ;;  %v2973_v34 = vperm.slane %v670_v24, 2 }
  0xb9   : > { %5869 = vst [vmem:[#allocation139_spill] sm:$0xff] %v2931_v31  ;;  %v2975_v53 = vperm.slane %v671_v40, 2  ;;  %v2977_v4 = vperm.slane %v672_v29, 2  ;;  %v2979_v12 = vperm.slane %v673_v5, 2  ;;  %v2982_v16 = vsub.f32 %v640_v8, %v2917_v33  ;;  %v5932_v33 = vld [vmem:[#allocation106_spill] sm:$0xff] }
  0xba   : > { %5870 = vst [vmem:[#allocation140_spill] sm:$0xff] %v2933_v19  ;;  %v2985_v46 = vsub.f32 %v640_v8, %v2919_v26  ;;  %v2988_v44 = vsub.f32 %v640_v8, %v2921_v20  ;;  %v2991_v42 = vsub.f32 %v640_v8, %v2923_v30  ;;  %v2994_v13 = vsub.f32 %v640_v8, %v2925_v18  ;;  %v5929_v20 = vld [vmem:[#allocation104_spill] sm:$0xff]  ;;  %v5930_v26 = vld [vmem:[#allocation105_spill] sm:$0xff] }
  0xbb   : > { %5871 = vst [vmem:[#allocation141_spill] sm:$0xff] %v2935_v54  ;;  %v2997_v40 = vsub.f32 %v640_v8, %v2927_v23  ;;  %v3000_v5 = vsub.f32 %v640_v8, %v2929_v32  ;;  %v3003_v6 = vsub.f32 %v640_v8, %v2931_v31  ;;  %v3006_v24 = vsub.f32 %v640_v8, %v2933_v19 }
  0xbc   : > { %5872 = vst [vmem:[#allocation142_spill] sm:$0xff] %v2937_v14  ;;  %v3009_v29 = vsub.f32 %v640_v8, %v2935_v54  ;;  %v3012_v30 = vsub.f32 %v640_v8, %v2937_v14  ;;  %v3015_v18 = vsub.f32 %v640_v8, %v2939_v9  ;;  %v3018_v23 = vsub.f32 %v640_v8, %v2941_v50 }
  0xbd   : > { %5873 = vst [vmem:[#allocation143_spill] sm:$0xff] %v2939_v9  ;;  %v3021_v32 = vsub.f32 %v640_v8, %v2943_v10  ;;  %v3024_v31 = vsub.f32 %v640_v8, %v2945_v49  ;;  %v3027_v19 = vsub.f32 %v640_v8, %v2947_v11  ;;  %v3030_v54 = vsub.f32 %v640_v8, %v2949_v48 }
  0xbe   : > { %5874 = vst [vmem:[#allocation144_spill] sm:$0xff] %v2941_v50  ;;  %v3033_v14 = vsub.f32 %v640_v8, %v2951_v35  ;;  %v3036_v9 = vsub.f32 %v640_v8, %v2953_v47  ;;  %v3039_v50 = vsub.f32 %v640_v8, %v2955_v7 }
  0xbf   : > { %5875 = vst [vmem:[#allocation145_spill] sm:$0xff] %v2943_v10  ;;  %v3042_v10 = vsub.f32 %v640_v8, %v2957_v37 }
  0xc0   : > { %5876 = vst [vmem:[#allocation146_spill] sm:$0xff] %v2945_v49  ;;  %v3045_v49 = vsub.f32 %v640_v8, %v2959_v15 }
  0xc1   : > { %5877 = vst [vmem:[#allocation147_spill] sm:$0xff] %v2947_v11  ;;  %v3048_v11 = vsub.f32 %v640_v8, %v2961_v45 }
  0xc2   : > { %5878 = vst [vmem:[#allocation148_spill] sm:$0xff] %v2949_v48  ;;  %v3051_v48 = vsub.f32 %v640_v8, %v2963_v17 }
  0xc3   : > { %5879 = vst [vmem:[#allocation149_spill] sm:$0xff] %v2951_v35  ;;  %v3054_v35 = vsub.f32 %v640_v8, %v2965_v43 }
  0xc4   : > { %5880 = vst [vmem:[#allocation150_spill] sm:$0xff] %v2953_v47  ;;  %v3057_v47 = vsub.f32 %v640_v8, %v2967_v51 }
  0xc5   : > { %5881 = vst [vmem:[#allocation151_spill] sm:$0xff] %v2955_v7  ;;  %v3060_v7 = vsub.f32 %v640_v8, %v2969_v41 }
  0xc6   : > { %5882 = vst [vmem:[#allocation152_spill] sm:$0xff] %v2957_v37  ;;  %v3063_v37 = vsub.f32 %v640_v8, %v2971_v52 }
  0xc7   : > { %5883 = vst [vmem:[#allocation153_spill] sm:$0xff] %v2959_v15  ;;  %v3066_v15 = vsub.f32 %v640_v8, %v2973_v34 }
  0xc8   : > { %5884 = vst [vmem:[#allocation154_spill] sm:$0xff] %v2961_v45  ;;  %v3069_v45 = vsub.f32 %v640_v8, %v2975_v53 }
  0xc9   : > { %5885 = vst [vmem:[#allocation155_spill] sm:$0xff] %v2963_v17  ;;  %v3072_v17 = vsub.f32 %v640_v8, %v2977_v4 }
  0xca   : > { %5886 = vst [vmem:[#allocation156_spill] sm:$0xff] %v2965_v43  ;;  %v3075_v43 = vsub.f32 %v640_v8, %v2979_v12  ;;  %v3095_v8 = vmul.f32 %v2722_v27, %v2722_v27  ;;  %v3115_v27 = vmul.f32 %v2737_v56, %v2737_v56  ;;  %v3135_v56 = vmul.f32 %v2752_v61, %v2752_v61 }
  0xcb   : > { %5887 = vst [vmem:[#allocation157_spill] sm:$0xff] %v2967_v51  ;;  %v3079_v51 = vmul.f32 %v2710_v25, %v2710_v25  ;;  %v3099_v25 = vmul.f32 %v2725_v38, %v2725_v38  ;;  %v3119_v38 = vmul.f32 %v2740_v57, %v2740_v57  ;;  %v3139_v57 = vmul.f32 %v2755_v62, %v2755_v62 }
  0xcc   : > { %5888 = vst [vmem:[#allocation158_spill] sm:$0xff] %v2969_v41  ;;  %v3155_v61 = vmul.f32 %v2767_v2, %v2767_v2  ;;  %v3159_v62 = vmul.f32 %v2770_v3, %v2770_v3  ;;  %v5928_v41 = vld [vmem:[#allocation103_spill] sm:$0xff]  ;;  %v3175_v2 = vmul.f32 %v5929_v20, %v5929_v20  ;;  %v3179_v3 = vmul.f32 %v5930_v26, %v5930_v26 }
  0xcd   : > { %5889 = vst [vmem:[#allocation159_spill] sm:$0xff] %v2971_v52  ;;  %v3083_v52 = vmul.f32 %v2713_v22, %v2713_v22  ;;  %v3103_v22 = vmul.f32 %v2728_v39, %v2728_v39  ;;  %v3123_v39 = vmul.f32 %v2743_v58, %v2743_v58  ;;  %v3143_v58 = vmul.f32 %v2758_v63, %v2758_v63 }
  0xce   : > { %5890 = vst [vmem:[#allocation160_spill] sm:$0xff] %v2973_v34  ;;  %v3087_v34 = vmul.f32 %v2716_v36, %v2716_v36  ;;  %v3107_v36 = vmul.f32 %v2731_v28, %v2731_v28  ;;  %v3127_v28 = vmul.f32 %v2746_v59, %v2746_v59  ;;  %v3147_v59 = vmul.f32 %v2761_v0, %v2761_v0 }
  0xcf   : > { %5891 = vst [vmem:[#allocation161_spill] sm:$0xff] %v2975_v53  ;;  %v3091_v53 = vmul.f32 %v2719_v21, %v2719_v21  ;;  %v3111_v21 = vmul.f32 %v2734_v55, %v2734_v55  ;;  %v3131_v55 = vmul.f32 %v2749_v60, %v2749_v60  ;;  %v3151_v60 = vmul.f32 %v2764_v1, %v2764_v1 }
  0xd0   : > { %5892 = vst [vmem:[#allocation162_spill] sm:$0xff] %v2977_v4  ;;  %v5927_v4 = vld [vmem:[#allocation102_spill] sm:$0xff]  ;;  %v3171_v1 = vmul.f32 %v5928_v41, %v5928_v41 }
  0xd1   : > { %5893 = vst [vmem:[#allocation163_spill] sm:$0xff] %v2979_v12  ;;  %v5926_v12 = vld [vmem:[#allocation101_spill] sm:$0xff]  ;;  %v3167_v0 = vmul.f32 %v5927_v4, %v5927_v4 }
  0xd2   : > { %5894 = vst [vmem:[#allocation164_spill] sm:$0xff] %v2982_v16  ;;  %v3163_v63 = vmul.f32 %v5926_v12, %v5926_v12  ;;  %v3183_v12 = vmul.f32 %v5932_v33, %v5932_v33  ;;  %v5968_v16 = vld [vmem:[#allocation124_spill] sm:$0xff] }
  0xd3   : > { %5895 = vst [vmem:[#allocation165_spill] sm:$0xff] %v2985_v46  ;;  %v5967_v46 = vld [vmem:[#allocation123_spill] sm:$0xff] }
  0xd4   : > { %5896 = vst [vmem:[#allocation166_spill] sm:$0xff] %v2988_v44  ;;  %v5966_v44 = vld [vmem:[#allocation122_spill] sm:$0xff] }
  0xd5   : > { %5897 = vst [vmem:[#allocation167_spill] sm:$0xff] %v2991_v42  ;;  %v5965_v42 = vld [vmem:[#allocation121_spill] sm:$0xff] }
  0xd6   : > { %5898 = vst [vmem:[#allocation168_spill] sm:$0xff] %v2994_v13  ;;  %v5964_v13 = vld [vmem:[#allocation120_spill] sm:$0xff] }
  0xd7   : > { %5899 = vst [vmem:[#allocation169_spill] sm:$0xff] %v2997_v40  ;;  %v5963_v40 = vld [vmem:[#allocation119_spill] sm:$0xff] }
  0xd8   : > { %5900 = vst [vmem:[#allocation170_spill] sm:$0xff] %v3000_v5  ;;  %v5962_v5 = vld [vmem:[#allocation118_spill] sm:$0xff] }
  0xd9   : > { %5901 = vst [vmem:[#allocation171_spill] sm:$0xff] %v3003_v6  ;;  %v5961_v6 = vld [vmem:[#allocation117_spill] sm:$0xff] }
  0xda   : > { %5902 = vst [vmem:[#allocation172_spill] sm:$0xff] %v3006_v24  ;;  %v5960_v24 = vld [vmem:[#allocation116_spill] sm:$0xff] }
  0xdb   : > { %5903 = vst [vmem:[#allocation173_spill] sm:$0xff] %v3009_v29  ;;  %v5959_v29 = vld [vmem:[#allocation115_spill] sm:$0xff] }
  0xdc   : > { %5904 = vst [vmem:[#allocation174_spill] sm:$0xff] %v3012_v30  ;;  %v5958_v30 = vld [vmem:[#allocation114_spill] sm:$0xff] }
  0xdd   : > { %5905 = vst [vmem:[#allocation175_spill] sm:$0xff] %v3015_v18  ;;  %v5957_v18 = vld [vmem:[#allocation113_spill] sm:$0xff] }
  0xde   : > { %5906 = vst [vmem:[#allocation176_spill] sm:$0xff] %v3018_v23  ;;  %v5956_v23 = vld [vmem:[#allocation112_spill] sm:$0xff] }
  0xdf   : > { %5907 = vst [vmem:[#allocation177_spill] sm:$0xff] %v3021_v32  ;;  %v5955_v32 = vld [vmem:[#allocation100_spill] sm:$0xff] }
  0xe0   : > { %5908 = vst [vmem:[#allocation178_spill] sm:$0xff] %v3024_v31  ;;  %v5954_v31 = vld [vmem:[#allocation99_spill] sm:$0xff] }
  0xe1   : > { %5909 = vst [vmem:[#allocation179_spill] sm:$0xff] %v3027_v19  ;;  %v5953_v19 = vld [vmem:[#allocation98_spill] sm:$0xff] }
  0xe2   : > { %5910 = vst [vmem:[#allocation180_spill] sm:$0xff] %v3030_v54  ;;  %v5952_v54 = vld [vmem:[#allocation97_spill] sm:$0xff] }
  0xe3   : > { %5911 = vst [vmem:[#allocation181_spill] sm:$0xff] %v3033_v14  ;;  %v5951_v14 = vld [vmem:[#allocation96_spill] sm:$0xff] }
  0xe4   : > { %5912 = vst [vmem:[#allocation182_spill] sm:$0xff] %v3036_v9 }
  0xe5   : > { %5913 = vst [vmem:[#allocation183_spill] sm:$0xff] %v3039_v50 }
  0xe6   : > { %5914 = vst [vmem:[#allocation184_spill] sm:$0xff] %v3042_v10  ;;  %v5949_v10 = vld [vmem:[#allocation94_spill] sm:$0xff] }
  0xe7   : > { %5915 = vst [vmem:[#allocation185_spill] sm:$0xff] %v3045_v49  ;;  %v5948_v49 = vld [vmem:[#allocation93_spill] sm:$0xff]  ;;  %v999_v50 = vmul.f32 %v5949_v10, %v5949_v10  ;;  %v1006_v10 = vmul.f32 %v5956_v23, %v5956_v23  ;;  %v1013_v23 = vmul.f32 %v5963_v40, %v5963_v40 }
  0xe8   : > { %5916 = vst [vmem:[#allocation186_spill] sm:$0xff] %v3048_v11  ;;  %v5947_v11 = vld [vmem:[#allocation92_spill] sm:$0xff] }
  0xe9   : > { %5917 = vst [vmem:[#allocation187_spill] sm:$0xff] %v3051_v48 }
  0xea   : > { %5918 = vst [vmem:[#allocation188_spill] sm:$0xff] %v3054_v35 }
  0xeb   : > { %5919 = vst [vmem:[#allocation189_spill] sm:$0xff] %v3057_v47  ;;  %v5945_v47 = vld [vmem:[#allocation90_spill] sm:$0xff] }
  0xec   : > { %5920 = vst [vmem:[#allocation190_spill] sm:$0xff] %v3060_v7  ;;  %v5944_v7 = vld [vmem:[#allocation89_spill] sm:$0xff]  ;;  %v995_v35 = vmul.f32 %v5945_v47, %v5945_v47  ;;  %v1002_v47 = vmul.f32 %v5952_v54, %v5952_v54  ;;  %v1009_v54 = vmul.f32 %v5959_v29, %v5959_v29  ;;  %v1016_v29 = vmul.f32 %v5966_v44, %v5966_v44 }
  0xed   : > { %5921 = vst [vmem:[#allocation191_spill] sm:$0xff] %v3063_v37  ;;  %v5942_v37 = vld [vmem:[#allocation111_spill] sm:$0xff] }
  0xee   : > { %5922 = vst [vmem:[#allocation192_spill] sm:$0xff] %v3066_v15  ;;  %v5940_v15 = vld [vmem:[#allocation110_spill] sm:$0xff]  ;;  %v3203_v33 = vmul.f32 %v5942_v37, %v5942_v37  ;;  %v5950_v37 = vld [vmem:[#allocation95_spill] sm:$0xff] }
  0xef   : > { %5923 = vst [vmem:[#allocation193_spill] sm:$0xff] %v3069_v45  ;;  %v5938_v45 = vld [vmem:[#allocation109_spill] sm:$0xff]  ;;  %v3199_v26 = vmul.f32 %v5940_v15, %v5940_v15  ;;  %v998_v15 = vmul.f32 %v5948_v49, %v5948_v49  ;;  %v1000_v9 = vmul.f32 %v5950_v37, %v5950_v37  ;;  %v1005_v49 = vmul.f32 %v5955_v32, %v5955_v32 }
  0xf0   : > { %5924 = vst [vmem:[#allocation194_spill] sm:$0xff] %v3072_v17  ;;  %v5936_v17 = vld [vmem:[#allocation108_spill] sm:$0xff]  ;;  %v3195_v20 = vmul.f32 %v5938_v45, %v5938_v45  ;;  %v997_v45 = vmul.f32 %v5947_v11, %v5947_v11  ;;  %v1004_v11 = vmul.f32 %v5954_v31, %v5954_v31  ;;  %v1007_v37 = vmul.f32 %v5957_v18, %v5957_v18 }
  0xf1   : > { %5925 = vst [vmem:[#allocation195_spill] sm:$0xff] %v3075_v43  ;;  %v5934_v43 = vld [vmem:[#allocation107_spill] sm:$0xff]  ;;  %v3191_v41 = vmul.f32 %v5936_v17, %v5936_v17  ;;  %v1011_v31 = vmul.f32 %v5961_v6, %v5961_v6  ;;  %v1012_v32 = vmul.f32 %v5962_v5, %v5962_v5  ;;  %v1014_v18 = vmul.f32 %v5964_v13, %v5964_v13 }
  0xf2   : > { %5931 = vst [vmem:[#allocation101_spill] sm:$0xff] %v3179_v3  ;;  %v3187_v4 = vmul.f32 %v5934_v43, %v5934_v43  ;;  %v994_v43 = vmul.f32 %v5944_v7, %v5944_v7  ;;  %v5946_v17 = vld [vmem:[#allocation91_spill] sm:$0xff]  ;;  %v1001_v7 = vmul.f32 %v5951_v14, %v5951_v14  ;;  %v1008_v14 = vmul.f32 %v5958_v30, %v5958_v30 }
  0xf3   : > { %5933 = vst [vmem:[#allocation102_spill] sm:$0xff] %v3183_v12  ;;  %v996_v48 = vmul.f32 %v5946_v17, %v5946_v17  ;;  %v1003_v17 = vmul.f32 %v5953_v19, %v5953_v19  ;;  %v1010_v19 = vmul.f32 %v5960_v24, %v5960_v24  ;;  %v1015_v30 = vmul.f32 %v5965_v42, %v5965_v42  ;;  %v5974_v12 = vld [vmem:[#allocation130_spill] sm:$0xff]  ;;  %v5975_v3 = vld [vmem:[#allocation131_spill] sm:$0xff] }
  0xf4   : > { %5935 = vst [vmem:[#allocation103_spill] sm:$0xff] %v3187_v4  ;;  %v1017_v24 = vmul.f32 %v5967_v46, %v5967_v46  ;;  %v1018_v6 = vmul.f32 %v5968_v16, %v5968_v16  ;;  %v5973_v4 = vld [vmem:[#allocation129_spill] sm:$0xff]  ;;  %v1024_v46 = vmul.f32 %v5974_v12, %v5974_v12  ;;  %v1025_v16 = vmul.f32 %v5975_v3, %v5975_v3 }
  0xf5   : > { %5937 = vst [vmem:[#allocation104_spill] sm:$0xff] %v3191_v41  ;;  %v5972_v41 = vld [vmem:[#allocation128_spill] sm:$0xff]  ;;  %v1023_v44 = vmul.f32 %v5973_v4, %v5973_v4  ;;  %v3282_v4 = vadd.f32 %v998_v15, %v3095_v8  ;;  %v3285_v12 = vadd.f32 %v999_v50, %v3099_v25  ;;  %v3288_v3 = vadd.f32 %v1000_v9, %v3103_v22 }
  0xf6   : > { %5939 = vst [vmem:[#allocation105_spill] sm:$0xff] %v3195_v20  ;;  %v5971_v20 = vld [vmem:[#allocation127_spill] sm:$0xff]  ;;  %v1022_v42 = vmul.f32 %v5972_v41, %v5972_v41  ;;  %v3279_v41 = vadd.f32 %v997_v45, %v3091_v53  ;;  %v3306_v50 = vadd.f32 %v1006_v10, %v3127_v28  ;;  %v3309_v9 = vadd.f32 %v1007_v37, %v3131_v55 }
  0xf7   : > { %5941 = vst [vmem:[#allocation106_spill] sm:$0xff] %v3199_v26  ;;  %v5970_v26 = vld [vmem:[#allocation126_spill] sm:$0xff]  ;;  %v1021_v13 = vmul.f32 %v5971_v20, %v5971_v20  ;;  %v3276_v20 = vadd.f32 %v996_v48, %v3087_v34  ;;  %v3297_v48 = vadd.f32 %v1003_v17, %v3115_v27  ;;  %v3303_v34 = vadd.f32 %v1005_v49, %v3123_v39  ;;  %v5991_v17 = vld [vmem:[#allocation165_spill] sm:$0xff]  ;;  %v5993_v37 = vld [vmem:[#allocation167_spill] sm:$0xff] }
  0xf8   : > { %5943 = vst [vmem:[#allocation107_spill] sm:$0xff] %v3203_v33  ;;  %v5969_v33 = vld [vmem:[#allocation125_spill] sm:$0xff]  ;;  %v1020_v40 = vmul.f32 %v5970_v26, %v5970_v26  ;;  %v3273_v26 = vadd.f32 %v995_v35, %v3083_v52  ;;  %v3294_v35 = vadd.f32 %v1002_v47, %v3111_v21  ;;  %v3300_v52 = vadd.f32 %v1004_v11, %v3119_v38  ;;  %v5992_v49 = vld [vmem:[#allocation166_spill] sm:$0xff] }
  0xf9   : > { %v1019_v5 = vmul.f32 %v5969_v33, %v5969_v33  ;;  %v3270_v33 = vadd.f32 %v994_v43, %v3079_v51  ;;  %v3291_v51 = vadd.f32 %v1001_v7, %v3107_v36  ;;  %v3312_v53 = vadd.f32 %v1008_v14, %v3135_v56  ;;  %v5976_v56 = vld [vmem:[#allocation101_spill] sm:$0xff]  ;;  %v5990_v7 = vld [vmem:[#allocation164_spill] sm:$0xff] }
  0xfa   : > { %v3315_v8 = vadd.f32 %v1009_v54, %v3139_v57  ;;  %v3318_v25 = vadd.f32 %v1010_v19, %v3143_v58  ;;  %v3321_v22 = vadd.f32 %v1011_v31, %v3147_v59  ;;  %v3324_v36 = vadd.f32 %v1012_v32, %v3151_v60  ;;  %v5978_v58 = vld [vmem:[#allocation102_spill] sm:$0xff]  ;;  %v5994_v54 = vld [vmem:[#allocation168_spill] sm:$0xff]  ;;  %v5995_v31 = vld [vmem:[#allocation169_spill] sm:$0xff] }
  0xfb   : > { %v3327_v21 = vadd.f32 %v1013_v23, %v3155_v61  ;;  %v3330_v27 = vadd.f32 %v1014_v18, %v3159_v62  ;;  %v3333_v38 = vadd.f32 %v1015_v30, %v3163_v63  ;;  %v3336_v39 = vadd.f32 %v1016_v29, %v3167_v0  ;;  %v5980_v60 = vld [vmem:[#allocation103_spill] sm:$0xff]  ;;  %v5996_v23 = vld [vmem:[#allocation170_spill] sm:$0xff] }
  0xfc   : > { %v3339_v28 = vadd.f32 %v1017_v24, %v3171_v1  ;;  %v3342_v55 = vadd.f32 %v1018_v6, %v3175_v2  ;;  %v3345_v57 = vadd.f32 %v1019_v5, %v5976_v56  ;;  %v3348_v59 = vadd.f32 %v1020_v40, %v5978_v58  ;;  %v5982_v62 = vld [vmem:[#allocation104_spill] sm:$0xff]  ;;  %v5997_v30 = vld [vmem:[#allocation171_spill] sm:$0xff]  ;;  %v5999_v5 = vld [vmem:[#allocation173_spill] sm:$0xff] }
  0xfd   : > { %v3351_v61 = vadd.f32 %v1021_v13, %v5980_v60  ;;  %v3354_v63 = vadd.f32 %v1022_v42, %v5982_v62  ;;  %v5984_v0 = vld [vmem:[#allocation105_spill] sm:$0xff]  ;;  %v1186_v47 = vmul.f32 %v5990_v7, %v5990_v7  ;;  %v1187_v11 = vmul.f32 %v5991_v17, %v5991_v17  ;;  %v5998_v24 = vld [vmem:[#allocation172_spill] sm:$0xff]  ;;  %v6000_v13 = vld [vmem:[#allocation174_spill] sm:$0xff] }
  0xfe   : > { %5977 = vst [vmem:[#allocation108_spill] sm:$0xff] %v3345_v57  ;;  %v3357_v43 = vadd.f32 %v1023_v44, %v5984_v0  ;;  %v5986_v1 = vld [vmem:[#allocation106_spill] sm:$0xff]  ;;  %v1188_v10 = vmul.f32 %v5992_v49, %v5992_v49  ;;  %v1189_v14 = vmul.f32 %v5993_v37, %v5993_v37  ;;  %v1190_v19 = vmul.f32 %v5994_v54, %v5994_v54  ;;  %v6001_v44 = vld [vmem:[#allocation175_spill] sm:$0xff]  ;;  %v6003_v58 = vld [vmem:[#allocation177_spill] sm:$0xff] }
  0xff   : > { %5979 = vst [vmem:[#allocation109_spill] sm:$0xff] %v3348_v59  ;;  %v3360_v45 = vadd.f32 %v1024_v46, %v5986_v1  ;;  %v5988_v2 = vld [vmem:[#allocation107_spill] sm:$0xff]  ;;  %v1191_v32 = vmul.f32 %v5995_v31, %v5995_v31  ;;  %v1192_v18 = vmul.f32 %v5996_v23, %v5996_v23  ;;  %v1193_v29 = vmul.f32 %v5997_v30, %v5997_v30  ;;  %v6004_v62 = vld [vmem:[#allocation178_spill] sm:$0xff]  ;;  %v6006_v7 = vld [vmem:[#allocation180_spill] sm:$0xff] }
 0x100   : > { %5981 = vst [vmem:[#allocation110_spill] sm:$0xff] %v3351_v61  ;;  %v3363_v15 = vadd.f32 %v1025_v16, %v5988_v2  ;;  %v1194_v6 = vmul.f32 %v5998_v24, %v5998_v24  ;;  %v1195_v40 = vmul.f32 %v5999_v5, %v5999_v5  ;;  %v1196_v42 = vmul.f32 %v6000_v13, %v6000_v13  ;;  %v6002_v16 = vld [vmem:[#allocation176_spill] sm:$0xff]  ;;  %v6005_v1 = vld [vmem:[#allocation179_spill] sm:$0xff]  ;;  %v6007_v49 = vld [vmem:[#allocation181_spill] sm:$0xff] }
 0x101   : > { %5983 = vst [vmem:[#allocation111_spill] sm:$0xff] %v3354_v63  ;;  %v1197_v46 = vmul.f32 %v6001_v44, %v6001_v44  ;;  %v1198_v56 = vmul.f32 %v6002_v16, %v6002_v16  ;;  %v1199_v60 = vmul.f32 %v6003_v58, %v6003_v58  ;;  %v1200_v0 = vmul.f32 %v6004_v62, %v6004_v62  ;;  %v6008_v54 = vld [vmem:[#allocation182_spill] sm:$0xff]  ;;  %v6009_v23 = vld [vmem:[#allocation183_spill] sm:$0xff]  ;;  %v6010_v24 = vld [vmem:[#allocation184_spill] sm:$0xff] }
 0x102   : > { %5985 = vst [vmem:[#allocation89_spill] sm:$0xff] %v3357_v43  ;;  %v1201_v2 = vmul.f32 %v6005_v1, %v6005_v1  ;;  %v1202_v17 = vmul.f32 %v6006_v7, %v6006_v7  ;;  %v1203_v37 = vmul.f32 %v6007_v49, %v6007_v49  ;;  %v1204_v31 = vmul.f32 %v6008_v54, %v6008_v54  ;;  %v6011_v13 = vld [vmem:[#allocation185_spill] sm:$0xff]  ;;  %v6012_v16 = vld [vmem:[#allocation186_spill] sm:$0xff]  ;;  %v6013_v62 = vld [vmem:[#allocation187_spill] sm:$0xff] }
 0x103   : > { %5987 = vst [vmem:[#allocation90_spill] sm:$0xff] %v3360_v45  ;;  %v1205_v30 = vmul.f32 %v6009_v23, %v6009_v23  ;;  %v1206_v5 = vmul.f32 %v6010_v24, %v6010_v24  ;;  %v1207_v44 = vmul.f32 %v6011_v13, %v6011_v13  ;;  %v1208_v58 = vmul.f32 %v6012_v16, %v6012_v16  ;;  %v6014_v7 = vld [vmem:[#allocation188_spill] sm:$0xff]  ;;  %v6016_v45 = vld [vmem:[#allocation190_spill] sm:$0xff]  ;;  %v6017_v43 = vld [vmem:[#allocation191_spill] sm:$0xff] }
 0x104   : > { %5989 = vst [vmem:[#allocation91_spill] sm:$0xff] %v3363_v15  ;;  %v1209_v1 = vmul.f32 %v6013_v62, %v6013_v62  ;;  %v1210_v49 = vmul.f32 %v6014_v7, %v6014_v7  ;;  %v6015_v15 = vld [vmem:[#allocation189_spill] sm:$0xff]  ;;  %v1212_v23 = vmul.f32 %v6016_v45, %v6016_v45  ;;  %v1213_v24 = vmul.f32 %v6017_v43, %v6017_v43  ;;  %v6018_v63 = vld [vmem:[#allocation192_spill] sm:$0xff]  ;;  %v6020_v59 = vld [vmem:[#allocation194_spill] sm:$0xff] }
 0x105   : > { %v1211_v54 = vmul.f32 %v6015_v15, %v6015_v15  ;;  %v1214_v13 = vmul.f32 %v6018_v63, %v6018_v63  ;;  %v6019_v61 = vld [vmem:[#allocation193_spill] sm:$0xff]  ;;  %v1216_v62 = vmul.f32 %v6020_v59, %v6020_v59  ;;  %v6021_v57 = vld [vmem:[#allocation195_spill] sm:$0xff]  ;;  %v3430_v15 = vadd.f32 %v1186_v47, %v3270_v33 }
 0x106   : > { %v1215_v16 = vmul.f32 %v6019_v61, %v6019_v61  ;;  %v1217_v7 = vmul.f32 %v6021_v57, %v6021_v57  ;;  %v3433_v45 = vadd.f32 %v1187_v11, %v3273_v26  ;;  %v3436_v43 = vadd.f32 %v1188_v10, %v3276_v20 }
 0x107   : > { %v3439_v63 = vadd.f32 %v1189_v14, %v3279_v41  ;;  %v3442_v61 = vadd.f32 %v1190_v19, %v3282_v4  ;;  %v3445_v59 = vadd.f32 %v1191_v32, %v3285_v12  ;;  %v3448_v57 = vadd.f32 %v1192_v18, %v3288_v3 }
 0x108   : > { %v3451_v33 = vadd.f32 %v1193_v29, %v3291_v51  ;;  %v3454_v26 = vadd.f32 %v1194_v6, %v3294_v35  ;;  %v3457_v20 = vadd.f32 %v1195_v40, %v3297_v48  ;;  %v3460_v41 = vadd.f32 %v1196_v42, %v3300_v52  ;;  %v6035_v29 = vld [vmem:[#allocation8_spill] sm:$0xff]  ;;  %v6036_v42 = vld [vmem:[#allocation9_spill] sm:$0xff] }
 0x109   : > { %v3463_v4 = vadd.f32 %v1197_v46, %v3303_v34  ;;  %v3466_v12 = vadd.f32 %v1198_v56, %v3306_v50  ;;  %v3469_v3 = vadd.f32 %v1199_v60, %v3309_v9  ;;  %v3472_v51 = vadd.f32 %v1200_v0, %v3312_v53  ;;  %v6037_v60 = vld [vmem:[#allocation10_spill] sm:$0xff] }
 0x10a   : > { %v3475_v35 = vadd.f32 %v1201_v2, %v3315_v8  ;;  %v3478_v48 = vadd.f32 %v1202_v17, %v3318_v25  ;;  %v3481_v52 = vadd.f32 %v1203_v37, %v3321_v22  ;;  %v3484_v34 = vadd.f32 %v1204_v31, %v3324_v36  ;;  %v6022_v36 = vld [vmem:[#allocation108_spill] sm:$0xff]  ;;  %v6038_v17 = vld [vmem:[#allocation11_spill] sm:$0xff] }
 0x10b   : > { %v3487_v50 = vadd.f32 %v1205_v30, %v3327_v21  ;;  %v3490_v9 = vadd.f32 %v1206_v5, %v3330_v27  ;;  %v3493_v53 = vadd.f32 %v1207_v44, %v3333_v38  ;;  %v3496_v8 = vadd.f32 %v1208_v58, %v3336_v39  ;;  %v6023_v21 = vld [vmem:[#allocation109_spill] sm:$0xff]  ;;  %v6025_v27 = vld [vmem:[#allocation110_spill] sm:$0xff]  ;;  %v6027_v38 = vld [vmem:[#allocation111_spill] sm:$0xff] }
 0x10c   : > { %v3499_v25 = vadd.f32 %v1209_v1, %v3339_v28  ;;  %v3502_v22 = vadd.f32 %v1210_v49, %v3342_v55  ;;  %v3505_v47 = vadd.f32 %v1211_v54, %v6022_v36  ;;  %v3508_v11 = vadd.f32 %v1212_v23, %v6023_v21  ;;  %v6029_v39 = vld [vmem:[#allocation89_spill] sm:$0xff]  ;;  %v6031_v28 = vld [vmem:[#allocation90_spill] sm:$0xff]  ;;  %v6033_v55 = vld [vmem:[#allocation91_spill] sm:$0xff] }
 0x10d   : > { %v3511_v10 = vadd.f32 %v1213_v24, %v6025_v27  ;;  %v3514_v14 = vadd.f32 %v1214_v13, %v6027_v38  ;;  %v3517_v19 = vadd.f32 %v1215_v16, %v6029_v39  ;;  %v3520_v32 = vadd.f32 %v1216_v62, %v6031_v28  ;;  %v6039_v30 = vld [vmem:[#allocation12_spill] sm:$0xff]  ;;  %v6040_v58 = vld [vmem:[#allocation13_spill] sm:$0xff]  ;;  %v6041_v54 = vld [vmem:[#allocation14_spill] sm:$0xff] }
 0x10e   : > { %6024 = vst [vmem:[#allocation92_spill] sm:$0xff] %v3508_v11  ;;  %v3523_v18 = vadd.f32 %v1217_v7, %v6033_v55  ;;  %v1314_v6 = vperm.slane %v6035_v29, 3  ;;  %v1315_v40 = vperm.slane %v6035_v29, 7  ;;  %v1316_v46 = vperm.slane %v6036_v42, 3  ;;  %v6042_v13 = vld [vmem:[#allocation15_spill] sm:$0xff]  ;;  %v6043_v7 = vld [vmem:[#allocation16_spill] sm:$0xff] }
 0x10f   : > { %6026 = vst [vmem:[#allocation93_spill] sm:$0xff] %v3511_v10  ;;  %v1317_v56 = vperm.slane %v6036_v42, 7  ;;  %v1318_v0 = vperm.slane %v6037_v60, 3  ;;  %v1319_v2 = vperm.slane %v6037_v60, 7  ;;  %v1320_v37 = vperm.slane %v6038_v17, 3  ;;  %v6044_v27 = vld [vmem:[#allocation17_spill] sm:$0xff] }
 0x110   : > { %6028 = vst [vmem:[#allocation94_spill] sm:$0xff] %v3514_v14  ;;  %v1321_v31 = vperm.slane %v6038_v17, 7  ;;  %v1322_v5 = vperm.slane %v6039_v30, 3  ;;  %v1323_v44 = vperm.slane %v6039_v30, 7  ;;  %v1324_v1 = vperm.slane %v6040_v58, 3  ;;  %v6045_v28 = vld [vmem:[#allocation18_spill] sm:$0xff] }
 0x111   : > { %6030 = vst [vmem:[#allocation95_spill] sm:$0xff] %v3517_v19  ;;  %v1325_v49 = vperm.slane %v6040_v58, 7  ;;  %v1326_v23 = vperm.slane %v6041_v54, 3  ;;  %v1327_v24 = vperm.slane %v6041_v54, 7  ;;  %v1328_v16 = vperm.slane %v6042_v13, 3  ;;  %v6049_v30 = vld [vmem:[#allocation19_spill] sm:$0xff] }
 0x112   : > { %6032 = vst [vmem:[#allocation96_spill] sm:$0xff] %v3520_v32  ;;  %v1329_v62 = vperm.slane %v6042_v13, 7  ;;  %v1330_v36 = vperm.slane %v6043_v7, 3  ;;  %v1331_v21 = vperm.slane %v6043_v7, 7  ;;  %v1332_v38 = vperm.slane %v6044_v27, 3  ;;  %v6051_v7 = vld [vmem:[#allocation20_spill] sm:$0xff] }
 0x113   : > { %6034 = vst [vmem:[#allocation97_spill] sm:$0xff] %v3523_v18  ;;  %v1333_v39 = vperm.slane %v6044_v27, 7  ;;  %v1334_v55 = vperm.slane %v6045_v28, 3  ;;  %v3546_v29 = vperm.slane %v1314_v6, 3  ;;  %v3548_v42 = vperm.slane %v1315_v40, 3  ;;  %v6052_v32 = vld [vmem:[#allocation21_spill] sm:$0xff] }
 0x114   : > { %v3550_v60 = vperm.slane %v1316_v46, 3  ;;  %v1335_v17 = vperm.slane %v6045_v28, 7  ;;  %v1336_v58 = vperm.slane %v6049_v30, 3  ;;  %v3555_v13 = vperm.slane %v1317_v56, 3  ;;  %v6054_v46 = vld [vmem:[#allocation22_spill] sm:$0xff]  ;;  %v6057_v19 = vld [vmem:[#allocation23_spill] sm:$0xff] }
 0x115   : > { %6046 = vst [vmem:[#allocation98_spill] sm:$0xff] %v3546_v29  ;;  %v3560_v6 = vperm.slane %v1318_v0, 3  ;;  %v3565_v10 = vperm.slane %v1319_v2, 3  ;;  %v3567_v11 = vperm.slane %v1320_v37, 3  ;;  %v1474_v56 = vmul.f32 %v3546_v29, %v3430_v15 }
 0x116   : > { %6047 = vst [vmem:[#allocation99_spill] sm:$0xff] %v3548_v42  ;;  %v1475_v27 = vmul.f32 %v3548_v42, %v3433_v45  ;;  %v1476_v0 = vmul.f32 %v3550_v60, %v3436_v43  ;;  %v3577_v14 = vperm.slane %v1321_v31, 3  ;;  %v1477_v2 = vmul.f32 %v3555_v13, %v3439_v63 }
 0x117   : > { %6048 = vst [vmem:[#allocation100_spill] sm:$0xff] %v3550_v60  ;;  %v3581_v37 = vperm.slane %v1322_v5, 3  ;;  %v3583_v28 = vperm.slane %v1323_v44, 3  ;;  %v3585_v15 = vperm.slane %v1324_v1, 3  ;;  %v1478_v45 = vmul.f32 %v3560_v6, %v3442_v61  ;;  %v6154_v60 = vld [vmem:[#allocation76_spill] sm:$0xff] }
 0x118   : > { %6050 = vst [vmem:[#allocation112_spill] sm:$0xff] %v3555_v13  ;;  %v3589_v54 = vperm.slane %v1325_v49, 3  ;;  %v3591_v43 = vperm.slane %v1326_v23, 3  ;;  %v3593_v40 = vperm.slane %v1327_v24, 3  ;;  %v1479_v31 = vmul.f32 %v3565_v10, %v3445_v59 }
 0x119   : > { %6053 = vst [vmem:[#allocation113_spill] sm:$0xff] %v3560_v6  ;;  %v1480_v63 = vmul.f32 %v3567_v11, %v3448_v57  ;;  %v1634_v5 = vmul.f32 1.442695, %v1474_v56  ;;  %v1636_v44 = vmul.f32 1.442695, %v1475_v27  ;;  %v3599_v18 = vperm.slane %v1328_v16, 3 }
 0x11a   : > { %6055 = vst [vmem:[#allocation114_spill] sm:$0xff] %v3565_v10  ;;  %v1638_v1 = vmul.f32 1.442695, %v1476_v0  ;;  %v3601_v13 = vperm.slane %v1329_v62, 3  ;;  %v1481_v61 = vmul.f32 %v3577_v14, %v3451_v33  ;;  %v1640_v49 = vmul.f32 1.442695, %v1477_v2 }
 0x11b   : > { %6056 = vst [vmem:[#allocation115_spill] sm:$0xff] %v3567_v11  ;;  %v3605_v23 = vperm.slane %v1330_v36, 3  ;;  %v1482_v24 = vmul.f32 %v3581_v37, %v3454_v26  ;;  %2007 = vpow2.f32 %v1634_v5  ;;  %v1642_v59 = vmul.f32 1.442695, %v1478_v45  ;;  %v6148_v11 = vld [vmem:[#allocation73_spill] sm:$0xff]  ;;  %v6152_v6 = vld [vmem:[#allocation75_spill] sm:$0xff] }
 0x11c   : > { %6058 = vst [vmem:[#allocation116_spill] sm:$0xff] %v3577_v14  ;;  %v3613_v57 = vperm.slane %v1331_v21, 3  ;;  %v1483_v16 = vmul.f32 %v3583_v28, %v3457_v20  ;;  %2009 = vpow2.f32 %v1636_v44  ;;  %v1644_v62 = vmul.f32 1.442695, %v1479_v31  ;;  %v6146_v14 = vld [vmem:[#allocation72_spill] sm:$0xff] }
 0x11d   : > { %6059 = vst [vmem:[#allocation117_spill] sm:$0xff] %v3581_v37  ;;  %v3617_v27 = vperm.slane %v1332_v38, 3  ;;  %v1484_v33 = vmul.f32 %v3585_v15, %v3460_v41  ;;  %2011 = vpow2.f32 %v1638_v1  ;;  %v1646_v36 = vmul.f32 1.442695, %v1480_v63 }
 0x11e   : > { %6060 = vst [vmem:[#allocation118_spill] sm:$0xff] %v3583_v28  ;;  %v3621_v26 = vperm.slane %v1333_v39, 3  ;;  %v1485_v56 = vmul.f32 %v3589_v54, %v3463_v4  ;;  %2013 = vpow2.f32 %v1640_v49  ;;  %v1648_v21 = vmul.f32 1.442695, %v1481_v61 }
 0x11f   : > { %6061 = vst [vmem:[#allocation119_spill] sm:$0xff] %v3585_v15  ;;  %v3625_v0 = vperm.slane %v1334_v55, 3  ;;  %v1486_v20 = vmul.f32 %v3591_v43, %v3466_v12  ;;  %2015 = vpow2.f32 %v1642_v59  ;;  %v1650_v38 = vmul.f32 1.442695, %v1482_v24  ;;  %v6143_v15 = vld [vmem:[#allocation69_spill] sm:$0xff] }
 0x120   : > { %6062 = vst [vmem:[#allocation120_spill] sm:$0xff] %v3589_v54  ;;  %v3629_v2 = vperm.slane %v1335_v17, 3  ;;  %v1487_v41 = vmul.f32 %v3593_v40, %v3469_v3  ;;  %2017 = vpow2.f32 %v1644_v62  ;;  %v1652_v39 = vmul.f32 1.442695, %v1483_v16  ;;  %v6142_v54 = vld [vmem:[#allocation68_spill] sm:$0xff] }
 0x121   : > { %6063 = vst [vmem:[#allocation121_spill] sm:$0xff] %v3591_v43  ;;  %v2008_v45 = vpop.eup %2007  ;;  %v3633_v31 = vperm.slane %v1336_v58, 3  ;;  %v1488_v4 = vmul.f32 %v3599_v18, %v3472_v51  ;;  %2019 = vpow2.f32 %v1646_v36  ;;  %v1654_v55 = vmul.f32 1.442695, %v1484_v33 }
 0x122   : > { %6064 = vst [vmem:[#allocation122_spill] sm:$0xff] %v3593_v40  ;;  %v2010_v63 = vpop.eup %2009  ;;  %v6074_v12 = vperm.slane %v6049_v30, 7  ;;  %v1489_v17 = vmul.f32 %v3601_v13, %v3475_v35  ;;  %2021 = vpow2.f32 %v1648_v21  ;;  %v1656_v3 = vmul.f32 1.442695, %v1485_v56 }
 0x123   : > { %6065 = vst [vmem:[#allocation123_spill] sm:$0xff] %v3599_v18  ;;  %v2012_v44 = vpop.eup %2011  ;;  %v6076_v1 = vperm.slane %v6051_v7, 3  ;;  %v1490_v51 = vmul.f32 %v3605_v23, %v3478_v48  ;;  %2023 = vpow2.f32 %v1650_v38  ;;  %v1658_v61 = vmul.f32 1.442695, %v1486_v20  ;;  %v6139_v18 = vld [vmem:[#allocation65_spill] sm:$0xff] }
 0x124   : > { %6066 = vst [vmem:[#allocation124_spill] sm:$0xff] %v3601_v13  ;;  %v3639_v5 = vperm.slane %v6074_v12, 3  ;;  %v2014_v30 = vpop.eup %2013  ;;  %v6078_v35 = vperm.slane %v6051_v7, 7  ;;  %v1491_v24 = vmul.f32 %v3613_v57, %v3481_v52  ;;  %2025 = vpow2.f32 %v1652_v39  ;;  %v6138_v13 = vld [vmem:[#allocation64_spill] sm:$0xff] }
 0x125   : > { %6067 = vst [vmem:[#allocation125_spill] sm:$0xff] %v3605_v23  ;;  %v3645_v58 = vperm.slane %v6076_v1, 3  ;;  %v1660_v59 = vmul.f32 1.442695, %v1487_v41  ;;  %v2016_v48 = vpop.eup %2015  ;;  %v6080_v16 = vperm.slane %v6052_v32, 3  ;;  %v1492_v33 = vmul.f32 %v3617_v27, %v3484_v34 }
 0x126   : > { %6068 = vst [vmem:[#allocation126_spill] sm:$0xff] %v3613_v57  ;;  %v3655_v49 = vperm.slane %v6078_v35, 3  ;;  %2027 = vpow2.f32 %v1654_v55  ;;  %v1662_v7 = vmul.f32 1.442695, %v1488_v4  ;;  %v2018_v36 = vpop.eup %2017  ;;  %v6082_v56 = vperm.slane %v6052_v32, 7 }
 0x127   : > { %6069 = vst [vmem:[#allocation127_spill] sm:$0xff] %v3617_v27  ;;  %v3662_v62 = vperm.slane %v6080_v16, 3  ;;  %v1493_v52 = vmul.f32 %v3621_v26, %v3487_v50  ;;  %2029 = vpow2.f32 %v1656_v3  ;;  %v1664_v20 = vmul.f32 1.442695, %v1489_v17  ;;  %v2020_v38 = vpop.eup %2019  ;;  %v6093_v16 = vld [vmem:[#allocation93_spill] sm:$0xff] }
 0x128   : > { %6070 = vst [vmem:[#allocation128_spill] sm:$0xff] %v3621_v26  ;;  %v3669_v21 = vperm.slane %v6082_v56, 3  ;;  %v6084_v41 = vperm.slane %v6054_v46, 3  ;;  %v1494_v34 = vmul.f32 %v3625_v0, %v3490_v9  ;;  %2031 = vpow2.f32 %v1658_v61  ;;  %v6095_v56 = vld [vmem:[#allocation95_spill] sm:$0xff] }
 0x129   : > { %6071 = vst [vmem:[#allocation129_spill] sm:$0xff] %v3625_v0  ;;  %v1666_v32 = vmul.f32 1.442695, %v1490_v51  ;;  %v6086_v4 = vperm.slane %v6054_v46, 7  ;;  %v1495_v50 = vmul.f32 %v3629_v2, %v3493_v53  ;;  %2033 = vpow2.f32 %v1660_v59  ;;  %v6092_v59 = vld [vmem:[#allocation92_spill] sm:$0xff]  ;;  %v6133_v0 = vld [vmem:[#allocation59_spill] sm:$0xff] }
 0x12a   : > { %6072 = vst [vmem:[#allocation130_spill] sm:$0xff] %v3629_v2  ;;  %v3676_v39 = vperm.slane %v6084_v41, 3  ;;  %v6088_v17 = vperm.slane %v6057_v19, 3  ;;  %v1496_v9 = vmul.f32 %v3633_v31, %v3496_v8  ;;  %2035 = vpow2.f32 %v1662_v7  ;;  %v6096_v41 = vld [vmem:[#allocation96_spill] sm:$0xff] }
 0x12b   : > { %6073 = vst [vmem:[#allocation131_spill] sm:$0xff] %v3633_v31  ;;  %v3683_v55 = vperm.slane %v6086_v4, 3  ;;  %v1670_v46 = vmul.f32 1.442695, %v1492_v33  ;;  %v6090_v1 = vperm.slane %v6057_v19, 7  ;;  %v1497_v53 = vmul.f32 %v3639_v5, %v3499_v25 }
 0x12c   : > { %6075 = vst [vmem:[#allocation101_spill] sm:$0xff] %v3639_v5  ;;  %v3690_v3 = vperm.slane %v6088_v17, 3  ;;  %2037 = vpow2.f32 %v1664_v20  ;;  %v1672_v61 = vmul.f32 1.442695, %v1493_v52  ;;  %v1498_v35 = vmul.f32 %v3645_v58, %v3502_v22  ;;  %v3712_v22 = vpop.permute.xlu0 %205 }
 0x12d   : > { %6077 = vst [vmem:[#allocation102_spill] sm:$0xff] %v3645_v58  ;;  %v3697_v51 = vperm.slane %v6090_v1, 3  ;;  %v1499_v8 = vmul.f32 %v3655_v49, %v3505_v47  ;;  %2039 = vpow2.f32 %v1666_v32  ;;  %v1501_v25 = vmul.f32 %v3669_v21, %v6093_v16  ;;  %v6097_v32 = vld [vmem:[#allocation97_spill] sm:$0xff] }
 0x12e   : > { %1762 = vst [vmem:[%s3650_s20 + $0x200] sm:$0xff] %v2008_v45  ;;  %v2022_v45 = vpop.eup %2021  ;;  %v1676_v33 = vmul.f32 1.442695, %v1495_v50  ;;  %v1503_v52 = vmul.f32 %v3683_v55, %v6095_v56  ;;  %v1678_v20 = vmul.f32 1.442695, %v1496_v9  ;;  %v6103_v56 = vld [vmem:[#allocation29_spill] sm:$0xff] }
 0x12f   : > { %6079 = vst [vmem:[#allocation103_spill] sm:$0xff] %v3655_v49  ;;  %v2024_v12 = vpop.eup %2023  ;;  %v1680_v4 = vmul.f32 1.442695, %v1497_v53 }
 0x130   : > { %1763 = vst [vmem:[%s3650_s20 + $0x208] sm:$0xff] %v2010_v63  ;;  %v1668_v63 = vmul.f32 1.442695, %v1491_v24  ;;  %v1674_v24 = vmul.f32 1.442695, %v1494_v34  ;;  %v1504_v34 = vmul.f32 %v3690_v3, %v6096_v41 }
 0x131   : > { %6081 = vst [vmem:[#allocation104_spill] sm:$0xff] %v3662_v62 }
 0x132   : > { %1764 = vst [vmem:[%s3650_s20 + $0x210] sm:$0xff] %v2012_v44  ;;  %v2026_v44 = vpop.eup %2025  ;;  %2041 = vpow2.f32 %v1668_v63  ;;  %v1682_v63 = vmul.f32 1.442695, %v1498_v35 }
 0x133   : > { %6083 = vst [vmem:[#allocation105_spill] sm:$0xff] %v3669_v21  ;;  %2043 = vpow2.f32 %v1670_v46  ;;  %v1688_v46 = vmul.f32 1.442695, %v1501_v25 }
 0x134   : > { %1765 = vst [vmem:[%s3650_s20 + $0x218] sm:$0xff] %v2014_v30  ;;  %v2028_v30 = vpop.eup %2027  ;;  %2045 = vpow2.f32 %v1672_v61 }
 0x135   : > { %6085 = vst [vmem:[#allocation106_spill] sm:$0xff] %v3676_v39  ;;  %v2030_v19 = vpop.eup %2029  ;;  %2047 = vpow2.f32 %v1674_v24  ;;  %v6099_v24 = vld [vmem:[#allocation25_spill] sm:$0xff] }
 0x136   : > { %1766 = vst [vmem:[%s3650_s20 + $0x220] sm:$0xff] %v2016_v48  ;;  %v1500_v48 = vmul.f32 %v3662_v62, %v6092_v59  ;;  %v2032_v7 = vpop.eup %2031  ;;  %2049 = vpow2.f32 %v1676_v33  ;;  %v3733_v35 = vsub.f32 %v3712_v22, %v6099_v24  ;;  %v6101_v33 = vld [vmem:[#allocation27_spill] sm:$0xff] }
 0x137   : > { %6087 = vst [vmem:[#allocation107_spill] sm:$0xff] %v3683_v55  ;;  %2051 = vpow2.f32 %v1678_v20  ;;  %v6118_v24 = vld [vmem:[#allocation43_spill] sm:$0xff] }
 0x138   : > { %1767 = vst [vmem:[%s3650_s20 + $0x228] sm:$0xff] %v2018_v36  ;;  %v6094_v36 = vld [vmem:[#allocation94_spill] sm:$0xff]  ;;  %v1686_v9 = vmul.f32 1.442695, %v1500_v48  ;;  %2053 = vpow2.f32 %v1680_v4 }
 0x139   : > { %6089 = vst [vmem:[#allocation164_spill] sm:$0xff] %v3690_v3  ;;  %v1502_v47 = vmul.f32 %v3676_v39, %v6094_v36  ;;  %v6100_v48 = vld [vmem:[#allocation26_spill] sm:$0xff]  ;;  %2055 = vpow2.f32 %v1682_v63  ;;  %v6102_v36 = vld [vmem:[#allocation28_spill] sm:$0xff]  ;;  %v6107_v63 = vld [vmem:[#allocation33_spill] sm:$0xff] }
 0x13a   : > { %1768 = vst [vmem:[%s3650_s20 + $0x230] sm:$0xff] %v2020_v38  ;;  %v2034_v38 = vpop.eup %2033  ;;  %v3738_v16 = vsub.f32 %v3712_v22, %v6100_v48  ;;  %v6125_v39 = vld [vmem:[#allocation50_spill] sm:$0xff] }
 0x13b   : > { %6091 = vst [vmem:[#allocation165_spill] sm:$0xff] %v3697_v51  ;;  %v2036_v50 = vpop.eup %2035  ;;  %v1690_v53 = vmul.f32 1.442695, %v1502_v47  ;;  %v3747_v47 = vsub.f32 %v3712_v22, %v6102_v36 }
 0x13c   : > { %1769 = vst [vmem:[%s3650_s20 + $0x238] sm:$0xff] %v2022_v45  ;;  %v1505_v45 = vmul.f32 %v3697_v51, %v6097_v32  ;;  %v2038_v17 = vpop.eup %2037  ;;  %v6120_v51 = vld [vmem:[#allocation45_spill] sm:$0xff] }
 0x13d   : > { %1770 = vst [vmem:[%s3650_s20 + $0x240] sm:$0xff] %v2024_v12  ;;  %v1684_v12 = vmul.f32 1.442695, %v1499_v8  ;;  %v2040_v61 = vpop.eup %2039 }
 0x13e   : > { %1771 = vst [vmem:[%s3650_s20 + $0x248] sm:$0xff] %v2026_v44  ;;  %v6098_v44 = vld [vmem:[#allocation24_spill] sm:$0xff]  ;;  %v2042_v8 = vpop.eup %2041  ;;  %v1696_v59 = vmul.f32 1.442695, %v1505_v45 }
 0x13f   : > { %1772 = vst [vmem:[%s3650_s20 + $0x250] sm:$0xff] %v2028_v30  ;;  %v3728_v1 = vsub.f32 %v3712_v22, %v6098_v44  ;;  %v1692_v30 = vmul.f32 1.442695, %v1503_v52  ;;  %v2044_v25 = vpop.eup %2043  ;;  %v3751_v52 = vsub.f32 %v3712_v22, %v6103_v56  ;;  %2057 = vpow2.f32 %v1684_v12  ;;  %v6106_v45 = vld [vmem:[#allocation32_spill] sm:$0xff]  ;;  %v6112_v56 = vld [vmem:[#allocation38_spill] sm:$0xff] }
 0x140   : > { %1773 = vst [vmem:[%s3650_s20 + $0x258] sm:$0xff] %v2030_v19  ;;  %v1694_v19 = vmul.f32 1.442695, %v1504_v34  ;;  %v2046_v20 = vpop.eup %2045  ;;  %v6105_v34 = vld [vmem:[#allocation31_spill] sm:$0xff]  ;;  %v3764_v4 = vsub.f32 %v3712_v22, %v6106_v45  ;;  %2059 = vpow2.f32 %v1686_v9  ;;  %v3769_v12 = vsub.f32 %v3712_v22, %v6107_v63  ;;  %v6110_v45 = vld [vmem:[#allocation36_spill] sm:$0xff] }
 0x141   : > { %1774 = vst [vmem:[%s3650_s20 + $0x260] sm:$0xff] %v2032_v7  ;;  %v3743_v7 = vsub.f32 %v3712_v22, %v6101_v33  ;;  %v3760_v32 = vsub.f32 %v3712_v22, %v6105_v34  ;;  %2061 = vpow2.f32 %v1688_v46  ;;  %v3782_v9 = vsub.f32 %v3712_v22, %v6110_v45  ;;  %v6114_v46 = vld [vmem:[#allocation39_spill] sm:$0xff]  ;;  %v6115_v45 = vld [vmem:[#allocation40_spill] sm:$0xff] }
 0x142   : > { %1775 = vst [vmem:[%s3650_s20 + $0x268] sm:$0xff] %v2034_v38  ;;  %v6104_v38 = vld [vmem:[#allocation30_spill] sm:$0xff]  ;;  %2063 = vpow2.f32 %v1690_v53  ;;  %v3801_v33 = vsub.f32 %v3712_v22, %v6115_v45 }
 0x143   : > { %1776 = vst [vmem:[%s3650_s20 + $0x270] sm:$0xff] %v2036_v50  ;;  %v3756_v41 = vsub.f32 %v3712_v22, %v6104_v38  ;;  %v2048_v50 = vpop.eup %2047  ;;  %2065 = vpow2.f32 %v1692_v30  ;;  %v6117_v53 = vld [vmem:[#allocation42_spill] sm:$0xff]  ;;  %v3823_v30 = vsub.f32 %v3712_v22, %v6120_v51 }
 0x144   : > { %1777 = vst [vmem:[%s3650_s20 + $0x278] sm:$0xff] %v2038_v17  ;;  %v6108_v17 = vld [vmem:[#allocation34_spill] sm:$0xff]  ;;  %v2050_v38 = vpop.eup %2049  ;;  %2067 = vpow2.f32 %v1694_v19 }
 0x145   : > { %1778 = vst [vmem:[%s3650_s20 + $0x280] sm:$0xff] %v2040_v61  ;;  %v3773_v61 = vsub.f32 %v3712_v22, %v6108_v17  ;;  %v3790_v17 = vsub.f32 %v3712_v22, %v6112_v56  ;;  %v2052_v36 = vpop.eup %2051  ;;  %2069 = vpow2.f32 %v1696_v59  ;;  %v6127_v59 = vld [vmem:[#allocation52_spill] sm:$0xff] }
 0x146   : > { %1779 = vst [vmem:[%s3650_s20 + $0x288] sm:$0xff] %v2042_v8  ;;  %v6109_v8 = vld [vmem:[#allocation35_spill] sm:$0xff]  ;;  %v2054_v56 = vpop.eup %2053 }
 0x147   : > { %1780 = vst [vmem:[%s3650_s20 + $0x290] sm:$0xff] %v2044_v25  ;;  %v3777_v34 = vsub.f32 %v3712_v22, %v6109_v8  ;;  %v6111_v25 = vld [vmem:[#allocation37_spill] sm:$0xff]  ;;  %v3793_v8 = vpop.permute.xlu0 %210  ;;  %v2056_v44 = vpop.eup %2055 }
 0x148   : > { %1781 = vst [vmem:[%s3650_s20 + $0x298] sm:$0xff] %v2046_v20  ;;  %v3786_v63 = vsub.f32 %v3712_v22, %v6111_v25  ;;  %v3797_v20 = vsub.f32 %v3712_v22, %v6114_v46  ;;  %v6116_v25 = vld [vmem:[#allocation41_spill] sm:$0xff]  ;;  %v3814_v46 = vsub.f32 %v3712_v22, %v6118_v24  ;;  %v6122_v24 = vld [vmem:[#allocation47_spill] sm:$0xff]  ;;  %v2058_v55 = vpop.eup %2057 }
 0x149   : > { %1782 = vst [vmem:[%s3650_s20 + $0x2a0] sm:$0xff] %v2048_v50  ;;  %v3805_v48 = vsub.f32 %v3712_v22, %v6116_v25  ;;  %v3810_v50 = vsub.f32 %v3712_v22, %v6117_v53  ;;  %v428_v25 = vpop.permute.xlu1 %427  ;;  %v3831_v3 = vsub.f32 %v3712_v22, %v6122_v24  ;;  %v2060_v21 = vpop.eup %2059  ;;  %v6126_v24 = vld [vmem:[#allocation51_spill] sm:$0xff] }
 0x14a   : > { %6113 = vst [vmem:[#allocation166_spill] sm:$0xff] %v3793_v8  ;;  %v6119_v8 = vld [vmem:[#allocation44_spill] sm:$0xff]  ;;  %v3849_v62 = vsub.f32 %v3712_v22, %v6126_v24  ;;  %v6131_v24 = vld [vmem:[#allocation57_spill] sm:$0xff]  ;;  %v3931_v42 = vsub.f32 %v428_v25, %v6154_v60  ;;  %v6167_v60 = vld [vmem:[#allocation83_spill] sm:$0xff] }
 0x14b   : > { %1783 = vst [vmem:[%s3650_s20 + $0x2a8] sm:$0xff] %v2050_v38  ;;  %v3818_v45 = vsub.f32 %v3712_v22, %v6119_v8  ;;  %v6121_v38 = vld [vmem:[#allocation46_spill] sm:$0xff]  ;;  %v6123_v8 = vld [vmem:[#allocation48_spill] sm:$0xff]  ;;  %v3869_v31 = vsub.f32 %v428_v25, %v6131_v24  ;;  %v6137_v24 = vld [vmem:[#allocation63_spill] sm:$0xff] }
 0x14c   : > { %1784 = vst [vmem:[%s3650_s20 + $0x2b0] sm:$0xff] %v2052_v36  ;;  %v3827_v53 = vsub.f32 %v3712_v22, %v6121_v38  ;;  %v3836_v19 = vsub.f32 %v3712_v22, %v6123_v8  ;;  %v6124_v36 = vld [vmem:[#allocation49_spill] sm:$0xff]  ;;  %v3844_v38 = vsub.f32 %v3712_v22, %v6125_v39  ;;  %v2062_v39 = vpop.eup %2061  ;;  %v3888_v23 = vsub.f32 %v428_v25, %v6137_v24 }
 0x14d   : > { %1785 = vst [vmem:[%s3650_s20 + $0x2b8] sm:$0xff] %v2054_v56  ;;  %v3840_v51 = vsub.f32 %v3712_v22, %v6124_v36  ;;  %v3853_v56 = vsub.f32 %v3712_v22, %v6127_v59  ;;  %v6128_v8 = vld [vmem:[#allocation53_spill] sm:$0xff]  ;;  %v6129_v36 = vld [vmem:[#allocation54_spill] sm:$0xff]  ;;  %v2064_v26 = vpop.eup %2063  ;;  %v3905_v24 = vsub.f32 %v428_v25, %v6142_v54 }
 0x14e   : > { %1786 = vst [vmem:[%s3650_s20 + $0x2c0] sm:$0xff] %v2056_v44  ;;  %v3857_v49 = vsub.f32 %v3712_v22, %v6128_v8  ;;  %v3861_v58 = vsub.f32 %v3712_v22, %v6129_v36  ;;  %v6130_v44 = vld [vmem:[#allocation55_spill] sm:$0xff]  ;;  %v6132_v59 = vld [vmem:[#allocation58_spill] sm:$0xff]  ;;  %v3875_v8 = vsub.f32 %v428_v25, %v6133_v0  ;;  %v6134_v36 = vld [vmem:[#allocation60_spill] sm:$0xff]  ;;  %v3892_v0 = vsub.f32 %v428_v25, %v6138_v13 }
 0x14f   : > { %1787 = vst [vmem:[%s3650_s20 + $0x2c8] sm:$0xff] %v2058_v55  ;;  %v3866_v5 = vsub.f32 %v3712_v22, %v6130_v44  ;;  %v3872_v2 = vsub.f32 %v428_v25, %v6132_v59  ;;  %v3879_v27 = vsub.f32 %v428_v25, %v6134_v36  ;;  %v6135_v55 = vld [vmem:[#allocation61_spill] sm:$0xff]  ;;  %v6136_v22 = vld [vmem:[#allocation62_spill] sm:$0xff]  ;;  %v2066_v59 = vpop.eup %2065 }
 0x150   : > { %1788 = vst [vmem:[%s3650_s20 + $0x2d0] sm:$0xff] %v2060_v21  ;;  %v3882_v57 = vsub.f32 %v428_v25, %v6135_v55  ;;  %v3885_v44 = vsub.f32 %v428_v25, %v6136_v22  ;;  %v3895_v21 = vsub.f32 %v428_v25, %v6139_v18  ;;  %v6140_v36 = vld [vmem:[#allocation66_spill] sm:$0xff]  ;;  %v6141_v55 = vld [vmem:[#allocation67_spill] sm:$0xff]  ;;  %v2068_v22 = vpop.eup %2067 }
 0x151   : > { %1789 = vst [vmem:[%s3650_s20 + $0x2d8] sm:$0xff] %v2062_v39  ;;  %v3898_v40 = vsub.f32 %v428_v25, %v6140_v36  ;;  %v3901_v43 = vsub.f32 %v428_v25, %v6141_v55  ;;  %v3908_v39 = vsub.f32 %v428_v25, %v6143_v15  ;;  %v6144_v13 = vld [vmem:[#allocation70_spill] sm:$0xff]  ;;  %v6145_v18 = vld [vmem:[#allocation71_spill] sm:$0xff]  ;;  %v2070_v36 = vpop.eup %2069  ;;  %v3918_v55 = vsub.f32 %v428_v25, %v6146_v14 }
 0x152   : > { %1790 = vst [vmem:[%s3650_s20 + $0x2e0] sm:$0xff] %v2064_v26  ;;  %v3911_v28 = vsub.f32 %v428_v25, %v6144_v13  ;;  %v3914_v37 = vsub.f32 %v428_v25, %v6145_v18  ;;  %v3921_v26 = vsub.f32 %v428_v25, %v6148_v11  ;;  %v6150_v54 = vld [vmem:[#allocation74_spill] sm:$0xff]  ;;  %v3927_v15 = vsub.f32 %v428_v25, %v6152_v6  ;;  %v632_v13 = vpop.permute.xlu0 %631  ;;  %v6156_v18 = vld [vmem:[#allocation77_spill] sm:$0xff] }
 0x153   : > { %1791 = vst [vmem:[%s3650_s20 + $0x2e8] sm:$0xff] %v2066_v59  ;;  %v3924_v10 = vsub.f32 %v428_v25, %v6150_v54  ;;  %v3934_v29 = vsub.f32 %v428_v25, %v6156_v18  ;;  %v6158_v59 = vld [vmem:[#allocation78_spill] sm:$0xff]  ;;  %v6161_v54 = vld [vmem:[#allocation80_spill] sm:$0xff]  ;;  %v6163_v6 = vld [vmem:[#allocation81_spill] sm:$0xff] }
 0x154   : > { %6147 = vst [vmem:[#allocation167_spill] sm:$0xff] %v3918_v55  ;;  %v3937_v14 = vsub.f32 %v428_v25, %v6158_v59  ;;  %v6160_v55 = vld [vmem:[#allocation79_spill] sm:$0xff]  ;;  %v6169_v18 = vld [vmem:[#allocation84_spill] sm:$0xff]  ;;  %v6171_v59 = vld [vmem:[#allocation85_spill] sm:$0xff] }
 0x155   : > { %6149 = vst [vmem:[#allocation168_spill] sm:$0xff] %v3921_v26  ;;  %v3940_v11 = vsub.f32 %v428_v25, %v6160_v55  ;;  %v6173_v55 = vld [vmem:[#allocation86_spill] sm:$0xff] }
 0x156   : > { %6151 = vst [vmem:[#allocation169_spill] sm:$0xff] %v3924_v10  ;;  %v3944_v10 = vsub.f32 %v428_v25, %v6161_v54  ;;  %v6175_v54 = vld [vmem:[#allocation87_spill] sm:$0xff] }
 0x157   : > { %6153 = vst [vmem:[#allocation170_spill] sm:$0xff] %v3927_v15  ;;  %v3947_v15 = vsub.f32 %v428_v25, %v6163_v6  ;;  %v6177_v6 = vld [vmem:[#allocation88_spill] sm:$0xff] }
 0x158   : > { %1792 = vst [vmem:[%s3650_s20 + $0x2f0] sm:$0xff] %v2068_v22  ;;  %v6165_v22 = vld [vmem:[#allocation82_spill] sm:$0xff] }
 0x159   : > { %6155 = vst [vmem:[#allocation171_spill] sm:$0xff] %v3931_v42  ;;  %v3950_v26 = vsub.f32 %v428_v25, %v6165_v22  ;;  %v3953_v42 = vsub.f32 %v428_v25, %v6167_v60  ;;  %v6178_v22 = vld [vmem:[#allocation132_spill] sm:$0xff]  ;;  %v6180_v60 = vld [vmem:[#allocation133_spill] sm:$0xff] }
 0x15a   : > { %6157 = vst [vmem:[#allocation172_spill] sm:$0xff] %v3934_v29  ;;  %v3956_v29 = vsub.f32 %v428_v25, %v6169_v18  ;;  %v6182_v18 = vld [vmem:[#allocation134_spill] sm:$0xff] }
 0x15b   : > { %6159 = vst [vmem:[#allocation173_spill] sm:$0xff] %v3937_v14  ;;  %v3959_v14 = vsub.f32 %v428_v25, %v6171_v59  ;;  %v6184_v59 = vld [vmem:[#allocation135_spill] sm:$0xff] }
 0x15c   : > { %1793 = vst [vmem:[%s3650_s20 + $0x2f8] sm:$0xff] %v2070_v36  ;;  %v3962_v36 = vsub.f32 %v428_v25, %v6173_v55  ;;  %v6186_v55 = vld [vmem:[#allocation136_spill] sm:$0xff] }
 0x15d   : > { %6162 = vst [vmem:[#allocation174_spill] sm:$0xff] %v3944_v10  ;;  %v3965_v10 = vsub.f32 %v428_v25, %v6175_v54  ;;  %v6188_v54 = vld [vmem:[#allocation137_spill] sm:$0xff] }
 0x15e   : > { %6164 = vst [vmem:[#allocation175_spill] sm:$0xff] %v3947_v15  ;;  %v3968_v15 = vsub.f32 %v428_v25, %v6177_v6  ;;  %v6190_v25 = vld [vmem:[#allocation138_spill] sm:$0xff] }
 0x15f   : > { %6166 = vst [vmem:[#allocation176_spill] sm:$0xff] %v3950_v26  ;;  %v3971_v26 = vsub.f32 %v632_v13, %v6178_v22  ;;  %v3989_v6 = vsub.f32 %v632_v13, %v6190_v25  ;;  %v6192_v22 = vld [vmem:[#allocation139_spill] sm:$0xff]  ;;  %v6204_v25 = vld [vmem:[#allocation145_spill] sm:$0xff] }
 0x160   : > { %6168 = vst [vmem:[#allocation177_spill] sm:$0xff] %v3953_v42  ;;  %v3974_v42 = vsub.f32 %v632_v13, %v6180_v60  ;;  %v6194_v60 = vld [vmem:[#allocation140_spill] sm:$0xff] }
 0x161   : > { %6170 = vst [vmem:[#allocation178_spill] sm:$0xff] %v3956_v29  ;;  %v3977_v29 = vsub.f32 %v632_v13, %v6182_v18  ;;  %v6196_v18 = vld [vmem:[#allocation141_spill] sm:$0xff] }
 0x162   : > { %6172 = vst [vmem:[#allocation179_spill] sm:$0xff] %v3959_v14  ;;  %v3980_v14 = vsub.f32 %v632_v13, %v6184_v59  ;;  %v6198_v59 = vld [vmem:[#allocation142_spill] sm:$0xff] }
 0x163   : > { %6174 = vst [vmem:[#allocation180_spill] sm:$0xff] %v3962_v36  ;;  %v3983_v36 = vsub.f32 %v632_v13, %v6186_v55  ;;  %v6200_v55 = vld [vmem:[#allocation143_spill] sm:$0xff] }
 0x164   : > { %6176 = vst [vmem:[#allocation181_spill] sm:$0xff] %v3965_v10  ;;  %v3986_v10 = vsub.f32 %v632_v13, %v6188_v54  ;;  %v6202_v54 = vld [vmem:[#allocation144_spill] sm:$0xff] }
 0x165   : > { %6179 = vst [vmem:[#allocation182_spill] sm:$0xff] %v3971_v26  ;;  %v3992_v26 = vsub.f32 %v632_v13, %v6192_v22  ;;  %v6206_v22 = vld [vmem:[#allocation146_spill] sm:$0xff] }
 0x166   : > { %6181 = vst [vmem:[#allocation183_spill] sm:$0xff] %v3974_v42  ;;  %v3995_v42 = vsub.f32 %v632_v13, %v6194_v60  ;;  %v6208_v60 = vld [vmem:[#allocation147_spill] sm:$0xff] }
 0x167   : > { %6183 = vst [vmem:[#allocation184_spill] sm:$0xff] %v3977_v29  ;;  %v3998_v29 = vsub.f32 %v632_v13, %v6196_v18  ;;  %v6210_v18 = vld [vmem:[#allocation148_spill] sm:$0xff] }
 0x168   : > { %6185 = vst [vmem:[#allocation185_spill] sm:$0xff] %v3980_v14  ;;  %v4001_v14 = vsub.f32 %v632_v13, %v6198_v59  ;;  %v6212_v59 = vld [vmem:[#allocation149_spill] sm:$0xff] }
 0x169   : > { %6187 = vst [vmem:[#allocation186_spill] sm:$0xff] %v3983_v36  ;;  %v4004_v36 = vsub.f32 %v632_v13, %v6200_v55  ;;  %v6214_v55 = vld [vmem:[#allocation150_spill] sm:$0xff] }
 0x16a   : > { %6189 = vst [vmem:[#allocation187_spill] sm:$0xff] %v3986_v10  ;;  %v4007_v10 = vsub.f32 %v632_v13, %v6202_v54  ;;  %v6216_v54 = vld [vmem:[#allocation151_spill] sm:$0xff] }
 0x16b   : > { %6191 = vst [vmem:[#allocation188_spill] sm:$0xff] %v3989_v6  ;;  %v4010_v6 = vsub.f32 %v632_v13, %v6204_v25  ;;  %v6218_v25 = vld [vmem:[#allocation152_spill] sm:$0xff] }
 0x16c   : > { %6193 = vst [vmem:[#allocation189_spill] sm:$0xff] %v3992_v26  ;;  %v4013_v26 = vsub.f32 %v632_v13, %v6206_v22  ;;  %v6220_v22 = vld [vmem:[#allocation153_spill] sm:$0xff] }
 0x16d   : > { %6195 = vst [vmem:[#allocation190_spill] sm:$0xff] %v3995_v42  ;;  %v4016_v42 = vsub.f32 %v632_v13, %v6208_v60  ;;  %v6222_v60 = vld [vmem:[#allocation154_spill] sm:$0xff] }
 0x16e   : > { %6197 = vst [vmem:[#allocation191_spill] sm:$0xff] %v3998_v29  ;;  %v4019_v29 = vsub.f32 %v632_v13, %v6210_v18  ;;  %v6224_v18 = vld [vmem:[#allocation155_spill] sm:$0xff] }
 0x16f   : > { %6199 = vst [vmem:[#allocation192_spill] sm:$0xff] %v4001_v14  ;;  %v4022_v14 = vsub.f32 %v632_v13, %v6212_v59  ;;  %v6226_v59 = vld [vmem:[#allocation156_spill] sm:$0xff] }
 0x170   : > { %6201 = vst [vmem:[#allocation193_spill] sm:$0xff] %v4004_v36  ;;  %v4025_v36 = vsub.f32 %v632_v13, %v6214_v55  ;;  %v6228_v55 = vld [vmem:[#allocation157_spill] sm:$0xff] }
 0x171   : > { %6203 = vst [vmem:[#allocation194_spill] sm:$0xff] %v4007_v10  ;;  %v4028_v10 = vsub.f32 %v632_v13, %v6216_v54  ;;  %v6230_v54 = vld [vmem:[#allocation158_spill] sm:$0xff] }
 0x172   : > { %6205 = vst [vmem:[#allocation195_spill] sm:$0xff] %v4010_v6  ;;  %v4031_v6 = vsub.f32 %v632_v13, %v6218_v25  ;;  %v6232_v25 = vld [vmem:[#allocation159_spill] sm:$0xff] }
 0x173   : > { %6207 = vst [vmem:[#allocation108_spill] sm:$0xff] %v4013_v26  ;;  %v4034_v26 = vsub.f32 %v632_v13, %v6220_v22  ;;  %v6234_v22 = vld [vmem:[#allocation160_spill] sm:$0xff] }
 0x174   : > { %6209 = vst [vmem:[#allocation109_spill] sm:$0xff] %v4016_v42  ;;  %v4037_v42 = vsub.f32 %v632_v13, %v6222_v60  ;;  %v6236_v60 = vld [vmem:[#allocation161_spill] sm:$0xff] }
 0x175   : > { %6211 = vst [vmem:[#allocation110_spill] sm:$0xff] %v4019_v29  ;;  %v4040_v29 = vsub.f32 %v632_v13, %v6224_v18  ;;  %v6238_v18 = vld [vmem:[#allocation162_spill] sm:$0xff] }
 0x176   : > { %6213 = vst [vmem:[#allocation111_spill] sm:$0xff] %v4022_v14  ;;  %v4043_v14 = vsub.f32 %v632_v13, %v6226_v59  ;;  %v6240_v59 = vld [vmem:[#allocation163_spill] sm:$0xff] }
 0x177   : > { %6215 = vst [vmem:[#allocation89_spill] sm:$0xff] %v4025_v36  ;;  %v4046_v36 = vsub.f32 %v632_v13, %v6228_v55  ;;  %v4068_v55 = vmul.f32 %v3728_v1, %v3728_v1  ;;  %v4088_v1 = vmul.f32 %v3751_v52, %v3751_v52  ;;  %v4108_v52 = vmul.f32 %v3773_v61, %v3773_v61 }
 0x178   : > { %6217 = vst [vmem:[#allocation90_spill] sm:$0xff] %v4028_v10  ;;  %v4049_v10 = vsub.f32 %v632_v13, %v6230_v54  ;;  %v4128_v61 = vmul.f32 %v3797_v20, %v3797_v20  ;;  %v4148_v20 = vmul.f32 %v3818_v45, %v3818_v45  ;;  %v4168_v45 = vmul.f32 %v3840_v51, %v3840_v51  ;;  %v6252_v54 = vld [vmem:[#allocation167_spill] sm:$0xff] }
 0x179   : > { %6219 = vst [vmem:[#allocation91_spill] sm:$0xff] %v4031_v6  ;;  %v4052_v6 = vsub.f32 %v632_v13, %v6232_v25  ;;  %v4072_v25 = vmul.f32 %v3733_v35, %v3733_v35  ;;  %v4092_v35 = vmul.f32 %v3756_v41, %v3756_v41  ;;  %v4112_v41 = vmul.f32 %v3777_v34, %v3777_v34 }
 0x17a   : > { %6221 = vst [vmem:[#allocation8_spill] sm:$0xff] %v4034_v26  ;;  %v4055_v26 = vsub.f32 %v632_v13, %v6234_v22  ;;  %v4076_v22 = vmul.f32 %v3738_v16, %v3738_v16  ;;  %v4096_v16 = vmul.f32 %v3760_v32, %v3760_v32  ;;  %v4116_v32 = vmul.f32 %v3782_v9, %v3782_v9 }
 0x17b   : > { %6223 = vst [vmem:[#allocation9_spill] sm:$0xff] %v4037_v42  ;;  %v4058_v42 = vsub.f32 %v632_v13, %v6236_v60  ;;  %v4080_v60 = vmul.f32 %v3743_v7, %v3743_v7  ;;  %v4100_v7 = vmul.f32 %v3764_v4, %v3764_v4  ;;  %v4120_v4 = vmul.f32 %v3786_v63, %v3786_v63 }
 0x17c   : > { %6225 = vst [vmem:[#allocation10_spill] sm:$0xff] %v4040_v29  ;;  %v4061_v29 = vsub.f32 %v632_v13, %v6238_v18  ;;  %v4132_v34 = vmul.f32 %v3801_v33, %v3801_v33  ;;  %v4136_v9 = vmul.f32 %v3805_v48, %v3805_v48  ;;  %v4140_v63 = vmul.f32 %v3810_v50, %v3810_v50 }
 0x17d   : > { %6227 = vst [vmem:[#allocation11_spill] sm:$0xff] %v4043_v14  ;;  %v4064_v14 = vsub.f32 %v632_v13, %v6240_v59  ;;  %v4084_v13 = vmul.f32 %v3747_v47, %v3747_v47  ;;  %v4104_v47 = vmul.f32 %v3769_v12, %v3769_v12  ;;  %v4124_v12 = vmul.f32 %v3790_v17, %v3790_v17 }
 0x17e   : > { %6229 = vst [vmem:[#allocation12_spill] sm:$0xff] %v4046_v36  ;;  %v4144_v17 = vmul.f32 %v3814_v46, %v3814_v46  ;;  %v4152_v33 = vmul.f32 %v3823_v30, %v3823_v30  ;;  %v4156_v48 = vmul.f32 %v3827_v53, %v3827_v53  ;;  %v4160_v50 = vmul.f32 %v3831_v3, %v3831_v3  ;;  %v6259_v36 = vld [vmem:[#allocation174_spill] sm:$0xff] }
 0x17f   : > { %6231 = vst [vmem:[#allocation13_spill] sm:$0xff] %v4049_v10  ;;  %v4164_v46 = vmul.f32 %v3836_v19, %v3836_v19  ;;  %v4172_v30 = vmul.f32 %v3844_v38, %v3844_v38  ;;  %v4176_v53 = vmul.f32 %v3849_v62, %v3849_v62  ;;  %v4180_v3 = vmul.f32 %v3853_v56, %v3853_v56  ;;  %v6258_v10 = vld [vmem:[#allocation173_spill] sm:$0xff] }
 0x180   : > { %6233 = vst [vmem:[#allocation14_spill] sm:$0xff] %v4052_v6  ;;  %v4184_v19 = vmul.f32 %v3857_v49, %v3857_v49  ;;  %v4188_v51 = vmul.f32 %v3861_v58, %v3861_v58  ;;  %v4192_v38 = vmul.f32 %v3866_v5, %v3866_v5  ;;  %v930_v62 = vmul.f32 %v3869_v31, %v3869_v31  ;;  %v6257_v6 = vld [vmem:[#allocation172_spill] sm:$0xff] }
 0x181   : > { %6235 = vst [vmem:[#allocation15_spill] sm:$0xff] %v4055_v26  ;;  %v931_v59 = vmul.f32 %v3872_v2, %v3872_v2  ;;  %v932_v56 = vmul.f32 %v3875_v8, %v3875_v8  ;;  %v933_v49 = vmul.f32 %v3879_v27, %v3879_v27  ;;  %v934_v58 = vmul.f32 %v3882_v57, %v3882_v57  ;;  %v6256_v26 = vld [vmem:[#allocation171_spill] sm:$0xff] }
 0x182   : > { %6237 = vst [vmem:[#allocation16_spill] sm:$0xff] %v4058_v42  ;;  %v935_v18 = vmul.f32 %v3885_v44, %v3885_v44  ;;  %v936_v5 = vmul.f32 %v3888_v23, %v3888_v23  ;;  %v937_v31 = vmul.f32 %v3892_v0, %v3892_v0  ;;  %v938_v2 = vmul.f32 %v3895_v21, %v3895_v21  ;;  %v6255_v42 = vld [vmem:[#allocation170_spill] sm:$0xff] }
 0x183   : > { %6239 = vst [vmem:[#allocation17_spill] sm:$0xff] %v4061_v29  ;;  %v939_v8 = vmul.f32 %v3898_v40, %v3898_v40  ;;  %v940_v27 = vmul.f32 %v3901_v43, %v3901_v43  ;;  %v941_v57 = vmul.f32 %v3905_v24, %v3905_v24  ;;  %v942_v44 = vmul.f32 %v3908_v39, %v3908_v39  ;;  %v6254_v29 = vld [vmem:[#allocation169_spill] sm:$0xff] }
 0x184   : > { %6241 = vst [vmem:[#allocation18_spill] sm:$0xff] %v4064_v14  ;;  %v943_v23 = vmul.f32 %v3911_v28, %v3911_v28  ;;  %v944_v0 = vmul.f32 %v3914_v37, %v3914_v37  ;;  %v945_v21 = vmul.f32 %v6252_v54, %v6252_v54  ;;  %v6253_v14 = vld [vmem:[#allocation168_spill] sm:$0xff]  ;;  %v947_v43 = vmul.f32 %v6254_v29, %v6254_v29 }
 0x185   : > { %6242 = vst [vmem:[#allocation19_spill] sm:$0xff] %v4156_v48  ;;  %v946_v40 = vmul.f32 %v6253_v14, %v6253_v14  ;;  %v948_v24 = vmul.f32 %v6255_v42, %v6255_v42  ;;  %v949_v39 = vmul.f32 %v6256_v26, %v6256_v26  ;;  %v950_v28 = vmul.f32 %v6257_v6, %v6257_v6 }
 0x186   : > { %6243 = vst [vmem:[#allocation20_spill] sm:$0xff] %v4160_v50  ;;  %v951_v37 = vmul.f32 %v6258_v10, %v6258_v10  ;;  %v952_v54 = vmul.f32 %v3940_v11, %v3940_v11  ;;  %v953_v14 = vmul.f32 %v6259_v36, %v6259_v36  ;;  %v1030_v50 = vadd.f32 %v934_v58, %v4084_v13 }
 0x187   : > { %6244 = vst [vmem:[#allocation21_spill] sm:$0xff] %v4164_v46  ;;  %v1027_v46 = vadd.f32 %v931_v59, %v4072_v25  ;;  %v4266_v48 = vadd.f32 %v937_v31, %v4096_v16  ;;  %v4281_v59 = vadd.f32 %v942_v44, %v4116_v32  ;;  %v4290_v25 = vadd.f32 %v945_v21, %v4128_v61  ;;  %v6283_v44 = vld [vmem:[#allocation183_spill] sm:$0xff] }
 0x188   : > { %6245 = vst [vmem:[#allocation22_spill] sm:$0xff] %v4168_v45  ;;  %v6266_v45 = vld [vmem:[#allocation181_spill] sm:$0xff]  ;;  %v4293_v13 = vadd.f32 %v946_v40, %v4132_v34  ;;  %v4302_v16 = vadd.f32 %v949_v39, %v4144_v17 }
 0x189   : > { %6246 = vst [vmem:[#allocation23_spill] sm:$0xff] %v4172_v30  ;;  %v6265_v30 = vld [vmem:[#allocation180_spill] sm:$0xff]  ;;  %v960_v36 = vmul.f32 %v6266_v45, %v6266_v45  ;;  %v4269_v45 = vadd.f32 %v938_v2, %v4100_v7  ;;  %v4305_v7 = vadd.f32 %v950_v28, %v4148_v20  ;;  %v6285_v40 = vld [vmem:[#allocation185_spill] sm:$0xff]  ;;  %v6287_v28 = vld [vmem:[#allocation187_spill] sm:$0xff] }
 0x18a   : > { %6247 = vst [vmem:[#allocation92_spill] sm:$0xff] %v4176_v53  ;;  %v6264_v53 = vld [vmem:[#allocation179_spill] sm:$0xff]  ;;  %v959_v11 = vmul.f32 %v6265_v30, %v6265_v30  ;;  %v1032_v30 = vadd.f32 %v936_v5, %v4092_v35  ;;  %v4299_v35 = vadd.f32 %v948_v24, %v4140_v63  ;;  %v6286_v24 = vld [vmem:[#allocation186_spill] sm:$0xff] }
 0x18b   : > { %6248 = vst [vmem:[#allocation93_spill] sm:$0xff] %v4180_v3  ;;  %v6263_v3 = vld [vmem:[#allocation178_spill] sm:$0xff]  ;;  %v958_v10 = vmul.f32 %v6264_v53, %v6264_v53  ;;  %v1031_v53 = vadd.f32 %v935_v18, %v4088_v1  ;;  %v4284_v18 = vadd.f32 %v943_v23, %v4120_v4  ;;  %v4296_v1 = vadd.f32 %v947_v43, %v4136_v9 }
 0x18c   : > { %6249 = vst [vmem:[#allocation94_spill] sm:$0xff] %v4184_v19  ;;  %v6262_v19 = vld [vmem:[#allocation177_spill] sm:$0xff]  ;;  %v957_v6 = vmul.f32 %v6263_v3, %v6263_v3  ;;  %v1029_v3 = vadd.f32 %v933_v49, %v4080_v60  ;;  %v4278_v60 = vadd.f32 %v941_v57, %v4112_v41  ;;  %v1123_v23 = vmul.f32 %v6283_v44, %v6283_v44 }
 0x18d   : > { %6250 = vst [vmem:[#allocation95_spill] sm:$0xff] %v4188_v51  ;;  %v6261_v51 = vld [vmem:[#allocation176_spill] sm:$0xff]  ;;  %v956_v26 = vmul.f32 %v6262_v19, %v6262_v19  ;;  %v1028_v19 = vadd.f32 %v932_v56, %v4076_v22  ;;  %v4287_v22 = vadd.f32 %v944_v0, %v4124_v12  ;;  %v1125_v43 = vmul.f32 %v6285_v40, %v6285_v40 }
 0x18e   : > { %6251 = vst [vmem:[#allocation96_spill] sm:$0xff] %v4192_v38  ;;  %v6260_v38 = vld [vmem:[#allocation175_spill] sm:$0xff]  ;;  %v955_v42 = vmul.f32 %v6261_v51, %v6261_v51  ;;  %v1026_v51 = vadd.f32 %v930_v62, %v4068_v55  ;;  %v4275_v55 = vadd.f32 %v940_v27, %v4108_v52  ;;  %v6268_v32 = vld [vmem:[#allocation20_spill] sm:$0xff]  ;;  %v6269_v12 = vld [vmem:[#allocation21_spill] sm:$0xff]  ;;  %v1126_v39 = vmul.f32 %v6286_v24, %v6286_v24 }
 0x18f   : > { %v954_v29 = vmul.f32 %v6260_v38, %v6260_v38  ;;  %v961_v38 = vmul.f32 %v3968_v15, %v3968_v15  ;;  %v4272_v15 = vadd.f32 %v939_v8, %v4104_v47  ;;  %v4308_v47 = vadd.f32 %v951_v37, %v4152_v33  ;;  %v6267_v52 = vld [vmem:[#allocation19_spill] sm:$0xff]  ;;  %v6270_v34 = vld [vmem:[#allocation22_spill] sm:$0xff]  ;;  %v6284_v0 = vld [vmem:[#allocation184_spill] sm:$0xff] }
 0x190   : > { %v4311_v41 = vadd.f32 %v952_v54, %v6267_v52  ;;  %v4314_v4 = vadd.f32 %v953_v14, %v6268_v32  ;;  %v4320_v9 = vadd.f32 %v955_v42, %v6270_v34  ;;  %v6271_v63 = vld [vmem:[#allocation23_spill] sm:$0xff]  ;;  %v6282_v27 = vld [vmem:[#allocation182_spill] sm:$0xff]  ;;  %v1124_v21 = vmul.f32 %v6284_v0, %v6284_v0  ;;  %v6288_v54 = vld [vmem:[#allocation188_spill] sm:$0xff] }
 0x191   : > { %v4317_v61 = vadd.f32 %v954_v29, %v6269_v12  ;;  %v4323_v17 = vadd.f32 %v956_v26, %v6271_v63  ;;  %v6272_v20 = vld [vmem:[#allocation92_spill] sm:$0xff]  ;;  %v1122_v57 = vmul.f32 %v6282_v27, %v6282_v27  ;;  %v1127_v37 = vmul.f32 %v6287_v28, %v6287_v28  ;;  %v6289_v29 = vld [vmem:[#allocation189_spill] sm:$0xff]  ;;  %v6290_v26 = vld [vmem:[#allocation190_spill] sm:$0xff] }
 0x192   : > { %v4326_v62 = vadd.f32 %v957_v6, %v6272_v20  ;;  %v6274_v33 = vld [vmem:[#allocation93_spill] sm:$0xff]  ;;  %v1128_v14 = vmul.f32 %v6288_v54, %v6288_v54  ;;  %v1129_v42 = vmul.f32 %v6289_v29, %v6289_v29  ;;  %v1130_v6 = vmul.f32 %v6290_v26, %v6290_v26  ;;  %v6294_v12 = vld [vmem:[#allocation194_spill] sm:$0xff]  ;;  %v6295_v63 = vld [vmem:[#allocation195_spill] sm:$0xff] }
 0x193   : > { %v4329_v56 = vadd.f32 %v958_v10, %v6274_v33  ;;  %v6276_v49 = vld [vmem:[#allocation94_spill] sm:$0xff]  ;;  %v6291_v10 = vld [vmem:[#allocation191_spill] sm:$0xff]  ;;  %v6293_v52 = vld [vmem:[#allocation193_spill] sm:$0xff]  ;;  %v1134_v34 = vmul.f32 %v6294_v12, %v6294_v12  ;;  %v1135_v20 = vmul.f32 %v6295_v63, %v6295_v63  ;;  %v1218_v26 = vadd.f32 %v1122_v57, %v1026_v51 }
 0x194   : > { %6273 = vst [vmem:[#allocation97_spill] sm:$0xff] %v4326_v62  ;;  %v4332_v58 = vadd.f32 %v959_v11, %v6276_v49  ;;  %v6278_v5 = vld [vmem:[#allocation95_spill] sm:$0xff]  ;;  %v1131_v11 = vmul.f32 %v6291_v10, %v6291_v10  ;;  %v1133_v32 = vmul.f32 %v6293_v52, %v6293_v52  ;;  %v6296_v33 = vld [vmem:[#allocation108_spill] sm:$0xff]  ;;  %v6298_v27 = vld [vmem:[#allocation110_spill] sm:$0xff]  ;;  %v1219_v10 = vadd.f32 %v1123_v23, %v1027_v46 }
 0x195   : > { %6275 = vst [vmem:[#allocation167_spill] sm:$0xff] %v4329_v56  ;;  %v4335_v31 = vadd.f32 %v960_v36, %v6278_v5  ;;  %v6280_v2 = vld [vmem:[#allocation96_spill] sm:$0xff]  ;;  %v1136_v49 = vmul.f32 %v6296_v33, %v6296_v33  ;;  %v6297_v5 = vld [vmem:[#allocation109_spill] sm:$0xff]  ;;  %v1138_v44 = vmul.f32 %v6298_v27, %v6298_v27  ;;  %v6299_v0 = vld [vmem:[#allocation111_spill] sm:$0xff]  ;;  %v1222_v57 = vadd.f32 %v1126_v39, %v1030_v50 }
 0x196   : > { %6277 = vst [vmem:[#allocation168_spill] sm:$0xff] %v4332_v58  ;;  %v4338_v8 = vadd.f32 %v961_v38, %v6280_v2  ;;  %v6292_v36 = vld [vmem:[#allocation192_spill] sm:$0xff]  ;;  %v1137_v2 = vmul.f32 %v6297_v5, %v6297_v5  ;;  %v1139_v40 = vmul.f32 %v6299_v0, %v6299_v0  ;;  %v6300_v24 = vld [vmem:[#allocation89_spill] sm:$0xff]  ;;  %v6301_v54 = vld [vmem:[#allocation90_spill] sm:$0xff]  ;;  %v1221_v0 = vadd.f32 %v1125_v43, %v1029_v3 }
 0x197   : > { %6279 = vst [vmem:[#allocation169_spill] sm:$0xff] %v4335_v31  ;;  %v1132_v38 = vmul.f32 %v6292_v36, %v6292_v36  ;;  %v1140_v28 = vmul.f32 %v6300_v24, %v6300_v24  ;;  %v1141_v29 = vmul.f32 %v6301_v54, %v6301_v54  ;;  %v1220_v36 = vadd.f32 %v1124_v21, %v1028_v19  ;;  %v6302_v52 = vld [vmem:[#allocation91_spill] sm:$0xff]  ;;  %v6303_v63 = vld [vmem:[#allocation8_spill] sm:$0xff]  ;;  %v6304_v5 = vld [vmem:[#allocation9_spill] sm:$0xff] }
 0x198   : > { %6281 = vst [vmem:[#allocation170_spill] sm:$0xff] %v4338_v8  ;;  %v1142_v12 = vmul.f32 %v6302_v52, %v6302_v52  ;;  %v1143_v33 = vmul.f32 %v6303_v63, %v6303_v63  ;;  %v4386_v27 = vmul.f32 %v6304_v5, %v6304_v5  ;;  %v6305_v8 = vld [vmem:[#allocation10_spill] sm:$0xff]  ;;  %v6306_v31 = vld [vmem:[#allocation11_spill] sm:$0xff]  ;;  %v6307_v46 = vld [vmem:[#allocation12_spill] sm:$0xff]  ;;  %v1223_v52 = vadd.f32 %v1127_v37, %v1031_v53 }
 0x199   : > { %v4390_v24 = vmul.f32 %v6305_v8, %v6305_v8  ;;  %v4394_v51 = vmul.f32 %v6306_v31, %v6306_v31  ;;  %v4398_v19 = vmul.f32 %v6307_v46, %v6307_v46  ;;  %v6308_v23 = vld [vmem:[#allocation13_spill] sm:$0xff]  ;;  %v6309_v54 = vld [vmem:[#allocation14_spill] sm:$0xff]  ;;  %v6311_v43 = vld [vmem:[#allocation15_spill] sm:$0xff]  ;;  %v1224_v31 = vadd.f32 %v1128_v14, %v1032_v30 }
 0x19a   : > { %v4402_v21 = vmul.f32 %v6308_v23, %v6308_v23  ;;  %v4406_v3 = vmul.f32 %v6309_v54, %v6309_v54  ;;  %v4410_v8 = vmul.f32 %v6311_v43, %v6311_v43  ;;  %v6313_v63 = vld [vmem:[#allocation98_spill] sm:$0xff]  ;;  %v6314_v58 = vld [vmem:[#allocation99_spill] sm:$0xff]  ;;  %v6315_v56 = vld [vmem:[#allocation100_spill] sm:$0xff]  ;;  %v1226_v37 = vadd.f32 %v1130_v6, %v4269_v45 }
 0x19b   : > { %v1410_v5 = vmul.f32 %v6313_v63, %v1218_v26  ;;  %v1411_v46 = vmul.f32 %v6314_v58, %v1219_v10  ;;  %v1412_v50 = vmul.f32 %v6315_v56, %v1220_v36  ;;  %v6316_v39 = vld [vmem:[#allocation16_spill] sm:$0xff]  ;;  %v6317_v62 = vld [vmem:[#allocation17_spill] sm:$0xff]  ;;  %v6319_v53 = vld [vmem:[#allocation18_spill] sm:$0xff]  ;;  %v1227_v14 = vadd.f32 %v1131_v11, %v4272_v15 }
 0x19c   : > { %6310 = vst [vmem:[#allocation171_spill] sm:$0xff] %v4406_v3  ;;  %v4417_v23 = vmul.f32 %v6316_v39, %v6316_v39  ;;  %v4421_v54 = vmul.f32 %v6317_v62, %v6317_v62  ;;  %v1225_v3 = vadd.f32 %v1129_v42, %v4266_v48  ;;  %v6318_v43 = vld [vmem:[#allocation112_spill] sm:$0xff]  ;;  %v4427_v30 = vmul.f32 %v6319_v53, %v6319_v53  ;;  %v6320_v26 = vld [vmem:[#allocation113_spill] sm:$0xff]  ;;  %v6321_v56 = vld [vmem:[#allocation114_spill] sm:$0xff] }
 0x19d   : > { %6312 = vst [vmem:[#allocation172_spill] sm:$0xff] %v4410_v8  ;;  %v1413_v8 = vmul.f32 %v6318_v43, %v1221_v0  ;;  %v1414_v10 = vmul.f32 %v6320_v26, %v1222_v57  ;;  %v1228_v36 = vadd.f32 %v1132_v38, %v4275_v55  ;;  %v1229_v39 = vadd.f32 %v1133_v32, %v4278_v60  ;;  %v6322_v42 = vld [vmem:[#allocation115_spill] sm:$0xff]  ;;  %v6323_v15 = vld [vmem:[#allocation116_spill] sm:$0xff]  ;;  %v6324_v38 = vld [vmem:[#allocation117_spill] sm:$0xff] }
 0x19e   : > { %v1230_v62 = vadd.f32 %v1134_v34, %v4281_v59  ;;  %v1415_v48 = vmul.f32 %v6321_v56, %v1223_v52  ;;  %v1416_v0 = vmul.f32 %v6322_v42, %v1224_v31  ;;  %v1506_v43 = vmul.f32 1.442695, %v1410_v5  ;;  %v6325_v34 = vld [vmem:[#allocation118_spill] sm:$0xff]  ;;  %v6328_v5 = vld [vmem:[#allocation121_spill] sm:$0xff]  ;;  %v6417_v42 = vld [vmem:[#allocation79_spill] sm:$0xff] }
 0x19f   : > { %v1508_v58 = vmul.f32 1.442695, %v1411_v46  ;;  %v1510_v53 = vmul.f32 1.442695, %v1412_v50  ;;  %v1231_v63 = vadd.f32 %v1135_v20, %v4284_v18  ;;  %v1232_v45 = vadd.f32 %v1136_v49, %v4287_v22  ;;  %v6326_v18 = vld [vmem:[#allocation119_spill] sm:$0xff]  ;;  %v6419_v56 = vld [vmem:[#allocation80_spill] sm:$0xff] }
 0x1a0   : > { %v1417_v6 = vmul.f32 %v6323_v15, %v1225_v3  ;;  %v1512_v11 = vmul.f32 1.442695, %v1413_v8  ;;  %v1233_v55 = vadd.f32 %v1137_v2, %v4290_v25  ;;  %v1418_v60 = vmul.f32 %v6324_v38, %v1226_v37  ;;  %v6327_v3 = vld [vmem:[#allocation120_spill] sm:$0xff]  ;;  %v636_v38 = vpop.permute.xlu1 %635  ;;  %v6415_v15 = vld [vmem:[#allocation78_spill] sm:$0xff]  ;;  %v6421_v26 = vld [vmem:[#allocation81_spill] sm:$0xff] }
 0x1a1   : > { %2071 = vpow2.f32 %v1506_v43  ;;  %v1514_v59 = vmul.f32 1.442695, %v1414_v10  ;;  %v1234_v32 = vadd.f32 %v1138_v44, %v4293_v13  ;;  %v1419_v57 = vmul.f32 %v6325_v34, %v1227_v14  ;;  %v6331_v14 = vld [vmem:[#allocation124_spill] sm:$0xff] }
 0x1a2   : > { %2073 = vpow2.f32 %v1508_v58  ;;  %v1516_v52 = vmul.f32 1.442695, %v1415_v48  ;;  %v1235_v31 = vadd.f32 %v1139_v40, %v4296_v1  ;;  %v1420_v20 = vmul.f32 %v6326_v18, %v1228_v36  ;;  %v6329_v1 = vld [vmem:[#allocation122_spill] sm:$0xff]  ;;  %v6332_v36 = vld [vmem:[#allocation125_spill] sm:$0xff]  ;;  %v6409_v18 = vld [vmem:[#allocation75_spill] sm:$0xff] }
 0x1a3   : > { %2075 = vpow2.f32 %v1510_v53  ;;  %v1518_v22 = vmul.f32 1.442695, %v1416_v0  ;;  %v1236_v49 = vadd.f32 %v1140_v28, %v4299_v35  ;;  %v1421_v25 = vmul.f32 %v6327_v3, %v1229_v39  ;;  %v6330_v28 = vld [vmem:[#allocation123_spill] sm:$0xff]  ;;  %v6407_v3 = vld [vmem:[#allocation74_spill] sm:$0xff]  ;;  %v6411_v34 = vld [vmem:[#allocation76_spill] sm:$0xff] }
 0x1a4   : > { %2077 = vpow2.f32 %v1512_v11  ;;  %v1520_v2 = vmul.f32 1.442695, %v1417_v6  ;;  %v1237_v8 = vadd.f32 %v1141_v29, %v4302_v16  ;;  %v1422_v13 = vmul.f32 %v6328_v5, %v1230_v62 }
 0x1a5   : > { %2079 = vpow2.f32 %v1514_v59  ;;  %v1522_v58 = vmul.f32 1.442695, %v1418_v60  ;;  %v1238_v44 = vadd.f32 %v1142_v12, %v4305_v7  ;;  %v1423_v40 = vmul.f32 %v6329_v1, %v1231_v63  ;;  %v6336_v59 = vld [vmem:[#allocation97_spill] sm:$0xff] }
 0x1a6   : > { %2081 = vpow2.f32 %v1516_v52  ;;  %v1524_v46 = vmul.f32 1.442695, %v1419_v57  ;;  %v1239_v35 = vadd.f32 %v1143_v33, %v4308_v47  ;;  %v1424_v43 = vmul.f32 %v6330_v28, %v1232_v45 }
 0x1a7   : > { %v2072_v50 = vpop.eup %2071  ;;  %2083 = vpow2.f32 %v1518_v22  ;;  %v1526_v37 = vmul.f32 1.442695, %v1420_v20  ;;  %v1240_v29 = vadd.f32 %v4386_v27, %v4311_v41  ;;  %v1425_v10 = vmul.f32 %v6331_v14, %v1233_v55  ;;  %v6333_v27 = vld [vmem:[#allocation126_spill] sm:$0xff]  ;;  %v6339_v20 = vld [vmem:[#allocation167_spill] sm:$0xff]  ;;  %v6340_v22 = vld [vmem:[#allocation172_spill] sm:$0xff] }
 0x1a8   : > { %v2074_v16 = vpop.eup %2073  ;;  %2085 = vpow2.f32 %v1520_v2  ;;  %v1528_v7 = vmul.f32 1.442695, %v1421_v25  ;;  %1698 = vst [vmem:[%s3650_s20] sm:$0xff] %v2072_v50  ;;  %v1241_v63 = vadd.f32 %v4390_v24, %v4314_v4  ;;  %v1426_v47 = vmul.f32 %v6332_v36, %v1234_v32  ;;  %v6334_v24 = vld [vmem:[#allocation127_spill] sm:$0xff]  ;;  %v6344_v50 = vld [vmem:[#allocation169_spill] sm:$0xff] }
 0x1a9   : > { %v2076_v12 = vpop.eup %2075  ;;  %2087 = vpow2.f32 %v1522_v58  ;;  %v1530_v33 = vmul.f32 1.442695, %v1422_v13  ;;  %1699 = vst [vmem:[%s3650_s20 + $0x8] sm:$0xff] %v2074_v16  ;;  %v1242_v41 = vadd.f32 %v4394_v51, %v4317_v61  ;;  %v1427_v62 = vmul.f32 %v6333_v27, %v1235_v31  ;;  %v6335_v51 = vld [vmem:[#allocation128_spill] sm:$0xff]  ;;  %v6337_v32 = vld [vmem:[#allocation171_spill] sm:$0xff]  ;;  %v6401_v14 = vld [vmem:[#allocation69_spill] sm:$0xff] }
 0x1aa   : > { %v2078_v39 = vpop.eup %2077  ;;  %2089 = vpow2.f32 %v1524_v46  ;;  %v1532_v48 = vmul.f32 1.442695, %v1423_v40  ;;  %1700 = vst [vmem:[%s3650_s20 + $0x10] sm:$0xff] %v2076_v12  ;;  %v1243_v4 = vadd.f32 %v4398_v19, %v4320_v9  ;;  %v1428_v53 = vmul.f32 %v6334_v24, %v1236_v49  ;;  %v6338_v19 = vld [vmem:[#allocation129_spill] sm:$0xff]  ;;  %v6343_v58 = vld [vmem:[#allocation131_spill] sm:$0xff]  ;;  %v6347_v12 = vld [vmem:[#allocation102_spill] sm:$0xff] }
 0x1ab   : > { %v2080_v0 = vpop.eup %2079  ;;  %2091 = vpow2.f32 %v1526_v37  ;;  %v1534_v45 = vmul.f32 1.442695, %v1424_v43  ;;  %1701 = vst [vmem:[%s3650_s20 + $0x18] sm:$0xff] %v2078_v39  ;;  %v1244_v61 = vadd.f32 %v4402_v21, %v4323_v17  ;;  %v1429_v11 = vmul.f32 %v6335_v51, %v1237_v8  ;;  %v6341_v21 = vld [vmem:[#allocation130_spill] sm:$0xff]  ;;  %v6342_v8 = vld [vmem:[#allocation168_spill] sm:$0xff]  ;;  %v6345_v37 = vld [vmem:[#allocation101_spill] sm:$0xff] }
 0x1ac   : > { %v2082_v6 = vpop.eup %2081  ;;  %2093 = vpow2.f32 %v1528_v7  ;;  %v1536_v55 = vmul.f32 1.442695, %v1425_v10  ;;  %1702 = vst [vmem:[%s3650_s20 + $0x20] sm:$0xff] %v2080_v0  ;;  %v1245_v9 = vadd.f32 %v6337_v32, %v6336_v59  ;;  %v1430_v57 = vmul.f32 %v6338_v19, %v1238_v44  ;;  %v6346_v7 = vld [vmem:[#allocation170_spill] sm:$0xff]  ;;  %v6348_v39 = vld [vmem:[#allocation103_spill] sm:$0xff]  ;;  %v6353_v32 = vld [vmem:[#allocation164_spill] sm:$0xff] }
 0x1ad   : > { %v2084_v60 = vpop.eup %2083  ;;  %2095 = vpow2.f32 %v1530_v33  ;;  %v1538_v52 = vmul.f32 1.442695, %v1426_v47  ;;  %1703 = vst [vmem:[%s3650_s20 + $0x28] sm:$0xff] %v2082_v6  ;;  %v1246_v17 = vadd.f32 %v6340_v22, %v6339_v20  ;;  %v1431_v49 = vmul.f32 %v6341_v21, %v1239_v35  ;;  %v6351_v6 = vld [vmem:[#allocation106_spill] sm:$0xff] }
 0x1ae   : > { %v2086_v31 = vpop.eup %2085  ;;  %2097 = vpow2.f32 %v1532_v48  ;;  %v1540_v25 = vmul.f32 1.442695, %v1427_v62  ;;  %1704 = vst [vmem:[%s3650_s20 + $0x30] sm:$0xff] %v2084_v60  ;;  %v1247_v13 = vadd.f32 %v4417_v23, %v6342_v8  ;;  %v1432_v44 = vmul.f32 %v6343_v58, %v1240_v29  ;;  %v6349_v48 = vld [vmem:[#allocation104_spill] sm:$0xff]  ;;  %v6395_v58 = vld [vmem:[#allocation63_spill] sm:$0xff] }
 0x1af   : > { %v2088_v2 = vpop.eup %2087  ;;  %2099 = vpow2.f32 %v1534_v45  ;;  %v1542_v40 = vmul.f32 1.442695, %v1428_v53  ;;  %1705 = vst [vmem:[%s3650_s20 + $0x38] sm:$0xff] %v2086_v31  ;;  %v1248_v43 = vadd.f32 %v4421_v54, %v6344_v50  ;;  %v1433_v35 = vmul.f32 %v6345_v37, %v1241_v63  ;;  %v6350_v53 = vld [vmem:[#allocation105_spill] sm:$0xff] }
 0x1b0   : > { %v2090_v46 = vpop.eup %2089  ;;  %2101 = vpow2.f32 %v1536_v55  ;;  %v1544_v16 = vmul.f32 1.442695, %v1429_v11  ;;  %1706 = vst [vmem:[%s3650_s20 + $0x40] sm:$0xff] %v2088_v2  ;;  %v1249_v23 = vadd.f32 %v4427_v30, %v6346_v7  ;;  %v1434_v29 = vmul.f32 %v6347_v12, %v1242_v41  ;;  %v6352_v55 = vld [vmem:[#allocation107_spill] sm:$0xff]  ;;  %v6356_v2 = vld [vmem:[#allocation166_spill] sm:$0xff] }
 0x1b1   : > { %v2092_v10 = vpop.eup %2091  ;;  %2103 = vpow2.f32 %v1538_v52  ;;  %v1546_v47 = vmul.f32 1.442695, %v1430_v57  ;;  %1707 = vst [vmem:[%s3650_s20 + $0x48] sm:$0xff] %v2090_v46  ;;  %v1435_v62 = vmul.f32 %v6348_v39, %v1243_v4  ;;  %v1548_v54 = vmul.f32 1.442695, %v1431_v49  ;;  %v6357_v46 = vld [vmem:[#allocation25_spill] sm:$0xff] }
 0x1b2   : > { %v2094_v33 = vpop.eup %2093  ;;  %2105 = vpow2.f32 %v1540_v25  ;;  %1708 = vst [vmem:[%s3650_s20 + $0x50] sm:$0xff] %v2092_v10  ;;  %v1436_v0 = vmul.f32 %v6349_v48, %v1244_v61  ;;  %v1437_v45 = vmul.f32 %v6350_v53, %v1245_v9  ;;  %v1550_v30 = vmul.f32 1.442695, %v1432_v44  ;;  %v6354_v61 = vld [vmem:[#allocation165_spill] sm:$0xff]  ;;  %v6355_v25 = vld [vmem:[#allocation24_spill] sm:$0xff]  ;;  %v6358_v10 = vld [vmem:[#allocation26_spill] sm:$0xff] }
 0x1b3   : > { %v2096_v63 = vpop.eup %2095  ;;  %2107 = vpow2.f32 %v1542_v40  ;;  %1709 = vst [vmem:[%s3650_s20 + $0x58] sm:$0xff] %v2094_v33  ;;  %v1438_v11 = vmul.f32 %v6351_v6, %v1246_v17  ;;  %v1439_v60 = vmul.f32 %v6352_v55, %v1247_v13  ;;  %v1552_v4 = vmul.f32 1.442695, %v1433_v35  ;;  %v6360_v33 = vld [vmem:[#allocation28_spill] sm:$0xff] }
 0x1b4   : > { %v2098_v41 = vpop.eup %2097  ;;  %2109 = vpow2.f32 %v1544_v16  ;;  %1710 = vst [vmem:[%s3650_s20 + $0x60] sm:$0xff] %v2096_v63  ;;  %v1440_v57 = vmul.f32 %v6353_v32, %v1248_v43  ;;  %v1441_v52 = vmul.f32 %v6354_v61, %v1249_v23  ;;  %v1554_v9 = vmul.f32 1.442695, %v1434_v29  ;;  %v6359_v29 = vld [vmem:[#allocation27_spill] sm:$0xff]  ;;  %v6389_v53 = vld [vmem:[#allocation56_spill] sm:$0xff] }
 0x1b5   : > { %v2100_v59 = vpop.eup %2099  ;;  %2111 = vpow2.f32 %v1546_v47  ;;  %1711 = vst [vmem:[%s3650_s20 + $0x68] sm:$0xff] %v2098_v41  ;;  %v1556_v20 = vmul.f32 1.442695, %v1435_v62  ;;  %v1558_v17 = vmul.f32 1.442695, %v1436_v0  ;;  %v4509_v8 = vsub.f32 %v6356_v2, %v6355_v25  ;;  %v6363_v41 = vld [vmem:[#allocation31_spill] sm:$0xff] }
 0x1b6   : > { %v2102_v31 = vpop.eup %2101  ;;  %2113 = vpow2.f32 %v1548_v54  ;;  %1712 = vst [vmem:[%s3650_s20 + $0x70] sm:$0xff] %v2100_v59  ;;  %v1560_v49 = vmul.f32 1.442695, %v1437_v45  ;;  %v1562_v44 = vmul.f32 1.442695, %v1438_v11  ;;  %v4514_v50 = vsub.f32 %v6356_v2, %v6357_v46  ;;  %v6361_v54 = vld [vmem:[#allocation29_spill] sm:$0xff] }
 0x1b7   : > { %v2104_v22 = vpop.eup %2103  ;;  %2115 = vpow2.f32 %v1550_v30  ;;  %1713 = vst [vmem:[%s3650_s20 + $0x78] sm:$0xff] %v2102_v31  ;;  %v1564_v40 = vmul.f32 1.442695, %v1439_v60  ;;  %v1566_v35 = vmul.f32 1.442695, %v1440_v57  ;;  %v4519_v7 = vsub.f32 %v6356_v2, %v6358_v10  ;;  %v6362_v45 = vld [vmem:[#allocation30_spill] sm:$0xff] }
 0x1b8   : > { %v2106_v13 = vpop.eup %2105  ;;  %2117 = vpow2.f32 %v1552_v4  ;;  %1714 = vst [vmem:[%s3650_s20 + $0x80] sm:$0xff] %v2104_v22  ;;  %v1568_v16 = vmul.f32 1.442695, %v1441_v52  ;;  %v4524_v47 = vsub.f32 %v6356_v2, %v6359_v29  ;;  %v4528_v62 = vsub.f32 %v6356_v2, %v6360_v33  ;;  %v6364_v60 = vld [vmem:[#allocation32_spill] sm:$0xff]  ;;  %v6365_v57 = vld [vmem:[#allocation33_spill] sm:$0xff]  ;;  %v6371_v29 = vld [vmem:[#allocation39_spill] sm:$0xff] }
 0x1b9   : > { %v2108_v43 = vpop.eup %2107  ;;  %2119 = vpow2.f32 %v1554_v9  ;;  %1715 = vst [vmem:[%s3650_s20 + $0x88] sm:$0xff] %v2106_v13  ;;  %v4532_v63 = vsub.f32 %v6356_v2, %v6361_v54  ;;  %v4537_v30 = vsub.f32 %v6356_v2, %v6362_v45  ;;  %v4541_v11 = vsub.f32 %v6356_v2, %v6363_v41  ;;  %v6366_v9 = vld [vmem:[#allocation34_spill] sm:$0xff]  ;;  %v6368_v25 = vld [vmem:[#allocation36_spill] sm:$0xff]  ;;  %v6369_v13 = vld [vmem:[#allocation37_spill] sm:$0xff] }
 0x1ba   : > { %v2110_v23 = vpop.eup %2109  ;;  %2121 = vpow2.f32 %v1556_v20  ;;  %1716 = vst [vmem:[%s3650_s20 + $0x90] sm:$0xff] %v2108_v43  ;;  %v4545_v4 = vsub.f32 %v6356_v2, %v6364_v60  ;;  %v4550_v52 = vsub.f32 %v6356_v2, %v6365_v57  ;;  %v4554_v31 = vsub.f32 %v6356_v2, %v6366_v9  ;;  %v6367_v20 = vld [vmem:[#allocation35_spill] sm:$0xff]  ;;  %v6370_v43 = vld [vmem:[#allocation38_spill] sm:$0xff]  ;;  %v6372_v33 = vld [vmem:[#allocation40_spill] sm:$0xff] }
 0x1bb   : > { %v2112_v0 = vpop.eup %2111  ;;  %2123 = vpow2.f32 %v1558_v17  ;;  %1717 = vst [vmem:[%s3650_s20 + $0x98] sm:$0xff] %v2110_v23  ;;  %v4558_v22 = vsub.f32 %v6356_v2, %v6367_v20  ;;  %v4567_v46 = vsub.f32 %v6356_v2, %v6369_v13  ;;  %v4571_v10 = vsub.f32 %v6356_v2, %v6370_v43  ;;  %v6374_v60 = vld [vmem:[#allocation42_spill] sm:$0xff]  ;;  %v6376_v9 = vld [vmem:[#allocation44_spill] sm:$0xff] }
 0x1bc   : > { %v2114_v59 = vpop.eup %2113  ;;  %2125 = vpow2.f32 %v1560_v49  ;;  %1718 = vst [vmem:[%s3650_s20 + $0xa0] sm:$0xff] %v2112_v0  ;;  %v4563_v49 = vsub.f32 %v6356_v2, %v6368_v25  ;;  %v4580_v54 = vsub.f32 %v6356_v2, %v6372_v33  ;;  %v6373_v0 = vld [vmem:[#allocation41_spill] sm:$0xff]  ;;  %v4597_v20 = vsub.f32 %v6356_v2, %v6376_v9  ;;  %v6378_v13 = vld [vmem:[#allocation46_spill] sm:$0xff] }
 0x1bd   : > { %v2116_v17 = vpop.eup %2115  ;;  %2127 = vpow2.f32 %v1562_v44  ;;  %1719 = vst [vmem:[%s3650_s20 + $0xa8] sm:$0xff] %v2114_v59  ;;  %v4576_v44 = vsub.f32 %v6356_v2, %v6371_v29  ;;  %v4584_v45 = vsub.f32 %v6356_v2, %v6373_v0  ;;  %v6375_v59 = vld [vmem:[#allocation43_spill] sm:$0xff]  ;;  %v6377_v25 = vld [vmem:[#allocation45_spill] sm:$0xff]  ;;  %v4606_v43 = vsub.f32 %v6356_v2, %v6378_v13  ;;  %v6380_v0 = vld [vmem:[#allocation48_spill] sm:$0xff] }
 0x1be   : > { %v2118_v23 = vpop.eup %2117  ;;  %2129 = vpow2.f32 %v1564_v40  ;;  %1720 = vst [vmem:[%s3650_s20 + $0xb0] sm:$0xff] %v2116_v17  ;;  %v4589_v40 = vsub.f32 %v6356_v2, %v6374_v60  ;;  %v4593_v57 = vsub.f32 %v6356_v2, %v6375_v59  ;;  %v4615_v60 = vsub.f32 %v6356_v2, %v6380_v0  ;;  %v6382_v59 = vld [vmem:[#allocation50_spill] sm:$0xff]  ;;  %v6385_v0 = vld [vmem:[#allocation53_spill] sm:$0xff] }
 0x1bf   : > { %v2120_v41 = vpop.eup %2119  ;;  %2131 = vpow2.f32 %v1566_v35  ;;  %1721 = vst [vmem:[%s3650_s20 + $0xb8] sm:$0xff] %v2118_v23  ;;  %v4602_v35 = vsub.f32 %v6356_v2, %v6377_v25  ;;  %v6379_v23 = vld [vmem:[#allocation47_spill] sm:$0xff]  ;;  %v4623_v9 = vsub.f32 %v6356_v2, %v6382_v59  ;;  %v4636_v32 = vsub.f32 %v6356_v2, %v6385_v0 }
 0x1c0   : > { %v2122_v17 = vpop.eup %2121  ;;  %2133 = vpow2.f32 %v1568_v16  ;;  %1722 = vst [vmem:[%s3650_s20 + $0xc0] sm:$0xff] %v2120_v41  ;;  %v4610_v29 = vsub.f32 %v6356_v2, %v6379_v23  ;;  %v6381_v16 = vld [vmem:[#allocation49_spill] sm:$0xff]  ;;  %v6383_v25 = vld [vmem:[#allocation51_spill] sm:$0xff]  ;;  %v4674_v21 = vsub.f32 %v6389_v53, %v6395_v58  ;;  %v6400_v58 = vld [vmem:[#allocation68_spill] sm:$0xff] }
 0x1c1   : > { %v2124_v33 = vpop.eup %2123  ;;  %1723 = vst [vmem:[%s3650_s20 + $0xc8] sm:$0xff] %v2122_v17  ;;  %v4619_v41 = vsub.f32 %v6356_v2, %v6381_v16  ;;  %v4627_v13 = vsub.f32 %v6356_v2, %v6383_v25  ;;  %v6384_v17 = vld [vmem:[#allocation52_spill] sm:$0xff]  ;;  %v6386_v16 = vld [vmem:[#allocation54_spill] sm:$0xff]  ;;  %v6387_v59 = vld [vmem:[#allocation55_spill] sm:$0xff]  ;;  %v4695_v36 = vsub.f32 %v6389_v53, %v6400_v58 }
 0x1c2   : > { %v2126_v23 = vpop.eup %2125  ;;  %1724 = vst [vmem:[%s3650_s20 + $0xd0] sm:$0xff] %v2124_v33  ;;  %v4632_v61 = vsub.f32 %v6356_v2, %v6384_v17  ;;  %v4640_v55 = vsub.f32 %v6356_v2, %v6386_v16  ;;  %v4644_v6 = vsub.f32 %v6356_v2, %v6387_v59  ;;  %v6388_v33 = vld [vmem:[#allocation57_spill] sm:$0xff]  ;;  %v6390_v17 = vld [vmem:[#allocation58_spill] sm:$0xff]  ;;  %v6391_v0 = vld [vmem:[#allocation59_spill] sm:$0xff] }
 0x1c3   : > { %v2128_v25 = vpop.eup %2127  ;;  %1725 = vst [vmem:[%s3650_s20 + $0xd8] sm:$0xff] %v2126_v23  ;;  %v4649_v48 = vsub.f32 %v6389_v53, %v6388_v33  ;;  %v4653_v39 = vsub.f32 %v6389_v53, %v6390_v17  ;;  %v4657_v12 = vsub.f32 %v6389_v53, %v6391_v0  ;;  %v6392_v16 = vld [vmem:[#allocation60_spill] sm:$0xff]  ;;  %v6393_v23 = vld [vmem:[#allocation61_spill] sm:$0xff]  ;;  %v6394_v33 = vld [vmem:[#allocation62_spill] sm:$0xff] }
 0x1c4   : > { %v4661_v37 = vsub.f32 %v6389_v53, %v6392_v16  ;;  %v2130_v2 = vpop.eup %2129  ;;  %1726 = vst [vmem:[%s3650_s20 + $0xe0] sm:$0xff] %v2128_v25  ;;  %v4666_v59 = vsub.f32 %v6389_v53, %v6393_v23  ;;  %v4670_v17 = vsub.f32 %v6389_v53, %v6394_v33  ;;  %v6396_v0 = vld [vmem:[#allocation64_spill] sm:$0xff]  ;;  %v6397_v25 = vld [vmem:[#allocation65_spill] sm:$0xff]  ;;  %v6398_v23 = vld [vmem:[#allocation66_spill] sm:$0xff] }
 0x1c5   : > { %v4678_v19 = vsub.f32 %v6389_v53, %v6396_v0  ;;  %v2132_v16 = vpop.eup %2131  ;;  %1727 = vst [vmem:[%s3650_s20 + $0xe8] sm:$0xff] %v2130_v2  ;;  %v4683_v51 = vsub.f32 %v6389_v53, %v6397_v25  ;;  %v4687_v24 = vsub.f32 %v6389_v53, %v6398_v23  ;;  %v6399_v33 = vld [vmem:[#allocation67_spill] sm:$0xff]  ;;  %v4700_v2 = vsub.f32 %v6389_v53, %v6401_v14  ;;  %v6402_v25 = vld [vmem:[#allocation70_spill] sm:$0xff]  ;;  %v6405_v58 = vld [vmem:[#allocation73_spill] sm:$0xff] }
 0x1c6   : > { %v4691_v27 = vsub.f32 %v6389_v53, %v6399_v33  ;;  %v2134_v0 = vpop.eup %2133  ;;  %1728 = vst [vmem:[%s3650_s20 + $0xf0] sm:$0xff] %v2132_v16  ;;  %v4704_v28 = vsub.f32 %v6389_v53, %v6402_v25  ;;  %v6403_v23 = vld [vmem:[#allocation71_spill] sm:$0xff]  ;;  %v6404_v33 = vld [vmem:[#allocation72_spill] sm:$0xff]  ;;  %v4717_v16 = vsub.f32 %v6389_v53, %v6405_v58  ;;  %v4721_v14 = vsub.f32 %v6389_v53, %v6407_v3 }
 0x1c7   : > { %v4708_v1 = vsub.f32 %v6389_v53, %v6403_v23  ;;  %v4712_v5 = vsub.f32 %v6389_v53, %v6404_v33  ;;  %1729 = vst [vmem:[%s3650_s20 + $0xf8] sm:$0xff] %v2134_v0  ;;  %v4725_v25 = vsub.f32 %v6389_v53, %v6409_v18  ;;  %v4729_v23 = vsub.f32 %v6389_v53, %v6411_v34  ;;  %v6413_v33 = vld [vmem:[#allocation77_spill] sm:$0xff] }
 0x1c8   : > { %6406 = vst [vmem:[#allocation173_spill] sm:$0xff] %v4717_v16  ;;  %v4733_v0 = vsub.f32 %v6389_v53, %v6413_v33  ;;  %v4737_v58 = vsub.f32 %v6389_v53, %v6415_v15  ;;  %v4741_v3 = vsub.f32 %v6389_v53, %v6417_v42  ;;  %v4745_v18 = vsub.f32 %v6389_v53, %v6419_v56 }
 0x1c9   : > { %6408 = vst [vmem:[#allocation174_spill] sm:$0xff] %v4721_v14  ;;  %v4749_v34 = vsub.f32 %v6389_v53, %v6421_v26  ;;  %v6442_v14 = vld [vmem:[#allocation135_spill] sm:$0xff] }
 0x1ca   : > { %6410 = vst [vmem:[#allocation175_spill] sm:$0xff] %v4725_v25 }
 0x1cb   : > { %6412 = vst [vmem:[#allocation176_spill] sm:$0xff] %v4729_v23  ;;  %v6423_v23 = vld [vmem:[#allocation82_spill] sm:$0xff] }
 0x1cc   : > { %6414 = vst [vmem:[#allocation177_spill] sm:$0xff] %v4733_v0  ;;  %v4753_v33 = vsub.f32 %v6389_v53, %v6423_v23  ;;  %v6425_v0 = vld [vmem:[#allocation83_spill] sm:$0xff] }
 0x1cd   : > { %6416 = vst [vmem:[#allocation178_spill] sm:$0xff] %v4737_v58  ;;  %v4757_v15 = vsub.f32 %v6389_v53, %v6425_v0  ;;  %v6427_v58 = vld [vmem:[#allocation84_spill] sm:$0xff] }
 0x1ce   : > { %6418 = vst [vmem:[#allocation179_spill] sm:$0xff] %v4741_v3  ;;  %v4761_v42 = vsub.f32 %v6389_v53, %v6427_v58  ;;  %v6429_v3 = vld [vmem:[#allocation85_spill] sm:$0xff] }
 0x1cf   : > { %6420 = vst [vmem:[#allocation180_spill] sm:$0xff] %v4745_v18  ;;  %v4765_v56 = vsub.f32 %v6389_v53, %v6429_v3  ;;  %v6431_v18 = vld [vmem:[#allocation86_spill] sm:$0xff]  ;;  %v6438_v58 = vld [vmem:[#allocation133_spill] sm:$0xff] }
 0x1d0   : > { %6422 = vst [vmem:[#allocation181_spill] sm:$0xff] %v4749_v34  ;;  %v4769_v26 = vsub.f32 %v6389_v53, %v6431_v18  ;;  %v6433_v34 = vld [vmem:[#allocation87_spill] sm:$0xff]  ;;  %v6440_v3 = vld [vmem:[#allocation134_spill] sm:$0xff]  ;;  %v4789_v18 = vsub.f32 %v636_v38, %v6442_v14 }
 0x1d1   : > { %6424 = vst [vmem:[#allocation19_spill] sm:$0xff] %v4753_v33  ;;  %v4773_v23 = vsub.f32 %v6389_v53, %v6433_v34  ;;  %v6435_v33 = vld [vmem:[#allocation88_spill] sm:$0xff]  ;;  %v6446_v34 = vld [vmem:[#allocation137_spill] sm:$0xff]  ;;  %v6456_v14 = vld [vmem:[#allocation142_spill] sm:$0xff] }
 0x1d2   : > { %6426 = vst [vmem:[#allocation20_spill] sm:$0xff] %v4757_v15  ;;  %v4777_v0 = vsub.f32 %v6389_v53, %v6435_v33  ;;  %v6436_v15 = vld [vmem:[#allocation132_spill] sm:$0xff]  ;;  %v6448_v53 = vld [vmem:[#allocation138_spill] sm:$0xff] }
 0x1d3   : > { %6428 = vst [vmem:[#allocation21_spill] sm:$0xff] %v4761_v42  ;;  %v4780_v25 = vsub.f32 %v636_v38, %v6436_v15  ;;  %v4783_v42 = vsub.f32 %v636_v38, %v6438_v58  ;;  %v4798_v33 = vsub.f32 %v636_v38, %v6448_v53  ;;  %v6450_v15 = vld [vmem:[#allocation139_spill] sm:$0xff]  ;;  %v6452_v58 = vld [vmem:[#allocation140_spill] sm:$0xff]  ;;  %v6462_v53 = vld [vmem:[#allocation145_spill] sm:$0xff] }
 0x1d4   : > { %6430 = vst [vmem:[#allocation22_spill] sm:$0xff] %v4765_v56  ;;  %v4786_v56 = vsub.f32 %v636_v38, %v6440_v3  ;;  %v6454_v3 = vld [vmem:[#allocation141_spill] sm:$0xff] }
 0x1d5   : > { %6432 = vst [vmem:[#allocation23_spill] sm:$0xff] %v4769_v26  ;;  %v6444_v26 = vld [vmem:[#allocation136_spill] sm:$0xff] }
 0x1d6   : > { %6434 = vst [vmem:[#allocation92_spill] sm:$0xff] %v4773_v23  ;;  %v4792_v16 = vsub.f32 %v636_v38, %v6444_v26  ;;  %v4795_v23 = vsub.f32 %v636_v38, %v6446_v34  ;;  %v6458_v26 = vld [vmem:[#allocation143_spill] sm:$0xff]  ;;  %v6460_v34 = vld [vmem:[#allocation144_spill] sm:$0xff] }
 0x1d7   : > { %6437 = vst [vmem:[#allocation93_spill] sm:$0xff] %v4780_v25  ;;  %v4801_v25 = vsub.f32 %v636_v38, %v6450_v15  ;;  %v6464_v15 = vld [vmem:[#allocation146_spill] sm:$0xff] }
 0x1d8   : > { %6439 = vst [vmem:[#allocation94_spill] sm:$0xff] %v4783_v42  ;;  %v4804_v42 = vsub.f32 %v636_v38, %v6452_v58  ;;  %v6466_v58 = vld [vmem:[#allocation147_spill] sm:$0xff] }
 0x1d9   : > { %6441 = vst [vmem:[#allocation95_spill] sm:$0xff] %v4786_v56  ;;  %v4807_v56 = vsub.f32 %v636_v38, %v6454_v3  ;;  %v6468_v3 = vld [vmem:[#allocation148_spill] sm:$0xff] }
 0x1da   : > { %6443 = vst [vmem:[#allocation96_spill] sm:$0xff] %v4789_v18  ;;  %v4810_v18 = vsub.f32 %v636_v38, %v6456_v14  ;;  %v6470_v14 = vld [vmem:[#allocation149_spill] sm:$0xff] }
 0x1db   : > { %6445 = vst [vmem:[#allocation182_spill] sm:$0xff] %v4792_v16  ;;  %v4813_v16 = vsub.f32 %v636_v38, %v6458_v26  ;;  %v6472_v26 = vld [vmem:[#allocation150_spill] sm:$0xff] }
 0x1dc   : > { %6447 = vst [vmem:[#allocation183_spill] sm:$0xff] %v4795_v23  ;;  %v4816_v23 = vsub.f32 %v636_v38, %v6460_v34  ;;  %v6474_v34 = vld [vmem:[#allocation151_spill] sm:$0xff] }
 0x1dd   : > { %6449 = vst [vmem:[#allocation184_spill] sm:$0xff] %v4798_v33  ;;  %v4819_v33 = vsub.f32 %v636_v38, %v6462_v53  ;;  %v6476_v53 = vld [vmem:[#allocation152_spill] sm:$0xff] }
 0x1de   : > { %6451 = vst [vmem:[#allocation185_spill] sm:$0xff] %v4801_v25  ;;  %v4822_v25 = vsub.f32 %v636_v38, %v6464_v15  ;;  %v6478_v15 = vld [vmem:[#allocation153_spill] sm:$0xff] }
 0x1df   : > { %6453 = vst [vmem:[#allocation186_spill] sm:$0xff] %v4804_v42  ;;  %v4825_v42 = vsub.f32 %v636_v38, %v6466_v58  ;;  %v6480_v58 = vld [vmem:[#allocation154_spill] sm:$0xff] }
 0x1e0   : > { %6455 = vst [vmem:[#allocation187_spill] sm:$0xff] %v4807_v56  ;;  %v4828_v56 = vsub.f32 %v636_v38, %v6468_v3  ;;  %v6482_v3 = vld [vmem:[#allocation155_spill] sm:$0xff] }
 0x1e1   : > { %6457 = vst [vmem:[#allocation188_spill] sm:$0xff] %v4810_v18  ;;  %v4831_v18 = vsub.f32 %v636_v38, %v6470_v14  ;;  %v6484_v14 = vld [vmem:[#allocation156_spill] sm:$0xff] }
 0x1e2   : > { %6459 = vst [vmem:[#allocation189_spill] sm:$0xff] %v4813_v16  ;;  %v4834_v16 = vsub.f32 %v636_v38, %v6472_v26  ;;  %v6486_v26 = vld [vmem:[#allocation157_spill] sm:$0xff] }
 0x1e3   : > { %6461 = vst [vmem:[#allocation190_spill] sm:$0xff] %v4816_v23  ;;  %v4837_v23 = vsub.f32 %v636_v38, %v6474_v34  ;;  %v6488_v34 = vld [vmem:[#allocation158_spill] sm:$0xff] }
 0x1e4   : > { %6463 = vst [vmem:[#allocation191_spill] sm:$0xff] %v4819_v33  ;;  %v4840_v33 = vsub.f32 %v636_v38, %v6476_v53  ;;  %v6490_v53 = vld [vmem:[#allocation159_spill] sm:$0xff] }
 0x1e5   : > { %6465 = vst [vmem:[#allocation192_spill] sm:$0xff] %v4822_v25  ;;  %v4843_v25 = vsub.f32 %v636_v38, %v6478_v15  ;;  %v6492_v15 = vld [vmem:[#allocation160_spill] sm:$0xff] }
 0x1e6   : > { %6467 = vst [vmem:[#allocation193_spill] sm:$0xff] %v4825_v42  ;;  %v4846_v42 = vsub.f32 %v636_v38, %v6480_v58  ;;  %v6494_v58 = vld [vmem:[#allocation161_spill] sm:$0xff] }
 0x1e7   : > { %6469 = vst [vmem:[#allocation194_spill] sm:$0xff] %v4828_v56  ;;  %v4849_v56 = vsub.f32 %v636_v38, %v6482_v3  ;;  %v6496_v3 = vld [vmem:[#allocation162_spill] sm:$0xff] }
 0x1e8   : > { %6471 = vst [vmem:[#allocation195_spill] sm:$0xff] %v4831_v18  ;;  %v4852_v18 = vsub.f32 %v636_v38, %v6484_v14  ;;  %v6498_v14 = vld [vmem:[#allocation163_spill] sm:$0xff] }
 0x1e9   : > { %6473 = vst [vmem:[#allocation108_spill] sm:$0xff] %v4834_v16  ;;  %v4855_v16 = vsub.f32 %v636_v38, %v6486_v26  ;;  %v4877_v26 = vmul.f32 %v4509_v8, %v4509_v8  ;;  %v4897_v8 = vmul.f32 %v4532_v63, %v4532_v63  ;;  %v4917_v63 = vmul.f32 %v4554_v31, %v4554_v31 }
 0x1ea   : > { %6475 = vst [vmem:[#allocation109_spill] sm:$0xff] %v4837_v23  ;;  %v4858_v23 = vsub.f32 %v636_v38, %v6488_v34  ;;  %v4881_v34 = vmul.f32 %v4514_v50, %v4514_v50  ;;  %v4901_v50 = vmul.f32 %v4537_v30, %v4537_v30  ;;  %v4921_v30 = vmul.f32 %v4558_v22, %v4558_v22 }
 0x1eb   : > { %6477 = vst [vmem:[#allocation110_spill] sm:$0xff] %v4840_v33  ;;  %v4861_v33 = vsub.f32 %v636_v38, %v6490_v53  ;;  %v4885_v53 = vmul.f32 %v4519_v7, %v4519_v7  ;;  %v4905_v7 = vmul.f32 %v4541_v11, %v4541_v11  ;;  %v4925_v11 = vmul.f32 %v4563_v49, %v4563_v49 }
 0x1ec   : > { %6479 = vst [vmem:[#allocation111_spill] sm:$0xff] %v4843_v25  ;;  %v4864_v25 = vsub.f32 %v636_v38, %v6492_v15  ;;  %v4889_v15 = vmul.f32 %v4524_v47, %v4524_v47  ;;  %v4909_v47 = vmul.f32 %v4545_v4, %v4545_v4  ;;  %v4929_v4 = vmul.f32 %v4567_v46, %v4567_v46 }
 0x1ed   : > { %6481 = vst [vmem:[#allocation89_spill] sm:$0xff] %v4846_v42  ;;  %v4867_v42 = vsub.f32 %v636_v38, %v6494_v58  ;;  %v4937_v31 = vmul.f32 %v4576_v44, %v4576_v44  ;;  %v4941_v22 = vmul.f32 %v4580_v54, %v4580_v54  ;;  %v4945_v49 = vmul.f32 %v4584_v45, %v4584_v45 }
 0x1ee   : > { %6483 = vst [vmem:[#allocation90_spill] sm:$0xff] %v4849_v56  ;;  %v4870_v56 = vsub.f32 %v636_v38, %v6496_v3  ;;  %v4949_v46 = vmul.f32 %v4589_v40, %v4589_v40  ;;  %v4957_v44 = vmul.f32 %v4597_v20, %v4597_v20  ;;  %v4961_v54 = vmul.f32 %v4602_v35, %v4602_v35 }
 0x1ef   : > { %6485 = vst [vmem:[#allocation91_spill] sm:$0xff] %v4852_v18  ;;  %v4873_v18 = vsub.f32 %v636_v38, %v6498_v14  ;;  %v4893_v38 = vmul.f32 %v4528_v62, %v4528_v62  ;;  %v4913_v62 = vmul.f32 %v4550_v52, %v4550_v52  ;;  %v4933_v52 = vmul.f32 %v4571_v10, %v4571_v10  ;;  %v6510_v14 = vld [vmem:[#allocation173_spill] sm:$0xff] }
 0x1f0   : > { %6487 = vst [vmem:[#allocation8_spill] sm:$0xff] %v4855_v16  ;;  %v4953_v10 = vmul.f32 %v4593_v57, %v4593_v57  ;;  %v4965_v45 = vmul.f32 %v4606_v43, %v4606_v43  ;;  %v4969_v40 = vmul.f32 %v4610_v29, %v4610_v29  ;;  %v4973_v57 = vmul.f32 %v4615_v60, %v4615_v60  ;;  %v6517_v16 = vld [vmem:[#allocation180_spill] sm:$0xff] }
 0x1f1   : > { %6489 = vst [vmem:[#allocation9_spill] sm:$0xff] %v4858_v23  ;;  %v4977_v20 = vmul.f32 %v4619_v41, %v4619_v41  ;;  %v4981_v35 = vmul.f32 %v4623_v9, %v4623_v9  ;;  %v4985_v43 = vmul.f32 %v4627_v13, %v4627_v13  ;;  %v4989_v29 = vmul.f32 %v4632_v61, %v4632_v61  ;;  %v6516_v23 = vld [vmem:[#allocation179_spill] sm:$0xff] }
 0x1f2   : > { %6491 = vst [vmem:[#allocation10_spill] sm:$0xff] %v4861_v33  ;;  %v4993_v60 = vmul.f32 %v4636_v32, %v4636_v32  ;;  %v4997_v41 = vmul.f32 %v4640_v55, %v4640_v55  ;;  %v5001_v9 = vmul.f32 %v4644_v6, %v4644_v6  ;;  %v962_v13 = vmul.f32 %v4649_v48, %v4649_v48  ;;  %v6515_v33 = vld [vmem:[#allocation178_spill] sm:$0xff] }
 0x1f3   : > { %6493 = vst [vmem:[#allocation11_spill] sm:$0xff] %v4864_v25  ;;  %v963_v58 = vmul.f32 %v4653_v39, %v4653_v39  ;;  %v964_v61 = vmul.f32 %v4657_v12, %v4657_v12  ;;  %v965_v32 = vmul.f32 %v4661_v37, %v4661_v37  ;;  %v966_v55 = vmul.f32 %v4666_v59, %v4666_v59  ;;  %v6514_v25 = vld [vmem:[#allocation177_spill] sm:$0xff] }
 0x1f4   : > { %6495 = vst [vmem:[#allocation12_spill] sm:$0xff] %v4867_v42  ;;  %v967_v3 = vmul.f32 %v4670_v17, %v4670_v17  ;;  %v968_v6 = vmul.f32 %v4674_v21, %v4674_v21  ;;  %v969_v48 = vmul.f32 %v4678_v19, %v4678_v19  ;;  %v970_v39 = vmul.f32 %v4683_v51, %v4683_v51  ;;  %v6513_v42 = vld [vmem:[#allocation176_spill] sm:$0xff] }
 0x1f5   : > { %6497 = vst [vmem:[#allocation13_spill] sm:$0xff] %v4870_v56  ;;  %v971_v12 = vmul.f32 %v4687_v24, %v4687_v24  ;;  %v972_v37 = vmul.f32 %v4691_v27, %v4691_v27  ;;  %v973_v59 = vmul.f32 %v4695_v36, %v4695_v36  ;;  %v974_v17 = vmul.f32 %v4700_v2, %v4700_v2  ;;  %v6512_v56 = vld [vmem:[#allocation175_spill] sm:$0xff] }
 0x1f6   : > { %6499 = vst [vmem:[#allocation14_spill] sm:$0xff] %v4873_v18  ;;  %v975_v21 = vmul.f32 %v4704_v28, %v4704_v28  ;;  %v976_v19 = vmul.f32 %v4708_v1, %v4708_v1  ;;  %v977_v51 = vmul.f32 %v4712_v5, %v4712_v5  ;;  %v978_v24 = vmul.f32 %v6510_v14, %v6510_v14  ;;  %v6511_v18 = vld [vmem:[#allocation174_spill] sm:$0xff] }
 0x1f7   : > { %6500 = vst [vmem:[#allocation15_spill] sm:$0xff] %v4965_v45  ;;  %v979_v27 = vmul.f32 %v6511_v18, %v6511_v18  ;;  %v980_v36 = vmul.f32 %v6512_v56, %v6512_v56  ;;  %v981_v2 = vmul.f32 %v6513_v42, %v6513_v42  ;;  %v982_v28 = vmul.f32 %v6514_v25, %v6514_v25 }
 0x1f8   : > { %6501 = vst [vmem:[#allocation16_spill] sm:$0xff] %v4969_v40  ;;  %v983_v1 = vmul.f32 %v6515_v33, %v6515_v33  ;;  %v984_v5 = vmul.f32 %v6516_v23, %v6516_v23  ;;  %v985_v14 = vmul.f32 %v6517_v16, %v6517_v16  ;;  %v1062_v40 = vadd.f32 %v966_v55, %v4893_v38 }
 0x1f9   : > { %6502 = vst [vmem:[#allocation17_spill] sm:$0xff] %v4973_v57  ;;  %v1059_v57 = vadd.f32 %v963_v58, %v4881_v34  ;;  %v5075_v45 = vadd.f32 %v969_v48, %v4905_v7  ;;  %v5087_v34 = vadd.f32 %v973_v59, %v4921_v30  ;;  %v5096_v38 = vadd.f32 %v976_v19, %v4933_v52  ;;  %v6541_v19 = vld [vmem:[#allocation95_spill] sm:$0xff] }
 0x1fa   : > { %6503 = vst [vmem:[#allocation18_spill] sm:$0xff] %v4977_v20  ;;  %v6524_v20 = vld [vmem:[#allocation92_spill] sm:$0xff]  ;;  %v5105_v7 = vadd.f32 %v979_v27, %v4945_v49  ;;  %v5117_v30 = vadd.f32 %v983_v1, %v4961_v54 }
 0x1fb   : > { %6504 = vst [vmem:[#allocation97_spill] sm:$0xff] %v4981_v35  ;;  %v6523_v35 = vld [vmem:[#allocation23_spill] sm:$0xff]  ;;  %v992_v16 = vmul.f32 %v6524_v20, %v6524_v20  ;;  %v5078_v20 = vadd.f32 %v970_v39, %v4909_v47  ;;  %v5108_v47 = vadd.f32 %v980_v36, %v4949_v46  ;;  %v6543_v36 = vld [vmem:[#allocation182_spill] sm:$0xff] }
 0x1fc   : > { %6505 = vst [vmem:[#allocation171_spill] sm:$0xff] %v4985_v43  ;;  %v6522_v43 = vld [vmem:[#allocation22_spill] sm:$0xff]  ;;  %v991_v23 = vmul.f32 %v6523_v35, %v6523_v35  ;;  %v1064_v35 = vadd.f32 %v968_v6, %v4901_v50  ;;  %v5102_v50 = vadd.f32 %v978_v24, %v4941_v22  ;;  %v6542_v24 = vld [vmem:[#allocation96_spill] sm:$0xff] }
 0x1fd   : > { %6506 = vst [vmem:[#allocation167_spill] sm:$0xff] %v4989_v29  ;;  %v6521_v29 = vld [vmem:[#allocation21_spill] sm:$0xff]  ;;  %v990_v33 = vmul.f32 %v6522_v43, %v6522_v43  ;;  %v1063_v43 = vadd.f32 %v967_v3, %v4897_v8  ;;  %v5099_v8 = vadd.f32 %v977_v51, %v4937_v31  ;;  %v1156_v51 = vmul.f32 %v6541_v19, %v6541_v19 }
 0x1fe   : > { %6507 = vst [vmem:[#allocation172_spill] sm:$0xff] %v4993_v60  ;;  %v6520_v60 = vld [vmem:[#allocation20_spill] sm:$0xff]  ;;  %v989_v25 = vmul.f32 %v6521_v29, %v6521_v29  ;;  %v1061_v29 = vadd.f32 %v965_v32, %v4889_v15  ;;  %v5093_v15 = vadd.f32 %v975_v21, %v4929_v4  ;;  %v1157_v27 = vmul.f32 %v6542_v24, %v6542_v24 }
 0x1ff   : > { %6508 = vst [vmem:[#allocation168_spill] sm:$0xff] %v4997_v41  ;;  %v6519_v41 = vld [vmem:[#allocation19_spill] sm:$0xff]  ;;  %v988_v42 = vmul.f32 %v6520_v60, %v6520_v60  ;;  %v1060_v60 = vadd.f32 %v964_v61, %v4885_v53  ;;  %v5090_v53 = vadd.f32 %v974_v17, %v4925_v11  ;;  %v6526_v52 = vld [vmem:[#allocation16_spill] sm:$0xff]  ;;  %v6540_v17 = vld [vmem:[#allocation94_spill] sm:$0xff] }
 0x200   : > { %6509 = vst [vmem:[#allocation169_spill] sm:$0xff] %v5001_v9  ;;  %v6518_v9 = vld [vmem:[#allocation181_spill] sm:$0xff]  ;;  %v987_v56 = vmul.f32 %v6519_v41, %v6519_v41  ;;  %v1058_v41 = vadd.f32 %v962_v13, %v4877_v26  ;;  %v5084_v26 = vadd.f32 %v972_v37, %v4917_v63  ;;  %v5114_v63 = vadd.f32 %v982_v28, %v4957_v44  ;;  %v6525_v11 = vld [vmem:[#allocation15_spill] sm:$0xff] }
 0x201   : > { %v986_v18 = vmul.f32 %v6518_v9, %v6518_v9  ;;  %v993_v9 = vmul.f32 %v4777_v0, %v4777_v0  ;;  %v5081_v0 = vadd.f32 %v971_v12, %v4913_v62  ;;  %v5111_v62 = vadd.f32 %v981_v2, %v4953_v10  ;;  %v6527_v22 = vld [vmem:[#allocation17_spill] sm:$0xff]  ;;  %v6528_v46 = vld [vmem:[#allocation18_spill] sm:$0xff]  ;;  %v6544_v28 = vld [vmem:[#allocation183_spill] sm:$0xff] }
 0x202   : > { %v5120_v4 = vadd.f32 %v984_v5, %v6525_v11  ;;  %v5123_v31 = vadd.f32 %v985_v14, %v6526_v52  ;;  %v5129_v13 = vadd.f32 %v987_v56, %v6528_v46  ;;  %v6529_v10 = vld [vmem:[#allocation97_spill] sm:$0xff]  ;;  %v1155_v21 = vmul.f32 %v6540_v17, %v6540_v17  ;;  %v6545_v5 = vld [vmem:[#allocation184_spill] sm:$0xff] }
 0x203   : > { %v5126_v49 = vadd.f32 %v986_v18, %v6527_v22  ;;  %v5132_v58 = vadd.f32 %v988_v42, %v6529_v10  ;;  %v6530_v44 = vld [vmem:[#allocation171_spill] sm:$0xff]  ;;  %v6539_v37 = vld [vmem:[#allocation93_spill] sm:$0xff]  ;;  %v1158_v2 = vmul.f32 %v6543_v36, %v6543_v36  ;;  %v1159_v1 = vmul.f32 %v6544_v28, %v6544_v28  ;;  %v6547_v42 = vld [vmem:[#allocation186_spill] sm:$0xff] }
 0x204   : > { %v5135_v61 = vadd.f32 %v989_v25, %v6530_v44  ;;  %v6531_v54 = vld [vmem:[#allocation167_spill] sm:$0xff]  ;;  %v1154_v59 = vmul.f32 %v6539_v37, %v6539_v37  ;;  %v1160_v14 = vmul.f32 %v6545_v5, %v6545_v5  ;;  %v6546_v18 = vld [vmem:[#allocation185_spill] sm:$0xff]  ;;  %v1162_v25 = vmul.f32 %v6547_v42, %v6547_v42  ;;  %v6551_v22 = vld [vmem:[#allocation190_spill] sm:$0xff] }
 0x205   : > { %v5138_v32 = vadd.f32 %v990_v33, %v6531_v54  ;;  %v6533_v55 = vld [vmem:[#allocation172_spill] sm:$0xff]  ;;  %v1161_v56 = vmul.f32 %v6546_v18, %v6546_v18  ;;  %v6548_v33 = vld [vmem:[#allocation187_spill] sm:$0xff]  ;;  %v6550_v11 = vld [vmem:[#allocation189_spill] sm:$0xff]  ;;  %v1166_v46 = vmul.f32 %v6551_v22, %v6551_v22  ;;  %v1251_v24 = vadd.f32 %v1155_v21, %v1059_v57 }
 0x206   : > { %v5141_v3 = vadd.f32 %v991_v23, %v6533_v55  ;;  %v6535_v6 = vld [vmem:[#allocation168_spill] sm:$0xff]  ;;  %v1163_v23 = vmul.f32 %v6548_v33, %v6548_v33  ;;  %v1165_v52 = vmul.f32 %v6550_v11, %v6550_v11  ;;  %v6552_v10 = vld [vmem:[#allocation191_spill] sm:$0xff]  ;;  %v6555_v37 = vld [vmem:[#allocation194_spill] sm:$0xff]  ;;  %v1250_v19 = vadd.f32 %v1154_v59, %v1058_v41 }
 0x207   : > { %6532 = vst [vmem:[#allocation170_spill] sm:$0xff] %v5138_v32  ;;  %v5144_v48 = vadd.f32 %v992_v16, %v6535_v6  ;;  %v6537_v39 = vld [vmem:[#allocation169_spill] sm:$0xff]  ;;  %v6549_v16 = vld [vmem:[#allocation188_spill] sm:$0xff]  ;;  %v1167_v44 = vmul.f32 %v6552_v10, %v6552_v10  ;;  %v1170_v17 = vmul.f32 %v6555_v37, %v6555_v37  ;;  %v1252_v36 = vadd.f32 %v1156_v51, %v1060_v60  ;;  %v6556_v28 = vld [vmem:[#allocation195_spill] sm:$0xff] }
 0x208   : > { %6534 = vst [vmem:[#allocation24_spill] sm:$0xff] %v5141_v3  ;;  %v5147_v12 = vadd.f32 %v993_v9, %v6537_v39  ;;  %v1164_v9 = vmul.f32 %v6549_v16, %v6549_v16  ;;  %v6553_v54 = vld [vmem:[#allocation192_spill] sm:$0xff]  ;;  %v6554_v6 = vld [vmem:[#allocation193_spill] sm:$0xff]  ;;  %v1171_v5 = vmul.f32 %v6556_v28, %v6556_v28  ;;  %v1253_v11 = vadd.f32 %v1157_v27, %v1061_v29  ;;  %v6559_v22 = vld [vmem:[#allocation110_spill] sm:$0xff] }
 0x209   : > { %6536 = vst [vmem:[#allocation166_spill] sm:$0xff] %v5144_v48  ;;  %v1168_v55 = vmul.f32 %v6553_v54, %v6553_v54  ;;  %v1169_v39 = vmul.f32 %v6554_v6, %v6554_v6  ;;  %v6557_v18 = vld [vmem:[#allocation108_spill] sm:$0xff]  ;;  %v6558_v33 = vld [vmem:[#allocation109_spill] sm:$0xff]  ;;  %v5193_v10 = vmul.f32 %v6559_v22, %v6559_v22  ;;  %v6560_v54 = vld [vmem:[#allocation111_spill] sm:$0xff]  ;;  %v1254_v59 = vadd.f32 %v1158_v2, %v1062_v40 }
 0x20a   : > { %6538 = vst [vmem:[#allocation25_spill] sm:$0xff] %v5147_v12  ;;  %v1172_v42 = vmul.f32 %v6557_v18, %v6557_v18  ;;  %v5189_v16 = vmul.f32 %v6558_v33, %v6558_v33  ;;  %v5197_v41 = vmul.f32 %v6560_v54, %v6560_v54  ;;  %v6561_v57 = vld [vmem:[#allocation89_spill] sm:$0xff]  ;;  %v6562_v21 = vld [vmem:[#allocation90_spill] sm:$0xff]  ;;  %v6563_v6 = vld [vmem:[#allocation91_spill] sm:$0xff]  ;;  %v1255_v28 = vadd.f32 %v1159_v1, %v1063_v43 }
 0x20b   : > { %v5201_v60 = vmul.f32 %v6561_v57, %v6561_v57  ;;  %v5205_v51 = vmul.f32 %v6562_v21, %v6562_v21  ;;  %v5209_v29 = vmul.f32 %v6563_v6, %v6563_v6  ;;  %v6564_v27 = vld [vmem:[#allocation8_spill] sm:$0xff]  ;;  %v1256_v18 = vadd.f32 %v1160_v14, %v1064_v35  ;;  %v6565_v33 = vld [vmem:[#allocation98_spill] sm:$0xff]  ;;  %v6566_v54 = vld [vmem:[#allocation99_spill] sm:$0xff] }
 0x20c   : > { %v5213_v37 = vmul.f32 %v6564_v27, %v6564_v27  ;;  %v1442_v22 = vmul.f32 %v6565_v33, %v1250_v19  ;;  %v1443_v57 = vmul.f32 %v6566_v54, %v1251_v24  ;;  %v6567_v12 = vld [vmem:[#allocation100_spill] sm:$0xff]  ;;  %v6568_v2 = vld [vmem:[#allocation9_spill] sm:$0xff]  ;;  %v6569_v48 = vld [vmem:[#allocation10_spill] sm:$0xff]  ;;  %v1257_v3 = vadd.f32 %v1161_v56, %v5075_v45 }
 0x20d   : > { %v1444_v40 = vmul.f32 %v6567_v12, %v1252_v36  ;;  %v5220_v21 = vmul.f32 %v6568_v2, %v6568_v2  ;;  %v5224_v6 = vmul.f32 %v6569_v48, %v6569_v48  ;;  %v6570_v27 = vld [vmem:[#allocation112_spill] sm:$0xff]  ;;  %v6571_v43 = vld [vmem:[#allocation11_spill] sm:$0xff]  ;;  %v1258_v12 = vadd.f32 %v1162_v25, %v5078_v20  ;;  %v6574_v19 = vld [vmem:[#allocation113_spill] sm:$0xff] }
 0x20e   : > { %v1445_v32 = vmul.f32 %v6570_v27, %v1253_v11  ;;  %v5230_v35 = vmul.f32 %v6571_v43, %v6571_v43  ;;  %v6572_v1 = vld [vmem:[#allocation12_spill] sm:$0xff]  ;;  %v1446_v24 = vmul.f32 %v6574_v19, %v1254_v59  ;;  %v6575_v36 = vld [vmem:[#allocation13_spill] sm:$0xff]  ;;  %v1259_v45 = vadd.f32 %v1163_v23, %v5081_v0  ;;  %v6576_v11 = vld [vmem:[#allocation114_spill] sm:$0xff] }
 0x20f   : > { %v5234_v14 = vmul.f32 %v6572_v1, %v6572_v1  ;;  %v5240_v48 = vmul.f32 %v6575_v36, %v6575_v36  ;;  %v1260_v56 = vadd.f32 %v1164_v9, %v5084_v26  ;;  %v1447_v33 = vmul.f32 %v6576_v11, %v1255_v28  ;;  %v6577_v54 = vld [vmem:[#allocation115_spill] sm:$0xff]  ;;  %v6579_v59 = vld [vmem:[#allocation116_spill] sm:$0xff]  ;;  %v6580_v23 = vld [vmem:[#allocation117_spill] sm:$0xff] }
 0x210   : > { %v1448_v2 = vmul.f32 %v6577_v54, %v1256_v18  ;;  %v1570_v27 = vmul.f32 1.442695, %v1442_v22  ;;  %v1572_v43 = vmul.f32 1.442695, %v1443_v57  ;;  %v1574_v1 = vmul.f32 1.442695, %v1444_v40 }
 0x211   : > { %6573 = vst [vmem:[#allocation26_spill] sm:$0xff] %v5234_v14  ;;  %v6578_v14 = vld [vmem:[#allocation14_spill] sm:$0xff]  ;;  %v1261_v25 = vadd.f32 %v1165_v52, %v5087_v34  ;;  %v1449_v19 = vmul.f32 %v6579_v59, %v1257_v3  ;;  %v1576_v36 = vmul.f32 1.442695, %v1445_v32  ;;  %v1262_v0 = vadd.f32 %v1166_v46, %v5090_v53  ;;  %v6583_v3 = vld [vmem:[#allocation120_spill] sm:$0xff] }
 0x212   : > { %v5248_v20 = vmul.f32 %v6578_v14, %v6578_v14  ;;  %v1450_v26 = vmul.f32 %v6580_v23, %v1258_v12  ;;  %2135 = vpow2.f32 %v1570_v27  ;;  %v1578_v9 = vmul.f32 1.442695, %v1446_v24  ;;  %v6581_v18 = vld [vmem:[#allocation118_spill] sm:$0xff]  ;;  %v6582_v14 = vld [vmem:[#allocation119_spill] sm:$0xff]  ;;  %v6584_v12 = vld [vmem:[#allocation121_spill] sm:$0xff] }
 0x213   : > { %v1263_v28 = vadd.f32 %v1167_v44, %v5093_v15  ;;  %v1451_v22 = vmul.f32 %v6581_v18, %v1259_v45  ;;  %2137 = vpow2.f32 %v1572_v43  ;;  %v1580_v57 = vmul.f32 1.442695, %v1447_v33  ;;  %v6585_v45 = vld [vmem:[#allocation122_spill] sm:$0xff] }
 0x214   : > { %v1264_v40 = vadd.f32 %v1168_v55, %v5096_v38  ;;  %v1452_v11 = vmul.f32 %v6582_v14, %v1260_v56  ;;  %2139 = vpow2.f32 %v1574_v1  ;;  %v1582_v34 = vmul.f32 1.442695, %v1448_v2  ;;  %v6588_v1 = vld [vmem:[#allocation125_spill] sm:$0xff] }
 0x215   : > { %v1265_v32 = vadd.f32 %v1169_v39, %v5099_v8  ;;  %v1453_v53 = vmul.f32 %v6583_v3, %v1261_v25  ;;  %2141 = vpow2.f32 %v1576_v36  ;;  %v1584_v52 = vmul.f32 1.442695, %v1449_v19  ;;  %v6586_v39 = vld [vmem:[#allocation123_spill] sm:$0xff]  ;;  %v6589_v19 = vld [vmem:[#allocation126_spill] sm:$0xff] }
 0x216   : > { %v1266_v46 = vadd.f32 %v1170_v17, %v5102_v50  ;;  %v1454_v15 = vmul.f32 %v6584_v12, %v1262_v0  ;;  %2143 = vpow2.f32 %v1578_v9  ;;  %v1586_v44 = vmul.f32 1.442695, %v1450_v26  ;;  %v6587_v17 = vld [vmem:[#allocation124_spill] sm:$0xff] }
 0x217   : > { %v1267_v24 = vadd.f32 %v1171_v5, %v5105_v7  ;;  %v1455_v38 = vmul.f32 %v6585_v45, %v1263_v28  ;;  %2145 = vpow2.f32 %v1580_v57  ;;  %v1588_v55 = vmul.f32 1.442695, %v1451_v22 }
 0x218   : > { %v2136_v56 = vpop.eup %2135  ;;  %v1268_v8 = vadd.f32 %v1172_v42, %v5108_v47  ;;  %v1456_v33 = vmul.f32 %v6586_v39, %v1264_v40  ;;  %2147 = vpow2.f32 %v1582_v34  ;;  %v1590_v54 = vmul.f32 1.442695, %v1452_v11 }
 0x219   : > { %v2138_v2 = vpop.eup %2137  ;;  %v1269_v50 = vadd.f32 %v5189_v16, %v5111_v62  ;;  %v1457_v27 = vmul.f32 %v6587_v17, %v1265_v32  ;;  %2149 = vpow2.f32 %v1584_v52  ;;  %v1592_v7 = vmul.f32 1.442695, %v1453_v53  ;;  %1730 = vst [vmem:[%s3650_s20 + $0x100] sm:$0xff] %v2136_v56 }
 0x21a   : > { %v2140_v5 = vpop.eup %2139  ;;  %v1270_v43 = vadd.f32 %v5193_v10, %v5114_v63  ;;  %v1458_v47 = vmul.f32 %v6588_v1, %v1266_v46  ;;  %2151 = vpow2.f32 %v1586_v44  ;;  %v1594_v42 = vmul.f32 1.442695, %v1454_v15  ;;  %1731 = vst [vmem:[%s3650_s20 + $0x108] sm:$0xff] %v2138_v2  ;;  %v6590_v10 = vld [vmem:[#allocation127_spill] sm:$0xff]  ;;  %v6596_v15 = vld [vmem:[#allocation170_spill] sm:$0xff] }
 0x21b   : > { %v2142_v25 = vpop.eup %2141  ;;  %v1271_v59 = vadd.f32 %v5197_v41, %v5117_v30  ;;  %v1459_v62 = vmul.f32 %v6589_v19, %v1267_v24  ;;  %2153 = vpow2.f32 %v1588_v55  ;;  %v1596_v16 = vmul.f32 1.442695, %v1455_v38  ;;  %1732 = vst [vmem:[%s3650_s20 + $0x110] sm:$0xff] %v2140_v5  ;;  %v6591_v41 = vld [vmem:[#allocation128_spill] sm:$0xff]  ;;  %v6599_v55 = vld [vmem:[#allocation26_spill] sm:$0xff]  ;;  %v6604_v5 = vld [vmem:[#allocation105_spill] sm:$0xff] }
 0x21c   : > { %v2144_v36 = vpop.eup %2143  ;;  %v1272_v63 = vadd.f32 %v5201_v60, %v5120_v4  ;;  %v1460_v0 = vmul.f32 %v6590_v10, %v1268_v8  ;;  %2155 = vpow2.f32 %v1590_v54  ;;  %v1598_v23 = vmul.f32 1.442695, %v1456_v33  ;;  %1733 = vst [vmem:[%s3650_s20 + $0x118] sm:$0xff] %v2142_v25  ;;  %v6592_v60 = vld [vmem:[#allocation129_spill] sm:$0xff]  ;;  %v6598_v38 = vld [vmem:[#allocation24_spill] sm:$0xff]  ;;  %v6601_v33 = vld [vmem:[#allocation166_spill] sm:$0xff] }
 0x21d   : > { %v2146_v26 = vpop.eup %2145  ;;  %v1273_v30 = vadd.f32 %v5205_v51, %v5123_v31  ;;  %v1461_v9 = vmul.f32 %v6591_v41, %v1269_v50  ;;  %2157 = vpow2.f32 %v1592_v7  ;;  %v1600_v28 = vmul.f32 1.442695, %v1457_v27  ;;  %1734 = vst [vmem:[%s3650_s20 + $0x120] sm:$0xff] %v2144_v36  ;;  %v6593_v51 = vld [vmem:[#allocation130_spill] sm:$0xff]  ;;  %v6602_v54 = vld [vmem:[#allocation104_spill] sm:$0xff]  ;;  %v6603_v27 = vld [vmem:[#allocation25_spill] sm:$0xff] }
 0x21e   : > { %v2148_v18 = vpop.eup %2147  ;;  %v1274_v4 = vadd.f32 %v5209_v29, %v5126_v49  ;;  %v1462_v22 = vmul.f32 %v6592_v60, %v1270_v43  ;;  %2159 = vpow2.f32 %v1594_v42  ;;  %v1602_v57 = vmul.f32 1.442695, %v1458_v47  ;;  %1735 = vst [vmem:[%s3650_s20 + $0x128] sm:$0xff] %v2146_v26  ;;  %v6594_v29 = vld [vmem:[#allocation131_spill] sm:$0xff]  ;;  %v6605_v42 = vld [vmem:[#allocation106_spill] sm:$0xff]  ;;  %v6607_v36 = vld [vmem:[#allocation164_spill] sm:$0xff] }
 0x21f   : > { %v2150_v40 = vpop.eup %2149  ;;  %v1275_v31 = vadd.f32 %v5213_v37, %v5129_v13  ;;  %v1463_v14 = vmul.f32 %v6593_v51, %v1271_v59  ;;  %2161 = vpow2.f32 %v1596_v16  ;;  %v1604_v11 = vmul.f32 1.442695, %v1459_v62  ;;  %1736 = vst [vmem:[%s3650_s20 + $0x130] sm:$0xff] %v2148_v18  ;;  %v6595_v37 = vld [vmem:[#allocation101_spill] sm:$0xff]  ;;  %v6606_v19 = vld [vmem:[#allocation107_spill] sm:$0xff] }
 0x220   : > { %v2152_v34 = vpop.eup %2151  ;;  %v1276_v49 = vadd.f32 %v5220_v21, %v5132_v58  ;;  %v1464_v32 = vmul.f32 %v6594_v29, %v1272_v63  ;;  %2163 = vpow2.f32 %v1598_v23  ;;  %v1606_v3 = vmul.f32 1.442695, %v1460_v0  ;;  %1737 = vst [vmem:[%s3650_s20 + $0x138] sm:$0xff] %v2150_v40  ;;  %v6597_v21 = vld [vmem:[#allocation102_spill] sm:$0xff]  ;;  %v6608_v23 = vld [vmem:[#allocation165_spill] sm:$0xff] }
 0x221   : > { %v2154_v53 = vpop.eup %2153  ;;  %v1277_v13 = vadd.f32 %v5224_v6, %v5135_v61  ;;  %v1465_v52 = vmul.f32 %v6595_v37, %v1273_v30  ;;  %2165 = vpow2.f32 %v1600_v28  ;;  %v1608_v46 = vmul.f32 1.442695, %v1461_v9  ;;  %1738 = vst [vmem:[%s3650_s20 + $0x140] sm:$0xff] %v2152_v34  ;;  %v6600_v6 = vld [vmem:[#allocation103_spill] sm:$0xff] }
 0x222   : > { %v2156_v12 = vpop.eup %2155  ;;  %v1278_v58 = vadd.f32 %v5230_v35, %v6596_v15  ;;  %v1466_v44 = vmul.f32 %v6597_v21, %v1274_v4  ;;  %2167 = vpow2.f32 %v1602_v57  ;;  %v1610_v24 = vmul.f32 1.442695, %v1462_v22  ;;  %1739 = vst [vmem:[%s3650_s20 + $0x148] sm:$0xff] %v2154_v53 }
 0x223   : > { %v2158_v45 = vpop.eup %2157  ;;  %v1279_v61 = vadd.f32 %v6599_v55, %v6598_v38  ;;  %v1467_v56 = vmul.f32 %v6600_v6, %v1275_v31  ;;  %2169 = vpow2.f32 %v1604_v11  ;;  %v1612_v8 = vmul.f32 1.442695, %v1463_v14  ;;  %1740 = vst [vmem:[%s3650_s20 + $0x150] sm:$0xff] %v2156_v12 }
 0x224   : > { %v2160_v39 = vpop.eup %2159  ;;  %v1280_v35 = vadd.f32 %v5240_v48, %v6601_v33  ;;  %v1468_v2 = vmul.f32 %v6602_v54, %v1276_v49  ;;  %2171 = vpow2.f32 %v1606_v3  ;;  %v1614_v50 = vmul.f32 1.442695, %v1464_v32  ;;  %1741 = vst [vmem:[%s3650_s20 + $0x158] sm:$0xff] %v2158_v45 }
 0x225   : > { %v2162_v17 = vpop.eup %2161  ;;  %v1281_v7 = vadd.f32 %v5248_v20, %v6603_v27  ;;  %v1469_v43 = vmul.f32 %v6604_v5, %v1277_v13  ;;  %2173 = vpow2.f32 %v1608_v46  ;;  %v1616_v1 = vmul.f32 1.442695, %v1465_v52  ;;  %1742 = vst [vmem:[%s3650_s20 + $0x160] sm:$0xff] %v2160_v39 }
 0x226   : > { %v2164_v47 = vpop.eup %2163  ;;  %v1470_v25 = vmul.f32 %v6605_v42, %v1278_v58  ;;  %2175 = vpow2.f32 %v1610_v24  ;;  %v1618_v48 = vmul.f32 1.442695, %v1466_v44  ;;  %v1471_v62 = vmul.f32 %v6606_v19, %v1279_v61  ;;  %1743 = vst [vmem:[%s3650_s20 + $0x168] sm:$0xff] %v2162_v17 }
 0x227   : > { %v2166_v59 = vpop.eup %2165  ;;  %2177 = vpow2.f32 %v1612_v8  ;;  %v1620_v16 = vmul.f32 1.442695, %v1467_v56  ;;  %v1472_v63 = vmul.f32 %v6607_v36, %v1280_v35  ;;  %v1622_v10 = vmul.f32 1.442695, %v1468_v2  ;;  %1744 = vst [vmem:[%s3650_s20 + $0x170] sm:$0xff] %v2164_v47 }
 0x228   : > { %v2168_v20 = vpop.eup %2167  ;;  %2179 = vpow2.f32 %v1614_v50  ;;  %v1473_v26 = vmul.f32 %v6608_v23, %v1281_v7  ;;  %v1624_v30 = vmul.f32 1.442695, %v1469_v43  ;;  %1745 = vst [vmem:[%s3650_s20 + $0x178] sm:$0xff] %v2166_v59  ;;  %v1626_v9 = vmul.f32 1.442695, %v1470_v25 }
 0x229   : > { %v2170_v0 = vpop.eup %2169  ;;  %2181 = vpow2.f32 %v1616_v1  ;;  %1746 = vst [vmem:[%s3650_s20 + $0x180] sm:$0xff] %v2168_v20  ;;  %v1628_v18 = vmul.f32 1.442695, %v1471_v62  ;;  %v1630_v60 = vmul.f32 1.442695, %v1472_v63 }
 0x22a   : > { %v2172_v41 = vpop.eup %2171  ;;  %2183 = vpow2.f32 %v1618_v48  ;;  %1747 = vst [vmem:[%s3650_s20 + $0x188] sm:$0xff] %v2170_v0  ;;  %v1632_v57 = vmul.f32 1.442695, %v1473_v26 }
 0x22b   : > { %v2174_v28 = vpop.eup %2173  ;;  %2185 = vpow2.f32 %v1620_v16  ;;  %1748 = vst [vmem:[%s3650_s20 + $0x190] sm:$0xff] %v2172_v41 }
 0x22c   : > { %v2176_v4 = vpop.eup %2175  ;;  %2187 = vpow2.f32 %v1622_v10  ;;  %1749 = vst [vmem:[%s3650_s20 + $0x198] sm:$0xff] %v2174_v28 }
 0x22d   : > { %v2178_v22 = vpop.eup %2177  ;;  %2189 = vpow2.f32 %v1624_v30  ;;  %1750 = vst [vmem:[%s3650_s20 + $0x1a0] sm:$0xff] %v2176_v4 }
 0x22e   : > { %v2180_v40 = vpop.eup %2179  ;;  %2191 = vpow2.f32 %v1626_v9  ;;  %1751 = vst [vmem:[%s3650_s20 + $0x1a8] sm:$0xff] %v2178_v22 }
 0x22f   : > { %v2182_v31 = vpop.eup %2181  ;;  %2193 = vpow2.f32 %v1628_v18  ;;  %1752 = vst [vmem:[%s3650_s20 + $0x1b0] sm:$0xff] %v2180_v40 }
 0x230   : > { %v2184_v51 = vpop.eup %2183  ;;  %2195 = vpow2.f32 %v1630_v60  ;;  %1753 = vst [vmem:[%s3650_s20 + $0x1b8] sm:$0xff] %v2182_v31 }
 0x231   : > { %v2186_v14 = vpop.eup %2185  ;;  %2197 = vpow2.f32 %v1632_v57  ;;  %1754 = vst [vmem:[%s3650_s20 + $0x1c0] sm:$0xff] %v2184_v51 }
 0x232   : > { %v2188_v11 = vpop.eup %2187  ;;  %1755 = vst [vmem:[%s3650_s20 + $0x1c8] sm:$0xff] %v2186_v14 }
 0x233   : > { %v2190_v34 = vpop.eup %2189  ;;  %1756 = vst [vmem:[%s3650_s20 + $0x1d0] sm:$0xff] %v2188_v11 }
 0x234   : > { %v2192_v49 = vpop.eup %2191  ;;  %1757 = vst [vmem:[%s3650_s20 + $0x1d8] sm:$0xff] %v2190_v34  ;;  %1801 = sbr.rel (!%p2386_p4) target bundleno = 607 (0x25f), region = 36 }
 0x235   : > { %v2194_v29 = vpop.eup %2193  ;;  %1758 = vst [vmem:[%s3650_s20 + $0x1e0] sm:$0xff] %v2192_v49 }
 0x236   : > { %v2196_v32 = vpop.eup %2195  ;;  %1759 = vst [vmem:[%s3650_s20 + $0x1e8] sm:$0xff] %v2194_v29 }
 0x237   : > { %v2198_v3 = vpop.eup %2197  ;;  %1760 = vst [vmem:[%s3650_s20 + $0x1f0] sm:$0xff] %v2196_v32 }
 0x238   : > { %1761 = vst [vmem:[%s3650_s20 + $0x1f8] sm:$0xff] %v2198_v3 }
 0x239   : > { %s6618_s25 = smov (!%p1805_p0, %s1804_s25), 32 }
 0x23a   : > { %s1807_s26 = smul.u32 24, %s6618_s25 }
 0x23c   : > { %s1808_s27 = ssub.s32 768, %s1807_s26 }
 0x23d   : > { %s1809_s29 = sshll.u32 %s1808_s27, 4 }
 0x23e   : > { %1810 = vsyncadd %s5343_s23, %s1809_s29  ;;  %p5352_p1 = scmp.ne.s32.totalorder %s1807_s26, 0  ;;  %s1928_s19 = sshll.u32 %s2314_s12, 8 }
 0x23f   : > { %s1815_s4 = scalar_lea.hbm %s5415_s2, %s1928_s19  ;;  %s1923_s5 = sshll.u32 %s6618_s25, 3 }
 0x240   : > { %s1818_s6 = sshll.u32 %s3650_s20, 4  ;;  %s1820_s7 = sshll.u32 %s1815_s4, 4  ;;  %s5362_s6 = int_to_ptr.vmem [resolvable:$true] %s1818_s6  ;;  %s5364_s7 = int_to_ptr.hbm [resolvable:$true] %s1820_s7 }
 0x241   : > { %s5367_s8 = smul.u32 384, %s6618_s25  ;;  %s2229_s15 = sshra.s32 %s5362_s6, 4  ;;  %s2230_s15 = int_to_ptr.vmem [resolvable:$true] %s2229_s15 }
 0x242   : > { %s2328_s20 = smov [#allocation5]  }
 0x243   : > { %s2231_s12 = sshrl.u32 %s5367_s8, 4  ;;  %s2240_s26 = scalar_lea.vmem %s2328_s20, 1536 }
 0x244   : > { %s2267_s16 = sshll.u32 %s2231_s12, 4  ;;  %s2234_s18 = sadd.s32 1, %s2231_s12 }
 0x245   : > { %p2233_p2 = scmp.ne.s32.totalorder %s2267_s16, %s5367_s8 }
 0x247   : > { %s6620_s18 = smov (!%p2233_p2, %s2234_s18), %s2231_s12 }
 0x248   : > { %s2236_s24 = scalar_lea.vmem %s2230_s15, %s6620_s18 }
 0x249   : > { %p2237_p3 = scmp.ne.s32.totalorder %s2230_s15, %s2236_s24  ;;  %p2242_p6 = scmp.lt.s32.totalorder %s2240_s26, %s2236_s24 }
 0x24b   : > { %p2238_p4 = pnand %p2237_p3, %p5352_p1 }
 0x24d   : > { %p2239_p5 = pneg %p2238_p4 }
 0x24f   : > { %p2244_p7 = pnand %p2242_p6, %p2239_p5 }
 0x251   : > { %2247 = shalt.err (!%p2244_p7)
}
 0x252   : > { %s2248_s27 = sshra.s32 %s5364_s7, 4  ;;  %s2259_s3 = scalar_lea.hbm %s5415_s2, 2256  ;;  %s2249_s27 = int_to_ptr.hbm [resolvable:$true] %s2248_s27 }
 0x253   : > { %s2255_s29 = scalar_lea.hbm %s2249_s27, %s6620_s18  ;;  %p2260_p12 = scmp.lt.s32.totalorder %s2249_s27, %s5415_s2 }
 0x254   : > { %p2256_p9 = scmp.ne.s32.totalorder %s2249_s27, %s2255_s29  ;;  %p2261_p13 = scmp.lt.s32.totalorder %s2259_s3, %s2255_s29 }
 0x256   : > { %p2257_p10 = pnand %p2256_p9, %p5352_p1  ;;  %p2262_p0 = por %p2261_p13, %p2260_p12 }
 0x258   : > { %p2258_p11 = pneg %p2257_p10 }
 0x25a   : > { %p2263_p2 = pnand %p2262_p0, %p2258_p11 }
 0x25c   : > { %2266 = shalt.err (!%p2263_p2)
}
 0x25d   : > { %s2329_s12 = smov 4096   ;;  %s2330_s16 = smov 12032  }
 0x25e   : > { %1826 = dma.vmem_to_hbm [thread:$0]  (%p5352_p1), %s5362_s6, %s5367_s8, %s5364_s7, %s5343_s23, %s2329_s12, %s2330_s16, %s1923_s5  }
 0x25f PF: > { %p1945_p3 = scmp.ge.s32.totalorder %s2322_s14, 2  ;;  %s1835_s18 = sand.u32 1, %s2302_s9  }
 0x260   : > { %s1836_s24 = scalar_lea.sflag [#allocation4], %s1835_s18 }
 0x261   : > { %p1940_p4 = pnand %p1945_p3, %p2393_p8 }
 0x263   : > { %p1941_p5 = pneg %p1940_p4 }
 0x265   : > { %2297 = dma.done.wait (%p1941_p5), %s1836_s24, 12288  }
 0x266   : > { %2299 = vsyncadd (%p1941_p5), %s1836_s24, 4294955008  ;;  %s16_s14 = sadd.s32 1, %s2322_s14   ;;  %s6610_s9 = smov %s2306_s10 }
 0x267   : > { %p13_p6 = scmp.ge.s32.totalorder %s16_s14, 5   ;;  %s6611_s10 = smov %s2310_s11 }
 0x268   : > { %s6612_s11 = smov %s2399_s22  ;;  %s6613_s12 = smov %s2318_s13 }
 0x269   : > { %s6614_s13 = smov %s6616_s17  ;;  %15 = sbr.rel (!%p13_p6) target bundleno = 5 (0x5), region = 69 }
 0x26e   :  { %1842 = vsyncpa [#allocation3], 1 }
 0x26f   :  { %1844 = vsyncpa [#allocation3 + $0x1], 1 }
 0x270   :  { %1845 = vsyncpa [#allocation4], 1 }
 0x271   :  { %1847 = vsyncpa [#allocation4 + $0x1], 1 }

</bundles_post_ra>
